<compile_context>
chip_gen: v5e
topology: v5e:2x2
jax: 0.10.0
libtpu: 0.0.40
codegen_flags: <defaults>
</compile_context>

<pallas_src>
import functools
import math

import jax
import jax.numpy as jnp
from jax.experimental import pallas as pl
from jax.experimental.pallas import tpu as pltpu


def _make_divisible(v, divisor, min_value=None):
    if min_value is None:
        min_value = divisor
    new_v = max(min_value, int(v + divisor / 2) // divisor * divisor)
    if new_v < 0.9 * v:
        new_v += divisor
    return new_v


# --------------------------------------------------------------------------
# Kernel
# --------------------------------------------------------------------------
def _dw3x3(x_nhwc, w_taps, bias):
    """Depthwise 3x3 'same' conv, channels-last.

    x_nhwc: (Nb, H, W, C) f32;  w_taps: (9, C) f32 (row = kh*3+kw);  bias: (C,).
    Zero padding is built with concatenation (no scatter / masks / iota), and
    the 9 taps are plain VPU FMAs on statically-sliced views.
    """
    nb, h, w, c = x_nhwc.shape
    zw = jnp.zeros((nb, h, 1, c), x_nhwc.dtype)
    p = jnp.concatenate([zw, x_nhwc, zw], axis=2)               # (Nb, H, W+2, C)
    zh = jnp.zeros((nb, 1, w + 2, c), x_nhwc.dtype)
    p = jnp.concatenate([zh, p, zh], axis=1)                    # (Nb, H+2, W+2, C)
    acc = None
    for kh in range(3):
        for kw in range(3):
            tap = jax.lax.slice(p, (0, kh, kw, 0), (nb, kh + h, kw + w, c))
            term = tap * w_taps[kh * 3 + kw, :][None, None, None, :]
            acc = term if acc is None else acc + term
    return acc + bias[None, None, None, :]


def _ghost_bottleneck_kernel(x_ref, w1p_ref, wdw_ref, wser_ref, wsee_ref,
                             w2p_ref, bias_ref, o_ref, *, h, w):
    f32 = jnp.float32
    nb, _, hw = x_ref.shape
    c1i = w1p_ref.shape[1]                 # ghost1 init channels
    c_mid, c_r = wser_ref.shape            # SE: mid channels, reduced channels
    c2i = w2p_ref.shape[1]                 # ghost2 init channels

    x = x_ref[...]                         # (Nb, Cin, HW)
    if x.dtype != f32:                     # cast once at the HBM boundary only
        x = x.astype(f32)

    # Packed small operands (one bias slab + one depthwise-filter slab).
    biases = bias_ref[...]                                       # (6, Cmax)
    b1p, bdw1 = biases[0, :c1i], biases[1, :c1i]
    b_ser, b_see = biases[2, :c_r], biases[3, :c_mid]
    b2p, bdw2 = biases[4, :c2i], biases[5, :c2i]
    wdw = wdw_ref[...]                                           # (9, C1i+C2i)
    wdw1, wdw2 = wdw[:, :c1i], wdw[:, c1i:c1i + c2i]

    # Channels-last working view: rows = Nb*HW (MXU M dim), lanes = channels.
    x2d = jnp.concatenate([x[n].T for n in range(nb)], axis=0)   # (Nb*HW, Cin)

    # ---- ghost1 primary: 1x1 conv (BN folded) + ReLU  -> MXU matmul ----
    y1p = jnp.dot(x2d, w1p_ref[...], preferred_element_type=f32) + b1p[None, :]
    y1p = jnp.maximum(y1p, 0.0)                                  # (Nb*HW, C1i)

    # ---- ghost1 cheap op: depthwise 3x3 (BN folded) + ReLU ----
    y1c = _dw3x3(y1p.reshape(nb, h, w, c1i), wdw1, bdw1)
    y1c = jnp.maximum(y1c, 0.0).reshape(nb * hw, c1i)

    x_mid = jnp.concatenate([y1p, y1c], axis=-1)                 # (Nb*HW, Cmid)
    x_mid3 = x_mid.reshape(nb, hw, c_mid)

    # ---- SqueezeExcite ----
    # Global average pool: MXU ones-row matmul when HW is large (keeps the XLU
    # free for other work), plain cross-sublane reduce for small HW.
    if hw >= 2048:
        ones_row = jnp.ones((1, hw), dtype=f32)
        pooled = jnp.concatenate(
            [jnp.dot(ones_row, x_mid3[n], preferred_element_type=f32)
             for n in range(nb)], axis=0)                        # (Nb, Cmid)
    else:
        pooled = jnp.sum(x_mid3, axis=1)                         # (Nb, Cmid)
    mean = pooled * (1.0 / float(hw))

    s = jnp.dot(mean, wser_ref[...], preferred_element_type=f32) + b_ser[None, :]
    s = jnp.maximum(s, 0.0)                                      # (Nb, Cr)
    e = jnp.dot(s, wsee_ref[...], preferred_element_type=f32) + b_see[None, :]
    gate = jnp.clip(e + 3.0, 0.0, 6.0) * (1.0 / 6.0)             # hard_sigmoid

    x_se = (x_mid3 * gate[:, None, :]).reshape(nb * hw, c_mid)   # gated mid

    # ---- ghost2 primary: 1x1 conv (BN folded), no activation -> MXU ----
    y2p = jnp.dot(x_se, w2p_ref[...], preferred_element_type=f32) + b2p[None, :]

    # ---- ghost2 cheap op: depthwise 3x3 (BN folded), no activation ----
    y2c = _dw3x3(y2p.reshape(nb, h, w, c2i), wdw2, bdw2).reshape(nb * hw, c2i)

    out2d = jnp.concatenate([y2p, y2c], axis=-1)                 # (Nb*HW, Cout)

    # ---- identity shortcut (stride==1, in_chs==out_chs) + NCHW store ----
    # TODO(synk): the stride>1 path (conv_dw/bn_dw) and the non-identity
    # shortcut conv branch of GhostBottleneck are not implemented in-kernel.
    for n in range(nb):
        o_n = out2d[n * hw:(n + 1) * hw, :].T                    # (Cout, HW)
        o_ref[n] = (o_n + x[n]).astype(o_ref.dtype)


# --------------------------------------------------------------------------
# Wrapper: BN folding, weight packing, block sizing, pallas_call
# --------------------------------------------------------------------------
def _fold_conv_bn(wconv, gamma, beta, mean, var, eps=1e-5):
    """Fold eval-mode BatchNorm into a preceding bias-free 1x1 conv (O,I)."""
    scale = gamma / jnp.sqrt(var + eps)
    return wconv * scale[:, None], beta - mean * scale


def _fold_dw_bn(wdw, gamma, beta, mean, var, eps=1e-5):
    """Fold eval-mode BatchNorm into a preceding bias-free depthwise conv (C,3,3)."""
    scale = gamma / jnp.sqrt(var + eps)
    return wdw * scale[:, None, None], beta - mean * scale


def _pack_rows(rows, width):
    return jnp.stack([jnp.pad(r, (0, width - r.shape[0])) for r in rows], axis=0)


def _choose_block_n(n, c, hw, itemsize):
    """~2 MB x-blocks (well under v7x's 32 MiB scoped VMEM with double-buffered
    in+out), while keeping >=2 grid steps so the 'parallel' batch axis can be
    split across both v7x TensorCores (no-op on v5e/v6e)."""
    per_sample = max(1, c * hw * itemsize)
    nb = max(1, min(n, (2 * 1024 * 1024) // per_sample))
    if n >= 2:
        nb = max(1, min(nb, n // 2))
    while n % nb:
        nb -= 1
    return nb


def ghost_bottleneck(x, params, *, block_n=None):
    """Fused GhostBottleneck forward. x: (N, C_in, H, W), NCHW, stride=1."""
    N, C_in, H, W = x.shape
    HW = H * W

    # Fold BN into the convs and pre-transpose for row-major MXU matmuls.
    w1p, b1p = _fold_conv_bn(params["g1_wp"], *params["g1_bn_p"])
    wdw1, bdw1 = _fold_dw_bn(params["g1_wdw"], *params["g1_bn_c"])
    w2p, b2p = _fold_conv_bn(params["g2_wp"], *params["g2_bn_p"])
    wdw2, bdw2 = _fold_dw_bn(params["g2_wdw"], *params["g2_bn_c"])

    c1i, c2i = w1p.shape[0], w2p.shape[0]
    c_mid, c_r = params["se_we"].shape[0], params["se_wr"].shape[0]
    c_out = 2 * c2i
    assert c_out == C_in, "kernel implements the identity-shortcut configuration"
    assert 2 * c1i == c_mid and w2p.shape[1] == c_mid

    w1p_t = w1p.T                                    # (C_in, C1i)
    w2p_t = w2p.T                                    # (C_mid, C2i)
    wser_t = params["se_wr"].T                       # (C_mid, Cr)
    wsee_t = params["se_we"].T                       # (Cr, C_mid)
    wdw_t = jnp.concatenate([wdw1.reshape(c1i, 9),
                             wdw2.reshape(c2i, 9)], axis=0).T     # (9, C1i+C2i)
    cmax = max(c1i, c_r, c_mid, c2i)
    bias_pack = _pack_rows(
        [b1p, bdw1, params["se_br"], params["se_be"], b2p, bdw2], cmax)

    nb = block_n or _choose_block_n(N, C_in, HW, x.dtype.itemsize)
    assert N % nb == 0
    grid = (N // nb,)
    x_flat = x.reshape(N, C_in, HW)                  # free: NCHW is contiguous

    def full(a):
        return pl.BlockSpec(a.shape, lambda n: (0,) * a.ndim)

    out = pl.pallas_call(
        functools.partial(_ghost_bottleneck_kernel, h=H, w=W),
        out_shape=jax.ShapeDtypeStruct((N, C_in, HW), x.dtype),
        grid_spec=pltpu.PrefetchScalarGridSpec(
            num_scalar_prefetch=0,
            grid=grid,
            in_specs=[
                pl.BlockSpec((nb, C_in, HW), lambda n: (n, 0, 0)),
                full(w1p_t), full(wdw_t), full(wser_t), full(wsee_t),
                full(w2p_t), full(bias_pack),
            ],
            out_specs=pl.BlockSpec((nb, C_in, HW), lambda n: (n, 0, 0)),
        ),
        compiler_params=pltpu.CompilerParams(
            dimension_semantics=("parallel",)),
    )(x_flat, w1p_t, wdw_t, wser_t, wsee_t, w2p_t, bias_pack)

    return out.reshape(N, C_in, H, W)


# --------------------------------------------------------------------------
# Pure-JAX reference mirroring the PyTorch module (eval-mode BN)
# --------------------------------------------------------------------------
def _bn_ref(y, gamma, beta, mean, var, eps=1e-5):
    scale = gamma / jnp.sqrt(var + eps)
    return y * scale[None, :, None, None] + (beta - mean * scale)[None, :, None, None]


def _conv1x1_ref(y, wconv):
    return jnp.einsum("oi,nihw->nohw", wconv, y)


def _dwconv3x3_ref(y, wdw):
    c = y.shape[1]
    return jax.lax.conv_general_dilated(
        y, wdw[:, None, :, :], window_strides=(1, 1), padding=((1, 1), (1, 1)),
        dimension_numbers=("NCHW", "OIHW", "NCHW"), feature_group_count=c)


def _ghost_module_ref(y, wp, bn_p, wdw, bn_c, act):
    y1 = _bn_ref(_conv1x1_ref(y, wp), *bn_p)
    if act:
        y1 = jnp.maximum(y1, 0.0)
    y2 = _bn_ref(_dwconv3x3_ref(y1, wdw), *bn_c)
    if act:
        y2 = jnp.maximum(y2, 0.0)
    return jnp.concatenate([y1, y2], axis=1)


def _reference(x, p):
    residual = x
    y = _ghost_module_ref(x, p["g1_wp"], p["g1_bn_p"], p["g1_wdw"], p["g1_bn_c"], True)
    m = jnp.mean(y, axis=(2, 3))
    s = jnp.maximum(m @ p["se_wr"].T + p["se_br"], 0.0)
    e = s @ p["se_we"].T + p["se_be"]
    gate = jnp.clip(e + 3.0, 0.0, 6.0) / 6.0
    y = y * gate[:, :, None, None]
    y = _ghost_module_ref(y, p["g2_wp"], p["g2_bn_p"], p["g2_wdw"], p["g2_bn_c"], False)
    return y + residual


# --------------------------------------------------------------------------
# Demo / self-test
# --------------------------------------------------------------------------
if __name__ == "__main__":
    # GhostBottleneck(in_chs=16, mid_chs=32, out_chs=16, stride=1, se_ratio=0.25)
    in_chs, mid_chs, out_chs = 16, 32, 16
    se_ratio, divisor = 0.25, 4
    reduced_chs = _make_divisible(mid_chs * se_ratio, divisor)   # 8
    c1i = math.ceil(mid_chs / 2)                                 # ghost1 init = 16
    c2i = math.ceil(out_chs / 2)                                 # ghost2 init = 8
    N, H, W = 2, 16, 16

    keys = iter(jax.random.split(jax.random.PRNGKey(0), 32))
    nk = lambda: next(keys)
    normal = lambda shape, s=0.1: jax.random.normal(nk(), shape, jnp.float32) * s
    bn = lambda c: (jax.random.uniform(nk(), (c,), jnp.float32, 0.5, 1.5),  # gamma
                    normal((c,)),                                           # beta
                    normal((c,)),                                           # running_mean
                    jax.random.uniform(nk(), (c,), jnp.float32, 0.5, 1.5))  # running_var

    x = jax.random.normal(nk(), (N, in_chs, H, W), dtype=jnp.float32)
    params = {
        "g1_wp": normal((c1i, in_chs)),           "g1_bn_p": bn(c1i),
        "g1_wdw": normal((c1i, 3, 3)),            "g1_bn_c": bn(c1i),
        "se_wr": normal((reduced_chs, mid_chs)),  "se_br": normal((reduced_chs,)),
        "se_we": normal((mid_chs, reduced_chs)),  "se_be": normal((mid_chs,)),
        "g2_wp": normal((c2i, mid_chs)),          "g2_bn_p": bn(c2i),
        "g2_wdw": normal((c2i, 3, 3)),            "g2_bn_c": bn(c2i),
    }

    out = jax.block_until_ready(ghost_bottleneck(x, params))
    ref = _reference(x, params)

    assert out.shape == x.shape and out.dtype == x.dtype
    err = float(jnp.max(jnp.abs(out - ref)))
    # tolerance accounts for MXU default-precision f32 matmuls on both sides
    assert err < 5e-2, f"max abs err {err}"
    print("KERNEL_OK")
</pallas_src>

<mosaic_0001>
module attributes {stable_mosaic.version = 11 : i64} {
  func.func @_ghost_bottleneck_kernel(%arg0: i32, %arg1: memref<1x16x256xf32, #tpu.memory_space<vmem>>, %arg2: memref<16x16xf32, #tpu.memory_space<vmem>>, %arg3: memref<9x24xf32, #tpu.memory_space<vmem>>, %arg4: memref<32x8xf32, #tpu.memory_space<vmem>>, %arg5: memref<8x32xf32, #tpu.memory_space<vmem>>, %arg6: memref<32x8xf32, #tpu.memory_space<vmem>>, %arg7: memref<6x32xf32, #tpu.memory_space<vmem>>, %arg8: memref<1x16x256xf32, #tpu.memory_space<vmem>>) attributes {dimension_semantics = [#tpu.dimension_semantics<parallel>], iteration_bounds = array<i64: 2>, scalar_prefetch = 0 : i64, scratch_operands = 0 : i64, tpu.core_type = #tpu.core_type<tc>, window_params = [{transform_indices = @transform_0, window_bounds = array<i64: 1, 16, 256>}, {pipeline_mode = #tpu.pipeline_mode<synchronous>, transform_indices = @transform_1, window_bounds = array<i64: 16, 16>}, {pipeline_mode = #tpu.pipeline_mode<synchronous>, transform_indices = @transform_2, window_bounds = array<i64: 9, 24>}, {pipeline_mode = #tpu.pipeline_mode<synchronous>, transform_indices = @transform_3, window_bounds = array<i64: 32, 8>}, {pipeline_mode = #tpu.pipeline_mode<synchronous>, transform_indices = @transform_4, window_bounds = array<i64: 8, 32>}, {pipeline_mode = #tpu.pipeline_mode<synchronous>, transform_indices = @transform_5, window_bounds = array<i64: 32, 8>}, {pipeline_mode = #tpu.pipeline_mode<synchronous>, transform_indices = @transform_6, window_bounds = array<i64: 6, 32>}, {transform_indices = @transform_7, window_bounds = array<i64: 1, 16, 256>}]} {
    %c0 = arith.constant 0 : index
    %c0_0 = arith.constant 0 : index
    %c0_1 = arith.constant 0 : index
    %0 = vector.load %arg1[%c0, %c0_0, %c0_1] : memref<1x16x256xf32, #tpu.memory_space<vmem>>, vector<1x16x256xf32>
    %c0_2 = arith.constant 0 : index
    %c0_3 = arith.constant 0 : index
    %1 = vector.load %arg7[%c0_2, %c0_3] : memref<6x32xf32, #tpu.memory_space<vmem>>, vector<6x32xf32>
    %2 = vector.extract_strided_slice %1 {offsets = [0, 0], sizes = [1, 16], strides = [1, 1]} : vector<6x32xf32> to vector<1x16xf32>
    %3 = vector.shape_cast %2 : vector<1x16xf32> to vector<16xf32>
    %4 = vector.extract_strided_slice %1 {offsets = [1, 0], sizes = [1, 16], strides = [1, 1]} : vector<6x32xf32> to vector<1x16xf32>
    %5 = vector.shape_cast %4 : vector<1x16xf32> to vector<16xf32>
    %6 = vector.extract_strided_slice %1 {offsets = [2, 0], sizes = [1, 8], strides = [1, 1]} : vector<6x32xf32> to vector<1x8xf32>
    %7 = vector.shape_cast %6 : vector<1x8xf32> to vector<8xf32>
    %8 = vector.extract_strided_slice %1 {offsets = [3, 0], sizes = [1, 32], strides = [1, 1]} : vector<6x32xf32> to vector<1x32xf32>
    %9 = vector.shape_cast %8 : vector<1x32xf32> to vector<32xf32>
    %10 = vector.extract_strided_slice %1 {offsets = [4, 0], sizes = [1, 8], strides = [1, 1]} : vector<6x32xf32> to vector<1x8xf32>
    %11 = vector.shape_cast %10 : vector<1x8xf32> to vector<8xf32>
    %12 = vector.extract_strided_slice %1 {offsets = [5, 0], sizes = [1, 8], strides = [1, 1]} : vector<6x32xf32> to vector<1x8xf32>
    %13 = vector.shape_cast %12 : vector<1x8xf32> to vector<8xf32>
    %c0_4 = arith.constant 0 : index
    %c0_5 = arith.constant 0 : index
    %14 = vector.load %arg3[%c0_4, %c0_5] : memref<9x24xf32, #tpu.memory_space<vmem>>, vector<9x24xf32>
    %15 = vector.extract_strided_slice %14 {offsets = [0, 0], sizes = [9, 16], strides = [1, 1]} : vector<9x24xf32> to vector<9x16xf32>
    %16 = vector.extract_strided_slice %14 {offsets = [0, 16], sizes = [9, 8], strides = [1, 1]} : vector<9x24xf32> to vector<9x8xf32>
    %17 = vector.shape_cast %0 : vector<1x16x256xf32> to vector<16x256xf32>
    %18 = tpu.transpose %17, [1, 0] : vector<16x256xf32> -> vector<256x16xf32>
    %c0_6 = arith.constant 0 : index
    %c0_7 = arith.constant 0 : index
    %19 = vector.load %arg2[%c0_6, %c0_7] : memref<16x16xf32, #tpu.memory_space<vmem>>, vector<16x16xf32>
    %cst = arith.constant dense<0.000000e+00> : vector<256x16xf32>
    %20 = tpu.matmul %18, %19, %cst {dimension_numbers = #tpu.dot_dimension_numbers<[1], [0], [0], [1], [0, 0, 1, 1], [], []>} : vector<256x16xf32>, vector<16x16xf32>, vector<256x16xf32> -> vector<256x16xf32>
    %21 = vector.shape_cast %3 : vector<16xf32> to vector<1x16xf32>
    %22 = vector.broadcast %21 : vector<1x16xf32> to vector<256x16xf32>
    %23 = arith.addf %20, %22 : vector<256x16xf32>
    %cst_8 = arith.constant 0.000000e+00 : f32
    %24 = vector.broadcast %cst_8 : f32 to vector<256x16xf32>
    %25 = arith.maximumf %23, %24 : vector<256x16xf32>
    %26 = vector.shape_cast %25 : vector<256x16xf32> to vector<1x16x16x16xf32>
    %cst_9 = arith.constant 0.000000e+00 : f32
    %27 = vector.broadcast %cst_9 : f32 to vector<1x16x1x16xf32>
    %28 = tpu.concatenate %27, %26, %27 in 2 : vector<1x16x1x16xf32>, vector<1x16x16x16xf32>, vector<1x16x1x16xf32> -> vector<1x16x18x16xf32>
    %cst_10 = arith.constant 0.000000e+00 : f32
    %29 = vector.broadcast %cst_10 : f32 to vector<1x1x18x16xf32>
    %30 = tpu.concatenate %29, %28, %29 in 1 : vector<1x1x18x16xf32>, vector<1x16x18x16xf32>, vector<1x1x18x16xf32> -> vector<1x18x18x16xf32>
    %31 = vector.extract_strided_slice %30 {offsets = [0, 0, 0, 0], sizes = [1, 16, 16, 16], strides = [1, 1, 1, 1]} : vector<1x18x18x16xf32> to vector<1x16x16x16xf32>
    %32 = vector.extract_strided_slice %15 {offsets = [0, 0], sizes = [1, 16], strides = [1, 1]} : vector<9x16xf32> to vector<1x16xf32>
    %33 = vector.shape_cast %32 : vector<1x16xf32> to vector<16xf32>
    %34 = vector.shape_cast %33 : vector<16xf32> to vector<1x1x1x16xf32>
    %35 = vector.broadcast %34 : vector<1x1x1x16xf32> to vector<1x16x16x16xf32>
    %36 = arith.mulf %31, %35 : vector<1x16x16x16xf32>
    %37 = vector.extract_strided_slice %30 {offsets = [0, 0, 1, 0], sizes = [1, 16, 16, 16], strides = [1, 1, 1, 1]} : vector<1x18x18x16xf32> to vector<1x16x16x16xf32>
    %38 = vector.extract_strided_slice %15 {offsets = [1, 0], sizes = [1, 16], strides = [1, 1]} : vector<9x16xf32> to vector<1x16xf32>
    %39 = vector.shape_cast %38 : vector<1x16xf32> to vector<16xf32>
    %40 = vector.shape_cast %39 : vector<16xf32> to vector<1x1x1x16xf32>
    %41 = vector.broadcast %40 : vector<1x1x1x16xf32> to vector<1x16x16x16xf32>
    %42 = arith.mulf %37, %41 : vector<1x16x16x16xf32>
    %43 = arith.addf %36, %42 : vector<1x16x16x16xf32>
    %44 = vector.extract_strided_slice %30 {offsets = [0, 0, 2, 0], sizes = [1, 16, 16, 16], strides = [1, 1, 1, 1]} : vector<1x18x18x16xf32> to vector<1x16x16x16xf32>
    %45 = vector.extract_strided_slice %15 {offsets = [2, 0], sizes = [1, 16], strides = [1, 1]} : vector<9x16xf32> to vector<1x16xf32>
    %46 = vector.shape_cast %45 : vector<1x16xf32> to vector<16xf32>
    %47 = vector.shape_cast %46 : vector<16xf32> to vector<1x1x1x16xf32>
    %48 = vector.broadcast %47 : vector<1x1x1x16xf32> to vector<1x16x16x16xf32>
    %49 = arith.mulf %44, %48 : vector<1x16x16x16xf32>
    %50 = arith.addf %43, %49 : vector<1x16x16x16xf32>
    %51 = vector.extract_strided_slice %30 {offsets = [0, 1, 0, 0], sizes = [1, 16, 16, 16], strides = [1, 1, 1, 1]} : vector<1x18x18x16xf32> to vector<1x16x16x16xf32>
    %52 = vector.extract_strided_slice %15 {offsets = [3, 0], sizes = [1, 16], strides = [1, 1]} : vector<9x16xf32> to vector<1x16xf32>
    %53 = vector.shape_cast %52 : vector<1x16xf32> to vector<16xf32>
    %54 = vector.shape_cast %53 : vector<16xf32> to vector<1x1x1x16xf32>
    %55 = vector.broadcast %54 : vector<1x1x1x16xf32> to vector<1x16x16x16xf32>
    %56 = arith.mulf %51, %55 : vector<1x16x16x16xf32>
    %57 = arith.addf %50, %56 : vector<1x16x16x16xf32>
    %58 = vector.extract_strided_slice %30 {offsets = [0, 1, 1, 0], sizes = [1, 16, 16, 16], strides = [1, 1, 1, 1]} : vector<1x18x18x16xf32> to vector<1x16x16x16xf32>
    %59 = vector.extract_strided_slice %15 {offsets = [4, 0], sizes = [1, 16], strides = [1, 1]} : vector<9x16xf32> to vector<1x16xf32>
    %60 = vector.shape_cast %59 : vector<1x16xf32> to vector<16xf32>
    %61 = vector.shape_cast %60 : vector<16xf32> to vector<1x1x1x16xf32>
    %62 = vector.broadcast %61 : vector<1x1x1x16xf32> to vector<1x16x16x16xf32>
    %63 = arith.mulf %58, %62 : vector<1x16x16x16xf32>
    %64 = arith.addf %57, %63 : vector<1x16x16x16xf32>
    %65 = vector.extract_strided_slice %30 {offsets = [0, 1, 2, 0], sizes = [1, 16, 16, 16], strides = [1, 1, 1, 1]} : vector<1x18x18x16xf32> to vector<1x16x16x16xf32>
    %66 = vector.extract_strided_slice %15 {offsets = [5, 0], sizes = [1, 16], strides = [1, 1]} : vector<9x16xf32> to vector<1x16xf32>
    %67 = vector.shape_cast %66 : vector<1x16xf32> to vector<16xf32>
    %68 = vector.shape_cast %67 : vector<16xf32> to vector<1x1x1x16xf32>
    %69 = vector.broadcast %68 : vector<1x1x1x16xf32> to vector<1x16x16x16xf32>
    %70 = arith.mulf %65, %69 : vector<1x16x16x16xf32>
    %71 = arith.addf %64, %70 : vector<1x16x16x16xf32>
    %72 = vector.extract_strided_slice %30 {offsets = [0, 2, 0, 0], sizes = [1, 16, 16, 16], strides = [1, 1, 1, 1]} : vector<1x18x18x16xf32> to vector<1x16x16x16xf32>
    %73 = vector.extract_strided_slice %15 {offsets = [6, 0], sizes = [1, 16], strides = [1, 1]} : vector<9x16xf32> to vector<1x16xf32>
    %74 = vector.shape_cast %73 : vector<1x16xf32> to vector<16xf32>
    %75 = vector.shape_cast %74 : vector<16xf32> to vector<1x1x1x16xf32>
    %76 = vector.broadcast %75 : vector<1x1x1x16xf32> to vector<1x16x16x16xf32>
    %77 = arith.mulf %72, %76 : vector<1x16x16x16xf32>
    %78 = arith.addf %71, %77 : vector<1x16x16x16xf32>
    %79 = vector.extract_strided_slice %30 {offsets = [0, 2, 1, 0], sizes = [1, 16, 16, 16], strides = [1, 1, 1, 1]} : vector<1x18x18x16xf32> to vector<1x16x16x16xf32>
    %80 = vector.extract_strided_slice %15 {offsets = [7, 0], sizes = [1, 16], strides = [1, 1]} : vector<9x16xf32> to vector<1x16xf32>
    %81 = vector.shape_cast %80 : vector<1x16xf32> to vector<16xf32>
    %82 = vector.shape_cast %81 : vector<16xf32> to vector<1x1x1x16xf32>
    %83 = vector.broadcast %82 : vector<1x1x1x16xf32> to vector<1x16x16x16xf32>
    %84 = arith.mulf %79, %83 : vector<1x16x16x16xf32>
    %85 = arith.addf %78, %84 : vector<1x16x16x16xf32>
    %86 = vector.extract_strided_slice %30 {offsets = [0, 2, 2, 0], sizes = [1, 16, 16, 16], strides = [1, 1, 1, 1]} : vector<1x18x18x16xf32> to vector<1x16x16x16xf32>
    %87 = vector.extract_strided_slice %15 {offsets = [8, 0], sizes = [1, 16], strides = [1, 1]} : vector<9x16xf32> to vector<1x16xf32>
    %88 = vector.shape_cast %87 : vector<1x16xf32> to vector<16xf32>
    %89 = vector.shape_cast %88 : vector<16xf32> to vector<1x1x1x16xf32>
    %90 = vector.broadcast %89 : vector<1x1x1x16xf32> to vector<1x16x16x16xf32>
    %91 = arith.mulf %86, %90 : vector<1x16x16x16xf32>
    %92 = arith.addf %85, %91 : vector<1x16x16x16xf32>
    %93 = vector.shape_cast %5 : vector<16xf32> to vector<1x1x1x16xf32>
    %94 = vector.broadcast %93 : vector<1x1x1x16xf32> to vector<1x16x16x16xf32>
    %95 = arith.addf %92, %94 : vector<1x16x16x16xf32>
    %cst_11 = arith.constant 0.000000e+00 : f32
    %96 = vector.broadcast %cst_11 : f32 to vector<1x16x16x16xf32>
    %97 = arith.maximumf %95, %96 : vector<1x16x16x16xf32>
    %98 = vector.shape_cast %97 : vector<1x16x16x16xf32> to vector<256x16xf32>
    %99 = tpu.concatenate %25, %98 in 1 : vector<256x16xf32>, vector<256x16xf32> -> vector<256x32xf32>
    %100 = vector.shape_cast %99 : vector<256x32xf32> to vector<1x256x32xf32>
    %cst_12 = arith.constant dense<0.000000e+00> : vector<1x32xf32>
    %101 = vector.multi_reduction <add>, %100, %cst_12 [1] : vector<1x256x32xf32> to vector<1x32xf32>
    %cst_13 = arith.constant 3.906250e-03 : f32
    %102 = vector.broadcast %cst_13 : f32 to vector<1x32xf32>
    %103 = arith.mulf %101, %102 : vector<1x32xf32>
    %c0_14 = arith.constant 0 : index
    %c0_15 = arith.constant 0 : index
    %104 = vector.load %arg4[%c0_14, %c0_15] : memref<32x8xf32, #tpu.memory_space<vmem>>, vector<32x8xf32>
    %cst_16 = arith.constant dense<0.000000e+00> : vector<1x8xf32>
    %105 = tpu.matmul %103, %104, %cst_16 {dimension_numbers = #tpu.dot_dimension_numbers<[1], [0], [0], [1], [0, 0, 1, 1], [], []>} : vector<1x32xf32>, vector<32x8xf32>, vector<1x8xf32> -> vector<1x8xf32>
    %106 = vector.shape_cast %7 : vector<8xf32> to vector<1x8xf32>
    %107 = arith.addf %105, %106 : vector<1x8xf32>
    %cst_17 = arith.constant 0.000000e+00 : f32
    %108 = vector.broadcast %cst_17 : f32 to vector<1x8xf32>
    %109 = arith.maximumf %107, %108 : vector<1x8xf32>
    %c0_18 = arith.constant 0 : index
    %c0_19 = arith.constant 0 : index
    %110 = vector.load %arg5[%c0_18, %c0_19] : memref<8x32xf32, #tpu.memory_space<vmem>>, vector<8x32xf32>
    %cst_20 = arith.constant dense<0.000000e+00> : vector<1x32xf32>
    %111 = tpu.matmul %109, %110, %cst_20 {dimension_numbers = #tpu.dot_dimension_numbers<[1], [0], [0], [1], [0, 0, 1, 1], [], []>} : vector<1x8xf32>, vector<8x32xf32>, vector<1x32xf32> -> vector<1x32xf32>
    %112 = vector.shape_cast %9 : vector<32xf32> to vector<1x32xf32>
    %113 = arith.addf %111, %112 : vector<1x32xf32>
    %cst_21 = arith.constant 3.000000e+00 : f32
    %114 = vector.broadcast %cst_21 : f32 to vector<1x32xf32>
    %115 = arith.addf %113, %114 : vector<1x32xf32>
    %cst_22 = arith.constant 0.000000e+00 : f32
    %cst_23 = arith.constant 6.000000e+00 : f32
    %116 = vector.broadcast %cst_22 : f32 to vector<1x32xf32>
    %117 = arith.maximumf %116, %115 : vector<1x32xf32>
    %118 = vector.broadcast %cst_23 : f32 to vector<1x32xf32>
    %119 = arith.minimumf %118, %117 : vector<1x32xf32>
    %cst_24 = arith.constant 0.166666672 : f32
    %120 = vector.broadcast %cst_24 : f32 to vector<1x32xf32>
    %121 = arith.mulf %119, %120 : vector<1x32xf32>
    %122 = vector.shape_cast %121 : vector<1x32xf32> to vector<1x1x32xf32>
    %123 = vector.broadcast %122 : vector<1x1x32xf32> to vector<1x256x32xf32>
    %124 = arith.mulf %100, %123 : vector<1x256x32xf32>
    %125 = vector.shape_cast %124 : vector<1x256x32xf32> to vector<256x32xf32>
    %c0_25 = arith.constant 0 : index
    %c0_26 = arith.constant 0 : index
    %126 = vector.load %arg6[%c0_25, %c0_26] : memref<32x8xf32, #tpu.memory_space<vmem>>, vector<32x8xf32>
    %cst_27 = arith.constant dense<0.000000e+00> : vector<256x8xf32>
    %127 = tpu.matmul %125, %126, %cst_27 {dimension_numbers = #tpu.dot_dimension_numbers<[1], [0], [0], [1], [0, 0, 1, 1], [], []>} : vector<256x32xf32>, vector<32x8xf32>, vector<256x8xf32> -> vector<256x8xf32>
    %128 = vector.shape_cast %11 : vector<8xf32> to vector<1x8xf32>
    %129 = vector.broadcast %128 : vector<1x8xf32> to vector<256x8xf32>
    %130 = arith.addf %127, %129 : vector<256x8xf32>
    %131 = vector.shape_cast %130 : vector<256x8xf32> to vector<1x16x16x8xf32>
    %cst_28 = arith.constant 0.000000e+00 : f32
    %132 = vector.broadcast %cst_28 : f32 to vector<1x16x1x8xf32>
    %133 = tpu.concatenate %132, %131, %132 in 2 : vector<1x16x1x8xf32>, vector<1x16x16x8xf32>, vector<1x16x1x8xf32> -> vector<1x16x18x8xf32>
    %cst_29 = arith.constant 0.000000e+00 : f32
    %134 = vector.broadcast %cst_29 : f32 to vector<1x1x18x8xf32>
    %135 = tpu.concatenate %134, %133, %134 in 1 : vector<1x1x18x8xf32>, vector<1x16x18x8xf32>, vector<1x1x18x8xf32> -> vector<1x18x18x8xf32>
    %136 = vector.extract_strided_slice %135 {offsets = [0, 0, 0, 0], sizes = [1, 16, 16, 8], strides = [1, 1, 1, 1]} : vector<1x18x18x8xf32> to vector<1x16x16x8xf32>
    %137 = vector.extract_strided_slice %16 {offsets = [0, 0], sizes = [1, 8], strides = [1, 1]} : vector<9x8xf32> to vector<1x8xf32>
    %138 = vector.shape_cast %137 : vector<1x8xf32> to vector<8xf32>
    %139 = vector.shape_cast %138 : vector<8xf32> to vector<1x1x1x8xf32>
    %140 = vector.broadcast %139 : vector<1x1x1x8xf32> to vector<1x16x16x8xf32>
    %141 = arith.mulf %136, %140 : vector<1x16x16x8xf32>
    %142 = vector.extract_strided_slice %135 {offsets = [0, 0, 1, 0], sizes = [1, 16, 16, 8], strides = [1, 1, 1, 1]} : vector<1x18x18x8xf32> to vector<1x16x16x8xf32>
    %143 = vector.extract_strided_slice %16 {offsets = [1, 0], sizes = [1, 8], strides = [1, 1]} : vector<9x8xf32> to vector<1x8xf32>
    %144 = vector.shape_cast %143 : vector<1x8xf32> to vector<8xf32>
    %145 = vector.shape_cast %144 : vector<8xf32> to vector<1x1x1x8xf32>
    %146 = vector.broadcast %145 : vector<1x1x1x8xf32> to vector<1x16x16x8xf32>
    %147 = arith.mulf %142, %146 : vector<1x16x16x8xf32>
    %148 = arith.addf %141, %147 : vector<1x16x16x8xf32>
    %149 = vector.extract_strided_slice %135 {offsets = [0, 0, 2, 0], sizes = [1, 16, 16, 8], strides = [1, 1, 1, 1]} : vector<1x18x18x8xf32> to vector<1x16x16x8xf32>
    %150 = vector.extract_strided_slice %16 {offsets = [2, 0], sizes = [1, 8], strides = [1, 1]} : vector<9x8xf32> to vector<1x8xf32>
    %151 = vector.shape_cast %150 : vector<1x8xf32> to vector<8xf32>
    %152 = vector.shape_cast %151 : vector<8xf32> to vector<1x1x1x8xf32>
    %153 = vector.broadcast %152 : vector<1x1x1x8xf32> to vector<1x16x16x8xf32>
    %154 = arith.mulf %149, %153 : vector<1x16x16x8xf32>
    %155 = arith.addf %148, %154 : vector<1x16x16x8xf32>
    %156 = vector.extract_strided_slice %135 {offsets = [0, 1, 0, 0], sizes = [1, 16, 16, 8], strides = [1, 1, 1, 1]} : vector<1x18x18x8xf32> to vector<1x16x16x8xf32>
    %157 = vector.extract_strided_slice %16 {offsets = [3, 0], sizes = [1, 8], strides = [1, 1]} : vector<9x8xf32> to vector<1x8xf32>
    %158 = vector.shape_cast %157 : vector<1x8xf32> to vector<8xf32>
    %159 = vector.shape_cast %158 : vector<8xf32> to vector<1x1x1x8xf32>
    %160 = vector.broadcast %159 : vector<1x1x1x8xf32> to vector<1x16x16x8xf32>
    %161 = arith.mulf %156, %160 : vector<1x16x16x8xf32>
    %162 = arith.addf %155, %161 : vector<1x16x16x8xf32>
    %163 = vector.extract_strided_slice %135 {offsets = [0, 1, 1, 0], sizes = [1, 16, 16, 8], strides = [1, 1, 1, 1]} : vector<1x18x18x8xf32> to vector<1x16x16x8xf32>
    %164 = vector.extract_strided_slice %16 {offsets = [4, 0], sizes = [1, 8], strides = [1, 1]} : vector<9x8xf32> to vector<1x8xf32>
    %165 = vector.shape_cast %164 : vector<1x8xf32> to vector<8xf32>
    %166 = vector.shape_cast %165 : vector<8xf32> to vector<1x1x1x8xf32>
    %167 = vector.broadcast %166 : vector<1x1x1x8xf32> to vector<1x16x16x8xf32>
    %168 = arith.mulf %163, %167 : vector<1x16x16x8xf32>
    %169 = arith.addf %162, %168 : vector<1x16x16x8xf32>
    %170 = vector.extract_strided_slice %135 {offsets = [0, 1, 2, 0], sizes = [1, 16, 16, 8], strides = [1, 1, 1, 1]} : vector<1x18x18x8xf32> to vector<1x16x16x8xf32>
    %171 = vector.extract_strided_slice %16 {offsets = [5, 0], sizes = [1, 8], strides = [1, 1]} : vector<9x8xf32> to vector<1x8xf32>
    %172 = vector.shape_cast %171 : vector<1x8xf32> to vector<8xf32>
    %173 = vector.shape_cast %172 : vector<8xf32> to vector<1x1x1x8xf32>
    %174 = vector.broadcast %173 : vector<1x1x1x8xf32> to vector<1x16x16x8xf32>
    %175 = arith.mulf %170, %174 : vector<1x16x16x8xf32>
    %176 = arith.addf %169, %175 : vector<1x16x16x8xf32>
    %177 = vector.extract_strided_slice %135 {offsets = [0, 2, 0, 0], sizes = [1, 16, 16, 8], strides = [1, 1, 1, 1]} : vector<1x18x18x8xf32> to vector<1x16x16x8xf32>
    %178 = vector.extract_strided_slice %16 {offsets = [6, 0], sizes = [1, 8], strides = [1, 1]} : vector<9x8xf32> to vector<1x8xf32>
    %179 = vector.shape_cast %178 : vector<1x8xf32> to vector<8xf32>
    %180 = vector.shape_cast %179 : vector<8xf32> to vector<1x1x1x8xf32>
    %181 = vector.broadcast %180 : vector<1x1x1x8xf32> to vector<1x16x16x8xf32>
    %182 = arith.mulf %177, %181 : vector<1x16x16x8xf32>
    %183 = arith.addf %176, %182 : vector<1x16x16x8xf32>
    %184 = vector.extract_strided_slice %135 {offsets = [0, 2, 1, 0], sizes = [1, 16, 16, 8], strides = [1, 1, 1, 1]} : vector<1x18x18x8xf32> to vector<1x16x16x8xf32>
    %185 = vector.extract_strided_slice %16 {offsets = [7, 0], sizes = [1, 8], strides = [1, 1]} : vector<9x8xf32> to vector<1x8xf32>
    %186 = vector.shape_cast %185 : vector<1x8xf32> to vector<8xf32>
    %187 = vector.shape_cast %186 : vector<8xf32> to vector<1x1x1x8xf32>
    %188 = vector.broadcast %187 : vector<1x1x1x8xf32> to vector<1x16x16x8xf32>
    %189 = arith.mulf %184, %188 : vector<1x16x16x8xf32>
    %190 = arith.addf %183, %189 : vector<1x16x16x8xf32>
    %191 = vector.extract_strided_slice %135 {offsets = [0, 2, 2, 0], sizes = [1, 16, 16, 8], strides = [1, 1, 1, 1]} : vector<1x18x18x8xf32> to vector<1x16x16x8xf32>
    %192 = vector.extract_strided_slice %16 {offsets = [8, 0], sizes = [1, 8], strides = [1, 1]} : vector<9x8xf32> to vector<1x8xf32>
    %193 = vector.shape_cast %192 : vector<1x8xf32> to vector<8xf32>
    %194 = vector.shape_cast %193 : vector<8xf32> to vector<1x1x1x8xf32>
    %195 = vector.broadcast %194 : vector<1x1x1x8xf32> to vector<1x16x16x8xf32>
    %196 = arith.mulf %191, %195 : vector<1x16x16x8xf32>
    %197 = arith.addf %190, %196 : vector<1x16x16x8xf32>
    %198 = vector.shape_cast %13 : vector<8xf32> to vector<1x1x1x8xf32>
    %199 = vector.broadcast %198 : vector<1x1x1x8xf32> to vector<1x16x16x8xf32>
    %200 = arith.addf %197, %199 : vector<1x16x16x8xf32>
    %201 = vector.shape_cast %200 : vector<1x16x16x8xf32> to vector<256x8xf32>
    %202 = tpu.concatenate %130, %201 in 1 : vector<256x8xf32>, vector<256x8xf32> -> vector<256x16xf32>
    %203 = tpu.transpose %202, [1, 0] : vector<256x16xf32> -> vector<16x256xf32>
    %204 = vector.shape_cast %0 : vector<1x16x256xf32> to vector<16x256xf32>
    %205 = arith.addf %203, %204 : vector<16x256xf32>
    %c0_30 = arith.constant 0 : index
    %c0_31 = arith.constant 0 : index
    %c0_32 = arith.constant 0 : index
    %206 = vector.load %arg8[%c0_30, %c0_31, %c0_32] : memref<1x16x256xf32, #tpu.memory_space<vmem>>, vector<1x16x256xf32>
    %207 = vector.shape_cast %206 : vector<1x16x256xf32> to vector<16x256xf32>
    %208 = vector.shape_cast %205 : vector<16x256xf32> to vector<1x16x256xf32>
    tpu.vector_store %arg8[%c0_30, %c0_31, %c0_32], %208 {strides = array<i32>} : memref<1x16x256xf32, #tpu.memory_space<vmem>>, vector<1x16x256xf32>,
    return
  }
  func.func @transform_0(%arg0: i32) -> (i32, i32, i32) {
    %c0_i32 = arith.constant 0 : i32
    %c0_i32_0 = arith.constant 0 : i32
    %c0_i32_1 = arith.constant 0 : i32
    return %arg0, %c0_i32, %c0_i32_0 : i32, i32, i32
  }
  func.func @transform_1(%arg0: i32) -> (i32, i32) {
    %c0_i32 = arith.constant 0 : i32
    %c0_i32_0 = arith.constant 0 : i32
    %c0_i32_1 = arith.constant 0 : i32
    return %c0_i32, %c0_i32_0 : i32, i32
  }
  func.func @transform_2(%arg0: i32) -> (i32, i32) {
    %c0_i32 = arith.constant 0 : i32
    %c0_i32_0 = arith.constant 0 : i32
    %c0_i32_1 = arith.constant 0 : i32
    return %c0_i32, %c0_i32_0 : i32, i32
  }
  func.func @transform_3(%arg0: i32) -> (i32, i32) {
    %c0_i32 = arith.constant 0 : i32
    %c0_i32_0 = arith.constant 0 : i32
    %c0_i32_1 = arith.constant 0 : i32
    return %c0_i32, %c0_i32_0 : i32, i32
  }
  func.func @transform_4(%arg0: i32) -> (i32, i32) {
    %c0_i32 = arith.constant 0 : i32
    %c0_i32_0 = arith.constant 0 : i32
    %c0_i32_1 = arith.constant 0 : i32
    return %c0_i32, %c0_i32_0 : i32, i32
  }
  func.func @transform_5(%arg0: i32) -> (i32, i32) {
    %c0_i32 = arith.constant 0 : i32
    %c0_i32_0 = arith.constant 0 : i32
    %c0_i32_1 = arith.constant 0 : i32
    return %c0_i32, %c0_i32_0 : i32, i32
  }
  func.func @transform_6(%arg0: i32) -> (i32, i32) {
    %c0_i32 = arith.constant 0 : i32
    %c0_i32_0 = arith.constant 0 : i32
    %c0_i32_1 = arith.constant 0 : i32
    return %c0_i32, %c0_i32_0 : i32, i32
  }
  func.func @transform_7(%arg0: i32) -> (i32, i32, i32) {
    %c0_i32 = arith.constant 0 : i32
    %c0_i32_0 = arith.constant 0 : i32
    %c0_i32_1 = arith.constant 0 : i32
    return %arg0, %c0_i32, %c0_i32_0 : i32, i32, i32
  }
}

</mosaic_0001>

<bundles_post_ra>
// kernel: tpu_custom_call.1
= control target key start
LH: loop header
LB: loop body
LE: loop exit
PB: predicated region body
PF: predicated region fallthrough
CT: control target
= control target key end

     0   :  { %s10210_s0 = inlined_call_operand.vmem [shape: f32[2,16,256], index: 0, kind: input, shape index: {}]   ;;  %s10211_s1 = inlined_call_operand.hbm [shape: f32[16,16], index: 1, kind: input, shape index: {}]   ;;  %s10212_s2 = inlined_call_operand.hbm [shape: f32[9,24], index: 2, kind: input, shape index: {}]   ;;  %s10213_s3 = inlined_call_operand.vmem [shape: f32[32,8], index: 3, kind: input, shape index: {}]   ;;  %s10214_s4 = inlined_call_operand.vmem [shape: f32[8,32], index: 4, kind: input, shape index: {}]   ;;  %s10215_s5 = inlined_call_operand.vmem [shape: f32[32,8], index: 5, kind: input, shape index: {}]   ;;  %s10216_s6 = inlined_call_operand.hbm [shape: f32[6,32], index: 6, kind: input, shape index: {}]   ;;  %s10217_s7 = inlined_call_operand.hbm [shape: f32[2,16,256], index: 7, kind: output, shape index: {}]  }
   0x1   :  { %10492 = sst [smem:[#allocation131_spill]] %s10211_s1 }
   0x2   :  { %12 = vsyncpa [#allocation3], 0 }
   0x3   :  { %13 = vsyncpa [#allocation6], 0 }
   0x4   :  { %14 = vsyncpa [#allocation4], 0 }
   0x5   :  { %16 = vsyncpa [#allocation4 + $0x1], 0  ;;  %s5504_s24 = smov 0   ;;  %s5506_s25 = smov 0  }
   0x6   :  { %s5508_s26 = smov 0   ;;  %s5510_s27 = smov 0  }
   0x7 LB: > { %s5525_s28 = sadd.s32 4294967295, %s5453_s27   ;;  %s5116_s29 = sadd.s32 4294967294, %s5453_s27   ;;  %s5453_s27 = sphi %s5510_s27, %s11243_s27   ;;  %s5449_s26 = sphi %s5508_s26, %s11242_s26   ;;  %s5445_s25 = sphi %s5506_s25, %s11241_s25   ;;  %s5441_s24 = sphi %s5504_s24, %s11240_s24  }
   0x8   : > { %s5529_s30 = sadd.s32 1, %s5453_s27   ;;  %s181_s8 = sadd.s32 1, %s5449_s26 }
   0x9   : > { %s178_s9 = ssub.s32 %s5453_s27, %s5529_s30  ;;  %p191_p0 = scmp.ne.s32.totalorder %s5449_s26, %s5445_s25 }
   0xa   : > { %p179_p1 = scmp.eq.s32.totalorder %s178_s9, 0  ;;  %p192_p2 = scmp.eq.s32.totalorder %s5525_s28, 1 }
   0xb   : > { %p197_p3 = scmp.ne.s32.totalorder %s5445_s25, %s5441_s24  ;;  %p198_p4 = scmp.eq.s32.totalorder %s5116_s29, 1 }
   0xc   : > { %s5540_s10 = scalar_select %p179_p1, %s5449_s26, %s181_s8  }
   0xd   : > { %p5542_p5 = por %p192_p2, %p191_p0  ;;  %p5546_p6 = por %p198_p4, %p197_p3 }
   0xe   : > { %p5117_p7 = scmp.ge.s32.totalorder %s5453_s27, 1  ;;  %p205_p8 = scmp.lt.s32.totalorder %s5453_s27, 3 }
   0xf   : > { %p5236_p9 = scmp.eq.s32.totalorder %s5525_s28, 0  ;;  %s230_s16 = sshll.u32 %s10212_s2, 4  ;;  %s231_s16 = int_to_ptr.hbm [resolvable:$true] %s230_s16 }
  0x10   : > { %p5553_p10 = pnand %p5117_p7, %p205_p8  ;;  %s10496_s1 = sld [smem:[#allocation131_spill]] }
  0x11   : > { %s5455_s21 = smov [#allocation5]   ;;  %s5456_s23 = smov 128  }
  0x12   : > { %p5222_p11 = pneg %p5553_p10  ;;  %s232_s22 = sshll.u32 %s5455_s21, 4  ;;  %s233_s22 = int_to_ptr.vmem [resolvable:$true] %s232_s22 }
  0x13   : > { %s5457_s29 = smov 8   ;;  %s5458_s8 = smov [#allocation2]  }
  0x14   : > { %p5567_p12 = pnand %p5236_p9, %p5222_p11  ;;  %s218_s9 = sshll.u32 %s5458_s8, 4  ;;  %s219_s9 = int_to_ptr.vmem [resolvable:$true] %s218_s9 }
  0x15   : > { %s254_s17 = sshll.u32 %s10216_s6, 4  ;;  %s5459_s18 = smov [#allocation7]   ;;  %s255_s17 = int_to_ptr.hbm [resolvable:$true] %s254_s17 }
  0x16   : > { %s216_s19 = sshll.u32 %s10496_s1, 4  ;;  %s256_s1 = sshll.u32 %s5459_s18, 4  ;;  %s217_s19 = int_to_ptr.hbm [resolvable:$true] %s216_s19  ;;  %s257_s1 = int_to_ptr.vmem [resolvable:$true] %s256_s1 }
  0x17   : > { %5228 = dma.hbm_to_vmem [thread:$0]  (!%p5567_p12), %s231_s16, 256, %s233_s22, [#allocation6], %s5456_s23, %s5456_s23, %s5457_s29  }
  0x18   : > { %5225 = dma.hbm_to_vmem [thread:$0]  (!%p5567_p12), %s217_s19, 256, %s219_s9, [#allocation3], %s5456_s23, %s5456_s23, %s5457_s29  }
  0x19   : > { %5231 = dma.hbm_to_vmem [thread:$0]  (!%p5567_p12), %s255_s17, 128, %s257_s1, [#allocation6]  }
  0x1a   : > { %277 = sbr.rel (%p5553_p10) target bundleno = 1840 (0x730), region = 48 }
  0x1f   : > { %5428 = dma.done.wait (%p5236_p9), [#allocation3], 256  }
  0x20   : > { %5430 = vsyncadd (%p5236_p9), [#allocation3], 4294967040 }
  0x21   : > { %5432 = dma.done.wait (%p5236_p9), [#allocation6], 384  }
  0x22   : > { %5434 = vsyncadd (%p5236_p9), [#allocation6], 4294966912  ;;  %p320_p13 = scmp.lt.s32.totalorder %s5525_s28, 1  ;;  %v397_v2 = vld [vmem:[#allocation2 + $0x8] sm:$0xff]  ;;  %v396_v3 = vld [vmem:[#allocation2] sm:$0xff]  ;;  %vm399_vm0 = vcmask 130048  }
  0x23   : > { %510 = vmatpush.msra.mxu0 %v397_v2  ;;  %5202 = vmatpush.msra.mxu1 %v397_v2  ;;  %v5634_v39 = vld [vmem:[#allocation7] sm:$0x3f]  ;;  %v330_v40 = vld [vmem:[#allocation5] sm:$0xff]  ;;  %vm673_vm1 = vcmask 1040384   ;;  %vm927_vm2 = vcmask 1046528   ;;  %vm1160_vm3 = vcmask 1045504  }
  0x24   : > { %s321_s16 = scalar_select %p320_p13, %s5525_s28, 1  ;;  %v5639_v41 = vperm.slane %v5634_v39, 0  ;;  %v5641_v42 = vperm.slane %v330_v40, 1  ;;  %v5649_v47 = vperm.slane %v330_v40, 0  ;;  %v5651_v48 = vperm.slane %v330_v40, 2 }
  0x25   : > { %511 = vmatpush.msra.mxu0 %v396_v3  ;;  %5203 = vmatpush.msra.mxu1 %v396_v3  ;;  %v5671_v3 = vperm.slane %v330_v40, 4  ;;  %s5460_s21 = smov 16   ;;  %vm2602_vm4 = vcmask 261120   ;;  %vm2707_vm5 = vcmask 64512   ;;  %s5462_s15 = smov 8  }
  0x26   : > { %s5200_s1 = sshll.u32 %s321_s16, 5  ;;  %v835_v49 = vmul.f32 0.0, %v5641_v42  ;;  %v803_v53 = vmul.f32 0.0, %v5649_v47  ;;  %v1068_v55 = vmul.f32 0.0, %v5651_v48  ;;  %s317_s17 = sand.u32 1, %s5445_s25  }
  0x27   : > { %s5595_s20 = scalar_lea.vmem %s10210_s0, %s5200_s1  ;;  %s5461_s1 = smov 112  }
  0x28   : > { %v326_v0 = vld [vmem:[%s5595_s20 + $0x8] sm:$0xff]  ;;  %v325_v1 = vld [vmem:[%s5595_s20] sm:$0xff]  ;;  %v328_v4 = vld [vmem:[%s5595_s20 + $0x18] sm:$0xff]  ;;  %v928_v54 = vrot.slane %v835_v49, 1  ;;  %v1161_v61 = vrot.slane %v1068_v55, 2  ;;  %s5126_s18 = sshll.u32 %s317_s17, 5 }
  0x29   : > { %364 = vxpose.xlu1.b32.start [1/2] (short) %v326_v0, 128  ;;  %332 = vxpose.xlu0.b32.start [1/2] (short) %v325_v1, 128  ;;  %v327_v5 = vld [vmem:[%s5595_s20 + $0x10] sm:$0xff]  ;;  %v5668_v1 = vperm.slane %v330_v40, 3  ;;  %s319_s16 = scalar_lea.vmem [#allocation8], %s5126_s18  ;;  %s5008_s8 = scalar_lea.sflag [#allocation4], %s317_s17 }
  0x2a   : > { %v1036_v60 = vadd.f32 %v928_v54, %v803_v53  ;;  %s5020_s23 = sshll.u32 %s319_s16, 4  ;;  %s5403_s18 = scalar_lea.hbm %s10217_s7, 64  ;;  %s5021_s23 = int_to_ptr.vmem [resolvable:$true] %s5020_s23 }
  0x31   : > { %365 = vxpose.xlu1.b32.end [2/2] (short) %v328_v4, 128  ;;  %333 = vxpose.xlu0.b32.end [2/2] (short) %v327_v5, 128  ;;  %v5673_v4 = vperm.slane %v330_v40, 5 }
  0xcd   : > { %v5601_v6 = vpop.trf.xlu1  ;;  %v348_v7 = vpop.trf.xlu0 }
  0xce   : > { %5129 = vmatmul.msk.f32.vlgmr.msra.gmra.mxu0 %vm399_vm0, %v348_v7 }
  0xd5   : > { %v381_v8 = vpop.trf.xlu1  ;;  %v349_v9 = vpop.trf.xlu0 }
  0xd6   : > { %5146 = vmatmul.msk.f32.vlgmr.msra.gmra.mxu1 %vm399_vm0, %v381_v8  ;;  %5130 = vmatmul.msk.f32.gmra.mxu0 %vm399_vm0, %v349_v9  ;;  %v1269_v8 = vadd.f32 %v1161_v61, %v1036_v60 }
  0xdd   : > { %v382_v10 = vpop.trf.xlu1  ;;  %v350_v11 = vpop.trf.xlu0 }
  0xde   : > { %5147 = vmatmul.msk.f32.gmra.mxu1 %vm399_vm0, %v382_v10  ;;  %5131 = vmatmul.msk.f32.gmra.mxu0 %vm399_vm0, %v350_v11  ;;  %v5685_v11 = vperm.slane %v330_v40, 7 }
  0xe5   : > { %v383_v12 = vpop.trf.xlu1  ;;  %v351_v13 = vpop.trf.xlu0 }
  0xe6   : > { %5148 = vmatmul.msk.f32.gmra.mxu1 %vm399_vm0, %v383_v12  ;;  %5132 = vmatmul.msk.f32.gmra.mxu0 %vm399_vm0, %v351_v13  ;;  %v5687_v12 = vperm.slane %v330_v40, 6 }
  0xed   : > { %v384_v14 = vpop.trf.xlu1  ;;  %v352_v15 = vpop.trf.xlu0 }
  0xee   : > { %5149 = vmatmul.msk.f32.gmra.mxu1 %vm399_vm0, %v384_v14  ;;  %5133 = vmatmul.msk.f32.gmra.mxu0 %vm399_vm0, %v352_v15 }
  0xf5   : > { %v385_v16 = vpop.trf.xlu1  ;;  %v353_v17 = vpop.trf.xlu0 }
  0xf6   : > { %5150 = vmatmul.msk.f32.gmra.mxu1 %vm399_vm0, %v385_v16  ;;  %5134 = vmatmul.msk.f32.gmra.mxu0 %vm399_vm0, %v353_v17 }
  0xfd   : > { %v386_v18 = vpop.trf.xlu1  ;;  %v354_v19 = vpop.trf.xlu0 }
  0xfe   : > { %5151 = vmatmul.msk.f32.gmra.mxu1 %vm399_vm0, %v386_v18  ;;  %5135 = vmatmul.msk.f32.gmra.mxu0 %vm399_vm0, %v354_v19 }
 0x105   : > { %v387_v20 = vpop.trf.xlu1  ;;  %v355_v21 = vpop.trf.xlu0 }
 0x106   : > { %5152 = vmatmul.msk.f32.gmra.mxu1 %vm399_vm0, %v387_v20  ;;  %5136 = vmatmul.msk.f32.gmra.mxu0 %vm399_vm0, %v355_v21 }
 0x10d   : > { %v388_v22 = vpop.trf.xlu1  ;;  %v356_v23 = vpop.trf.xlu0 }
 0x10e   : > { %5153 = vmatmul.msk.f32.gmra.mxu1 %vm399_vm0, %v388_v22  ;;  %5137 = vmatmul.msk.f32.gmra.mxu0 %vm399_vm0, %v356_v23 }
 0x115   : > { %v389_v24 = vpop.trf.xlu1  ;;  %v357_v25 = vpop.trf.xlu0 }
 0x116   : > { %5154 = vmatmul.msk.f32.gmra.mxu1 %vm399_vm0, %v389_v24  ;;  %5138 = vmatmul.msk.f32.gmra.mxu0 %vm399_vm0, %v357_v25 }
 0x11d   : > { %v390_v26 = vpop.trf.xlu1  ;;  %v358_v27 = vpop.trf.xlu0 }
 0x11e   : > { %5155 = vmatmul.msk.f32.gmra.mxu1 %vm399_vm0, %v390_v26  ;;  %5139 = vmatmul.msk.f32.gmra.mxu0 %vm399_vm0, %v358_v27 }
 0x125   : > { %v391_v28 = vpop.trf.xlu1  ;;  %v359_v29 = vpop.trf.xlu0 }
 0x126   : > { %5156 = vmatmul.msk.f32.gmra.mxu1 %vm399_vm0, %v391_v28  ;;  %5140 = vmatmul.msk.f32.gmra.mxu0 %vm399_vm0, %v359_v29 }
 0x12d   : > { %v392_v30 = vpop.trf.xlu1  ;;  %v360_v31 = vpop.trf.xlu0 }
 0x12e   : > { %5157 = vmatmul.msk.f32.gmra.mxu1 %vm399_vm0, %v392_v30  ;;  %5141 = vmatmul.msk.f32.gmra.mxu0 %vm399_vm0, %v360_v31 }
 0x135   : > { %v393_v32 = vpop.trf.xlu1  ;;  %v361_v33 = vpop.trf.xlu0 }
 0x136   : > { %5158 = vmatmul.msk.f32.gmra.mxu1 %vm399_vm0, %v393_v32  ;;  %5142 = vmatmul.msk.f32.gmra.mxu0 %vm399_vm0, %v361_v33 }
 0x13d   : > { %v394_v34 = vpop.trf.xlu1  ;;  %v362_v35 = vpop.trf.xlu0 }
 0x13e   : > { %5159 = vmatmul.msk.f32.gmra.mxu1 %vm399_vm0, %v394_v34  ;;  %5143 = vmatmul.msk.f32.gmra.mxu0 %vm399_vm0, %v362_v35 }
 0x145   : > { %v395_v36 = vpop.trf.xlu1  ;;  %v363_v37 = vpop.trf.xlu0 }
 0x146   : > { %5160 = vmatmul.msk.f32.gmra.mxu1 %vm399_vm0, %v395_v36  ;;  %5144 = vmatmul.msk.f32.gmra.mxu0 %vm399_vm0, %v363_v37 }
 0x14b   : > { %v513_v38 = vpop.f32.mrf.mxu0 }
 0x14c   : > { %v5647_v46 = vadd.f32 %v513_v38, %v5639_v41 }
 0x14e   : > { %5145 = vmatmul.msk.f32.gmra.mxu0 %vm399_vm0, %v5601_v6  ;;  %10499 = vst [vmem:[#allocation13_spill] sm:$0xff] %v5647_v46  ;;  %v10225_v51 = vmax.f32 %v5647_v46, 0.0 }
 0x150   : > { %v674_v57 = vrot.slane %v10225_v51, 7 }
 0x152   : > { %v770_v0 = vsel %vm673_vm1, 0.0, %v674_v57 }
 0x153   : > { %v516_v43 = vpop.f32.mrf.mxu0  ;;  %v564_v44 = vpop.f32.mrf.mxu1  ;;  %v5680_v9 = vmul.f32 %v5641_v42, %v770_v0  ;;  %v5683_v10 = vmul.f32 %v5651_v48, %v770_v0  ;;  %v5690_v13 = vmul.f32 %v5649_v47, %v770_v0  ;;  %v1301_v14 = vmul.f32 %v5668_v1, %v770_v0 }
 0x154   : > { %v5644_v45 = vadd.f32 %v516_v43, %v5639_v41  ;;  %v5663_v58 = vadd.f32 %v564_v44, %v5639_v41  ;;  %v1366_v17 = vmul.f32 %v5671_v3, %v770_v0  ;;  %v1607_v28 = vmul.f32 %v5673_v4, %v770_v0 }
 0x155   : > { %v930_v26 = vrot.slane %v5680_v9, 1  ;;  %v1333_v33 = vadd.f32 %v1301_v14, %v1269_v8 }
 0x156   : > { %10498 = vst [vmem:[#allocation12_spill] sm:$0xff] %v5644_v45  ;;  %v10226_v50 = vmax.f32 %v5644_v45, 0.0  ;;  %v10220_v2 = vmax.f32 %v5663_v58, 0.0  ;;  %v1462_v34 = vrot.slane %v1366_v17, 1  ;;  %v1703_v61 = vrot.slane %v1607_v28, 2 }
 0x157   : > { %10500 = vst [vmem:[#allocation14_spill] sm:$0xff] %v5663_v58 }
 0x158   : > { %v675_v56 = vrot.slane %v10226_v50, 7  ;;  %v5695_v15 = vrot.slane %v10220_v2, 7 }
 0x15a   : > { %v676_v62 = vsel %vm673_vm1, %v674_v57, %v675_v56  ;;  %v786_v63 = vsel %vm673_vm1, %v675_v56, 0.0  ;;  %10501 = vst [vmem:[#allocation15_spill] sm:$0xff] %v5695_v15  ;;  %v5719_v30 = vsel %vm673_vm1, %v5695_v15, 0.0 }
 0x15b   : > { %v519_v52 = vpop.f32.mrf.mxu0  ;;  %v567_v59 = vpop.f32.mrf.mxu1  ;;  %v5676_v5 = vmul.f32 %v5641_v42, %v676_v62  ;;  %v838_v6 = vmul.f32 %v5641_v42, %v786_v63  ;;  %v5702_v18 = vmul.f32 %v5651_v48, %v676_v62  ;;  %v1071_v19 = vmul.f32 %v5651_v48, %v786_v63  ;;  %10505 = vst [vmem:[#allocation19_spill] sm:$0xff] %v5719_v30 }
 0x15c   : > { %v5698_v16 = vadd.f32 %v519_v52, %v5639_v41  ;;  %v5706_v20 = vadd.f32 %v567_v59, %v5639_v41  ;;  %v1367_v23 = vmul.f32 %v5671_v3, %v676_v62  ;;  %v1368_v24 = vmul.f32 %v5671_v3, %v786_v63 }
 0x15d   : > { %v931_v21 = vrot.slane %v5676_v5, 1  ;;  %v933_v22 = vrot.slane %v838_v6, 1  ;;  %v10227_v35 = vrot.slane %v5702_v18, 2  ;;  %v1609_v36 = vmul.f32 %v5673_v4, %v786_v63 }
 0x15e   : > { %10502 = vst [vmem:[#allocation16_spill] sm:$0xff] %v5698_v16  ;;  %v10223_v31 = vmax.f32 %v5698_v16, 0.0  ;;  %v10219_v37 = vmax.f32 %v5706_v20, 0.0  ;;  %v1166_v40 = vrot.slane %v1071_v19, 2  ;;  %v1463_v43 = vrot.slane %v1367_v23, 1 }
 0x15f   : > { %10503 = vst [vmem:[#allocation17_spill] sm:$0xff] %v5706_v20  ;;  %v934_v38 = vsel %vm927_vm2, %v931_v21, %v933_v22  ;;  %v1465_v44 = vrot.slane %v1368_v24, 1  ;;  %v805_v52 = vmul.f32 %v5649_v47, %v676_v62  ;;  %v1302_v53 = vmul.f32 %v5668_v1, %v676_v62 }
 0x160   : > { %v5733_v54 = vmul.f32 %v5641_v42, %v5719_v30  ;;  %v5738_v56 = vmul.f32 %v5651_v48, %v5719_v30  ;;  %v677_v57 = vrot.slane %v10223_v31, 7  ;;  %v1608_v60 = vmul.f32 %v5673_v4, %v676_v62 }
 0x161   : > { %v1038_v63 = vadd.f32 %v934_v38, %v805_v52  ;;  %v5746_v0 = vmul.f32 %v5671_v3, %v5719_v30  ;;  %v701_v5 = vrot.slane %v10219_v37, 7  ;;  %v1167_v6 = vsel %vm1160_vm3, %v10227_v35, %v1166_v40 }
 0x162   : > { %10507 = vst [vmem:[#allocation21_spill] sm:$0xff] %v5733_v54  ;;  %v1706_v9 = vrot.slane %v1609_v36, 2  ;;  %v5756_v14 = vmul.f32 %v5673_v4, %v5719_v30  ;;  %v1464_v19 = vsel %vm927_vm2, %v1462_v34, %v1463_v43  ;;  %v1334_v22 = vadd.f32 %v1302_v53, %v1269_v8 }
 0x163   : > { %v522_v7 = vpop.f32.mrf.mxu0  ;;  %v570_v25 = vpop.f32.mrf.mxu1  ;;  %10508 = vst [vmem:[#allocation22_spill] sm:$0xff] %v5738_v56  ;;  %v5764_v24 = vsel %vm673_vm1, 0.0, %v677_v57  ;;  %v1704_v36 = vrot.slane %v1608_v60, 2  ;;  %v5768_v38 = vadd.f32 %v1167_v6, %v1038_v63  ;;  %v5776_v8 = vsel %vm673_vm1, 0.0, %v701_v5 }
 0x164   : > { %v5715_v29 = vadd.f32 %v570_v25, %v5639_v41  ;;  %v5723_v32 = vadd.f32 %v522_v7, %v5639_v41  ;;  %10509 = vst [vmem:[#allocation23_spill] sm:$0xff] %v5746_v0  ;;  %v1466_v7 = vsel %vm927_vm2, %v1463_v43, %v1465_v44  ;;  %v5773_v44 = vmul.f32 %v5685_v11, %v5719_v30 }
 0x165   : > { %10510 = vst [vmem:[#allocation24_spill] sm:$0xff] %v5756_v14  ;;  %v1574_v53 = vadd.f32 %v1464_v19, %v1333_v33  ;;  %v5783_v60 = vsel %vm927_vm2, %v930_v26, %v931_v21  ;;  %v5787_v63 = vmul.f32 %v5641_v42, %v5764_v24  ;;  %v5795_v37 = vadd.f32 %v1466_v7, %v1334_v22 }
 0x166   : > { %10504 = vst [vmem:[#allocation18_spill] sm:$0xff] %v5715_v29  ;;  %v10218_v55 = vmax.f32 %v5715_v29, 0.0  ;;  %v10221_v59 = vmax.f32 %v5723_v32, 0.0  ;;  %v1705_v26 = vsel %vm1160_vm3, %v1703_v61, %v1704_v36  ;;  %v1707_v7 = vsel %vm1160_vm3, %v1704_v36, %v1706_v9 }
 0x167   : > { %10506 = vst [vmem:[#allocation20_spill] sm:$0xff] %v5723_v32  ;;  %v1912_v40 = vmul.f32 %v5685_v11, %v5764_v24 }
 0x168   : > { %v702_v17 = vrot.slane %v10218_v55, 7  ;;  %v678_v25 = vrot.slane %v10221_v59, 7  ;;  %10511 = vst [vmem:[#allocation25_spill] sm:$0xff] %v5773_v44 }
 0x169   : > { %10512 = vst [vmem:[#allocation26_spill] sm:$0xff] %v5776_v8  ;;  %v2004_v45 = vrot.slane %v1912_v40, 1 }
 0x16a   : > { %v5790_v6 = vsel %vm673_vm1, %v701_v5, %v702_v17  ;;  %v5802_v33 = vsel %vm673_vm1, %v677_v57, %v678_v25  ;;  %v5807_v19 = vsel %vm673_vm1, %v678_v25, 0.0  ;;  %v5815_v22 = vsel %vm673_vm1, %v702_v17, 0.0 }
 0x16b   : > { %v525_v49 = vpop.f32.mrf.mxu0  ;;  %v573_v28 = vpop.f32.mrf.mxu1  ;;  %10514 = vst [vmem:[#allocation28_spill] sm:$0xff] %v5790_v6  ;;  %v5819_v57 = vmul.f32 %v5649_v47, %v5790_v6  ;;  %v5823_v61 = vmul.f32 %v5641_v42, %v5790_v6  ;;  %v1815_v25 = vadd.f32 %v1705_v26, %v1574_v53  ;;  %v5839_v59 = vmul.f32 %v5649_v47, %v5802_v33 }
 0x16c   : > { %v5780_v43 = vadd.f32 %v525_v49, %v5639_v41  ;;  %v5799_v49 = vmul.f32 %v5641_v42, %v5776_v8  ;;  %10516 = vst [vmem:[#allocation30_spill] sm:$0xff] %v5815_v22  ;;  %v841_v53 = vmul.f32 %v5641_v42, %v5807_v19  ;;  %v5845_v26 = vmul.f32 %v5651_v48, %v5802_v33 }
 0x16d   : > { %v1913_v51 = vmul.f32 %v5685_v11, %v5802_v33  ;;  %v5875_v2 = vmul.f32 %v5671_v3, %v5807_v19  ;;  %v5879_v27 = vmul.f32 %v5673_v4, %v5807_v19  ;;  %v5888_v36 = vadd.f32 %v573_v28, %v5639_v41 }
 0x16e   : > { %10513 = vst [vmem:[#allocation27_spill] sm:$0xff] %v5780_v43  ;;  %v10222_v21 = vmax.f32 %v5780_v43, 0.0  ;;  %v865_v46 = vmul.f32 %v5641_v42, %v5815_v22  ;;  %v938_v14 = vrot.slane %v841_v53, 1  ;;  %v1098_v0 = vmul.f32 %v5651_v48, %v5815_v22 }
 0x16f   : > { %10519 = vst [vmem:[#allocation33_spill] sm:$0xff] %v5888_v36  ;;  %v2005_v16 = vrot.slane %v1913_v51, 1  ;;  %v10529_v15 = vrot.slane %v5823_v61, 1 }
 0x170   : > { %v5832_v9 = vrot.slane %v10222_v21, 7  ;;  %v1074_v21 = vmul.f32 %v5651_v48, %v5807_v19  ;;  %v978_v30 = vrot.slane %v865_v46, 1 }
 0x173   : > { %v528_v52 = vpop.f32.mrf.mxu0  ;;  %v576_v34 = vpop.f32.mrf.mxu1 }
 0x174   : > { %v5793_v55 = vadd.f32 %v528_v52, %v5639_v41  ;;  %v5811_v52 = vperm.slane %v5634_v39, 1  ;;  %v5828_v39 = vmul.f32 %v5641_v42, %v5802_v33  ;;  %v5898_v58 = vadd.f32 %v576_v34, %v5639_v41 }
 0x175   : > { %v1914_v34 = vmul.f32 %v5685_v11, %v5807_v19 }
 0x176   : > { %10515 = vst [vmem:[#allocation29_spill] sm:$0xff] %v5793_v55  ;;  %v10224_v5 = vmax.f32 %v5793_v55, 0.0  ;;  %v1848_v55 = vmul.f32 %v5687_v12, %v5764_v24 }
 0x177   : > { %10520 = vst [vmem:[#allocation34_spill] sm:$0xff] %v5898_v58 }
 0x178   : > { %v681_v17 = vrot.slane %v10224_v5, 7  ;;  %v1879_v40 = vadd.f32 %v1848_v55, %v1815_v25 }
 0x17a   : > { %v5851_v31 = vsel %vm673_vm1, %v5832_v9, %v681_v17  ;;  %v5854_v5 = vsel %vm673_vm1, %v681_v17, 0.0  ;;  %v5870_v17 = vld [vmem:[#allocation5 + $0x8] ss:$0 sm:$0xff] }
 0x17b   : > { %v5860_v50 = vmul.f32 %v5641_v42, %v5851_v31  ;;  %v844_v23 = vmul.f32 %v5641_v42, %v5854_v5  ;;  %v5866_v62 = vmul.f32 %v5651_v48, %v5851_v31  ;;  %v1077_v35 = vmul.f32 %v5651_v48, %v5854_v5  ;;  %v531_v53 = vpop.f32.mrf.mxu0 }
 0x17c   : > { %v809_v43 = vmul.f32 %v5649_v47, %v5851_v31  ;;  %v2145_v51 = vmul.f32 %v5870_v17, %v5764_v24  ;;  %v2147_v46 = vmul.f32 %v5870_v17, %v5807_v19 }
 0x17d   : > { %10517 = vst [vmem:[#allocation31_spill] sm:$0xff] %v5860_v50  ;;  %v10240_v29 = vrot.slane %v5860_v50, 1  ;;  %v943_v20 = vrot.slane %v844_v23, 1  ;;  %v1176_v32 = vrot.slane %v1077_v35, 2  ;;  %v10522_v28 = vrot.slane %v5866_v62, 2 }
 0x17e   : > { %10518 = vst [vmem:[#allocation32_spill] sm:$0xff] %v5866_v62  ;;  %v2146_v35 = vmul.f32 %v5870_v17, %v5802_v33 }
 0x17f   : > { %v944_v23 = vsel %vm927_vm2, %v10240_v29, %v943_v20  ;;  %v5905_v54 = vsel %vm1160_vm3, %v10522_v28, %v1176_v32  ;;  %v2006_v32 = vsel %vm927_vm2, %v2004_v45, %v2005_v16  ;;  %v5921_v20 = vmul.f32 %v5651_v48, %v5790_v6 }
 0x180   : > { %v5900_v56 = vadd.f32 %v944_v23, %v809_v43  ;;  %10523 = vst [vmem:[#allocation36_spill] sm:$0xff] %v5905_v54  ;;  %v1171_v43 = vrot.slane %v1074_v21, 2  ;;  %v2112_v44 = vadd.f32 %v2006_v32, %v1879_v40  ;;  %v2237_v21 = vrot.slane %v2145_v51, 2  ;;  %v579_v23 = vpop.f32.mrf.mxu1 }
 0x181   : > { %v2238_v25 = vrot.slane %v2146_v35, 2  ;;  %v1816_v29 = vadd.f32 %v1707_v7, %v5795_v37  ;;  %v1849_v45 = vmul.f32 %v5687_v12, %v5802_v33  ;;  %v2007_v28 = vrot.slane %v1914_v34, 1 }
 0x182   : > { %10521 = vst [vmem:[#allocation35_spill] sm:$0xff] %v5900_v56  ;;  %v10524_v40 = vrot.slane %v5828_v39, 1  ;;  %v10525_v51 = vmax.f32 %v5888_v36, 0.0  ;;  %v10526_v37 = vrot.slane %v5845_v26, 2  ;;  %v2240_v36 = vrot.slane %v2147_v46, 2 }
 0x183   : > { %v2239_v55 = vsel %vm1160_vm3, %v2237_v21, %v2238_v25  ;;  %v1880_v6 = vadd.f32 %v1849_v45, %v1816_v29  ;;  %v2008_v19 = vsel %vm927_vm2, %v2005_v16, %v2007_v28  ;;  %v10247_v29 = vrot.slane %v5921_v20, 2 }
 0x184   : > { %v939_v32 = vsel %vm927_vm2, %v10524_v40, %v938_v14  ;;  %v704_v35 = vrot.slane %v10525_v51, 7  ;;  %v5940_v7 = vsel %vm1160_vm3, %v10526_v37, %v1171_v43  ;;  %v2345_v34 = vadd.f32 %v2239_v55, %v2112_v44 }
 0x185   : > { %v5945_v14 = vmul.f32 %v5671_v3, %v5815_v22  ;;  %v5949_v40 = vsel %vm673_vm1, 0.0, %v5832_v9  ;;  %v10528_v51 = vmax.f32 %v5898_v58, 0.0  ;;  %v979_v43 = vsel %vm927_vm2, %v10529_v15, %v978_v30 }
 0x186   : > { %v2378_v16 = vadd.f32 %v5811_v52, %v2345_v34  ;;  %v2113_v44 = vadd.f32 %v2008_v19, %v1880_v6  ;;  %v1211_v28 = vrot.slane %v1098_v0, 2  ;;  %v5960_v55 = vmul.f32 %v5673_v4, %v5815_v22 }
 0x187   : > { %10527 = vst [vmem:[#allocation37_spill] sm:$0xff] %v5945_v14  ;;  %v705_v21 = vrot.slane %v10528_v51, 7  ;;  %v5963_v9 = vsel %vm673_vm1, 0.0, %v704_v35  ;;  %v2241_v45 = vsel %vm1160_vm3, %v2238_v25, %v2240_v36  ;;  %v5968_v46 = vmul.f32 %v5641_v42, %v5949_v40 }
 0x188   : > { %10530 = vst [vmem:[#allocation38_spill] sm:$0xff] %v5960_v55  ;;  %v5972_v15 = vmul.f32 %v5641_v42, %v5963_v9  ;;  %v2410_v30 = vmax.f32 %v2378_v16, 0.0  ;;  %v2346_v6 = vadd.f32 %v2241_v45, %v2113_v44  ;;  %v5975_v0 = vadd.f32 %v939_v32, %v5839_v59 }
 0x189   : > { %10531 = vst [vmem:[#allocation39_spill] sm:$0xff] %v5963_v9  ;;  %v5978_v37 = vsel %vm673_vm1, %v704_v35, %v705_v21  ;;  %v5981_v34 = vsel %vm673_vm1, %v705_v21, 0.0  ;;  %v5984_v36 = vadd.f32 %v531_v53, %v5639_v41  ;;  %v5987_v25 = vadd.f32 %v979_v43, %v5819_v57  ;;  %v534_v35 = vpop.f32.mrf.mxu0 }
 0x18a   : > { %10532 = vst [vmem:[#allocation40_spill] sm:$0xff] %v5968_v46  ;;  %v5991_v19 = vmul.f32 %v5671_v3, %v5854_v5  ;;  %v5995_v59 = vmul.f32 %v5641_v42, %v5978_v37  ;;  %v868_v32 = vmul.f32 %v5641_v42, %v5981_v34  ;;  %2474 = vrot.lane.b32.xlu2 %v2410_v30, %s5460_s21  ;;  %v582_v30 = vpop.f32.mrf.mxu1 }
 0x18b   : > { %10533 = vst [vmem:[#allocation41_spill] sm:$0xff] %v5972_v15  ;;  %v6003_v57 = vsel %vm1160_vm3, %v10247_v29, %v1211_v28  ;;  %v6009_v21 = vmul.f32 %v5685_v11, %v5815_v22  ;;  %v6014_v44 = vadd.f32 %v579_v23, %v5639_v41  ;;  %v2379_v45 = vadd.f32 %v5811_v52, %v2346_v6 }
 0x18c   : > { %10534 = vst [vmem:[#allocation42_spill] sm:$0xff] %v5978_v37  ;;  %v6019_v28 = vmul.f32 %v5673_v4, %v5854_v5  ;;  %v6023_v51 = vmul.f32 %v5651_v48, %v5978_v37  ;;  %v6027_v43 = vadd.f32 %v534_v35, %v5639_v41  ;;  %v983_v29 = vrot.slane %v868_v32, 1 }
 0x18d   : > { %10535 = vst [vmem:[#allocation43_spill] sm:$0xff] %v5981_v34  ;;  %v6033_v6 = vmul.f32 %v5651_v48, %v5981_v34  ;;  %v6037_v58 = vmul.f32 %v5685_v11, %v5854_v5  ;;  %v6041_v55 = vmul.f32 %v5671_v3, %v5981_v34  ;;  %v6044_v35 = vadd.f32 %v582_v30, %v5639_v41 }
 0x18e   : > { %10536 = vst [vmem:[#allocation44_spill] sm:$0xff] %v5984_v36  ;;  %v1037_v16 = vadd.f32 %v5783_v60, %v5690_v13  ;;  %v825_v32 = vmul.f32 %v5649_v47, %v5978_v37  ;;  %v6052_v23 = vmul.f32 %v5673_v4, %v5981_v34  ;;  %v2411_v14 = vmax.f32 %v2379_v45, 0.0 }
 0x18f   : > { %10537 = vst [vmem:[#allocation45_spill] sm:$0xff] %v5995_v59  ;;  %v10544_v30 = vmax.f32 %v5984_v36, 0.0  ;;  %v10545_v13 = vrot.slane %v5995_v59, 1  ;;  %v6066_v62 = vmul.f32 %v5685_v11, %v5981_v34  ;;  %v10547_v45 = vrot.slane %v5702_v18, 2 }
 0x190   : > { %10538 = vst [vmem:[#allocation46_spill] sm:$0xff] %v6009_v21  ;;  %v10548_v22 = vrot.slane %v5683_v10, 2  ;;  %v10549_v56 = vmax.f32 %v6014_v44, 0.0  ;;  %v1369_v18 = vmul.f32 %v5671_v3, %v5764_v24  ;;  %v1370_v10 = vmul.f32 %v5671_v3, %v5802_v33 }
 0x191   : > { %10539 = vst [vmem:[#allocation47_spill] sm:$0xff] %v6014_v44  ;;  %v683_v15 = vrot.slane %v10544_v30, 7  ;;  %v984_v60 = vsel %vm927_vm2, %v10545_v13, %v983_v29  ;;  %v1303_v29 = vmul.f32 %v5668_v1, %v5764_v24  ;;  %v1915_v21 = vmul.f32 %v5685_v11, %v5949_v40 }
 0x192   : > { %10540 = vst [vmem:[#allocation48_spill] sm:$0xff] %v6027_v43  ;;  %2476 = vrot.lane.b32.xlu2 %v2411_v14, %s5460_s21  ;;  %v1165_v30 = vsel %vm1160_vm3, %v10548_v22, %v10547_v45  ;;  %v707_v36 = vrot.slane %v10549_v56, 7  ;;  %v10550_v14 = vmax.f32 %v6027_v43, 0.0  ;;  %v1610_v45 = vmul.f32 %v5673_v4, %v5764_v24 }
 0x193   : > { %10541 = vst [vmem:[#allocation49_spill] sm:$0xff] %v6041_v55  ;;  %v1270_v53 = vadd.f32 %v1165_v30, %v1037_v16  ;;  %v6086_v22 = vsel %vm673_vm1, 0.0, %v683_v15  ;;  %v1611_v30 = vmul.f32 %v5673_v4, %v5802_v33  ;;  %v1467_v13 = vrot.slane %v1369_v18, 1 }
 0x194   : > { %10542 = vst [vmem:[#allocation50_spill] sm:$0xff] %v6044_v35  ;;  %v684_v16 = vrot.slane %v10550_v14, 7  ;;  %v1468_v56 = vrot.slane %v1370_v10, 1  ;;  %v1916_v54 = vmul.f32 %v5685_v11, %v5851_v31  ;;  %v10551_v44 = vmax.f32 %v6044_v35, 0.0 }
 0x195   : > { %10543 = vst [vmem:[#allocation51_spill] sm:$0xff] %v6052_v23  ;;  %v1335_v34 = vadd.f32 %v1303_v29, %v1270_v53  ;;  %v1709_v43 = vrot.slane %v1611_v30, 2  ;;  %v2149_v14 = vmul.f32 %v5870_v17, %v5851_v31  ;;  %v1708_v46 = vrot.slane %v1610_v45, 2 }
 0x196   : > { %10546 = vst [vmem:[#allocation52_spill] sm:$0xff] %v6066_v62  ;;  %v708_v62 = vrot.slane %v10551_v44, 7  ;;  %v1469_v59 = vsel %vm927_vm2, %v1467_v13, %v1468_v56  ;;  %v2010_v50 = vrot.slane %v1916_v54, 1  ;;  %v1304_v18 = vmul.f32 %v5668_v1, %v5802_v33 }
 0x197   : > { %v6106_v10 = vsel %vm673_vm1, %v683_v15, %v684_v16  ;;  %v1576_v23 = vadd.f32 %v1469_v59, %v1335_v34  ;;  %v1850_v35 = vmul.f32 %v5687_v12, %v5949_v40  ;;  %v2148_v53 = vmul.f32 %v5870_v17, %v5949_v40 }
 0x198   : > { %v1710_v44 = vsel %vm1160_vm3, %v1708_v46, %v1709_v43  ;;  %v2009_v29 = vrot.slane %v1915_v21, 1  ;;  %v1336_v13 = vadd.f32 %v1304_v18, %v5768_v38  ;;  %v10552_v54 = vrot.slane %v5875_v2, 1  ;;  %v537_v21 = vpop.f32.mrf.mxu0 }
 0x199   : > { %v6118_v33 = vsel %vm673_vm1, %v684_v16, 0.0  ;;  %v1817_v15 = vadd.f32 %v1710_v44, %v1576_v23  ;;  %v2243_v34 = vrot.slane %v2149_v14, 2  ;;  %v2012_v59 = vrot.slane %v6037_v58, 1 }
 0x19a   : > { %v1471_v45 = vsel %vm927_vm2, %v1468_v56, %v10552_v54  ;;  %v2011_v30 = vsel %vm927_vm2, %v2009_v29, %v2010_v50  ;;  %v1851_v46 = vmul.f32 %v5687_v12, %v5851_v31  ;;  %v2150_v38 = vmul.f32 %v5870_v17, %v5854_v5 }
 0x19b   : > { %v1577_v55 = vadd.f32 %v1471_v45, %v1336_v13  ;;  %v6126_v2 = vadd.f32 %v984_v60, %v825_v32  ;;  %v6130_v16 = vmul.f32 %v5641_v42, %v6106_v10  ;;  %v1881_v23 = vadd.f32 %v1850_v35, %v1817_v15  ;;  %v585_v32 = vpop.f32.mrf.mxu1 }
 0x19c   : > { %v10555_v56 = vrot.slane %v5879_v27, 2  ;;  %v6137_v14 = vmul.f32 %v5641_v42, %v6086_v22  ;;  %v847_v18 = vmul.f32 %v5641_v42, %v6118_v33  ;;  %v2242_v5 = vrot.slane %v2148_v53, 2 }
 0x19d   : > { %10553 = vst [vmem:[#allocation53_spill] sm:$0xff] %v6126_v2  ;;  %v6142_v60 = vsel %vm673_vm1, 0.0, %v707_v36  ;;  %v2114_v29 = vadd.f32 %v2011_v30, %v1881_v23  ;;  %v2013_v35 = vsel %vm927_vm2, %v2010_v50, %v2012_v59  ;;  %v2245_v13 = vrot.slane %v2150_v38, 2 }
 0x19e   : > { %10554 = vst [vmem:[#allocation54_spill] sm:$0xff] %v6130_v16  ;;  %v1712_v58 = vsel %vm1160_vm3, %v1709_v43, %v10555_v56  ;;  %v6147_v27 = vmul.f32 %v5641_v42, %v6142_v60  ;;  %v6150_v43 = vsel %vm673_vm1, %v707_v36, %v708_v62  ;;  %v2244_v54 = vsel %vm1160_vm3, %v2242_v5, %v2243_v34 }
 0x19f   : > { %10556 = vst [vmem:[#allocation55_spill] sm:$0xff] %v6137_v14  ;;  %v1818_v44 = vadd.f32 %v1712_v58, %v1577_v55  ;;  %v10265_v55 = vrot.slane %v6130_v16, 1  ;;  %v6156_v53 = vmul.f32 %v5651_v48, %v6106_v10  ;;  %v1080_v50 = vmul.f32 %v5651_v48, %v6118_v33 }
 0x1a0   : > { %10557 = vst [vmem:[#allocation56_spill] sm:$0xff] %v6147_v27  ;;  %v2347_v15 = vadd.f32 %v2244_v54, %v2114_v29  ;;  %v948_v59 = vrot.slane %v847_v18, 1  ;;  %v6162_v30 = vmul.f32 %v5671_v3, %v6118_v33  ;;  %v6165_v36 = vsel %vm673_vm1, %v708_v62, 0.0  ;;  %v540_v62 = vpop.f32.mrf.mxu0 }
 0x1a1   : > { %v1882_v45 = vadd.f32 %v1851_v46, %v1818_v44  ;;  %10558 = vst [vmem:[#allocation57_spill] sm:$0xff] %v6156_v53  ;;  %v6169_v46 = vmul.f32 %v5641_v42, %v6150_v43  ;;  %v871_v23 = vmul.f32 %v5641_v42, %v6165_v36  ;;  %v2246_v58 = vsel %vm1160_vm3, %v2243_v34, %v2245_v13 }
 0x1a2   : > { %v2380_v56 = vadd.f32 %v5811_v52, %v2347_v15  ;;  %v10560_v18 = vrot.slane %v6033_v6, 2  ;;  %v10561_v5 = vrot.slane %v6023_v51, 2  ;;  %v6185_v29 = vmul.f32 %v5673_v4, %v6118_v33 }
 0x1a3   : > { %v2115_v38 = vadd.f32 %v2013_v35, %v1882_v45  ;;  %10559 = vst [vmem:[#allocation58_spill] sm:$0xff] %v6169_v46  ;;  %v811_v45 = vmul.f32 %v5649_v47, %v6106_v10  ;;  %v1181_v13 = vrot.slane %v1080_v50, 2  ;;  %v988_v54 = vrot.slane %v871_v23, 1  ;;  %v588_v27 = vpop.f32.mrf.mxu1 }
 0x1a4   : > { %v6180_v44 = vsel %vm1160_vm3, %v10561_v5, %v10560_v18  ;;  %v2412_v6 = vmax.f32 %v2380_v56, 0.0  ;;  %v6194_v18 = vmul.f32 %v5685_v11, %v6118_v33  ;;  %v6203_v50 = vadd.f32 %v537_v21, %v5639_v41 }
 0x1a5   : > { %10562 = vst [vmem:[#allocation59_spill] sm:$0xff] %v6180_v44  ;;  %v2348_v35 = vadd.f32 %v2246_v58, %v2115_v38  ;;  %v949_v38 = vsel %vm927_vm2, %v10265_v55, %v948_v59  ;;  %v6208_v15 = vmul.f32 %v5651_v48, %v6150_v43  ;;  %v6211_v34 = vadd.f32 %v585_v32, %v5639_v41 }
 0x1a6   : > { %2478 = vrot.lane.b32.xlu0 %v2412_v6, %s5460_s21  ;;  %10563 = vst [vmem:[#allocation60_spill] sm:$0xff] %v6203_v50  ;;  %v827_v59 = vmul.f32 %v5649_v47, %v6150_v43  ;;  %v1104_v23 = vmul.f32 %v5651_v48, %v6165_v36  ;;  %v6219_v21 = vmul.f32 %v5671_v3, %v6165_v36  ;;  %v10572_v58 = vrot.slane %v5828_v39, 1 }
 0x1a7   : > { %v2381_v5 = vadd.f32 %v5811_v52, %v2348_v35  ;;  %10564 = vst [vmem:[#allocation61_spill] sm:$0xff] %v6208_v15  ;;  %v6222_v6 = vadd.f32 %v540_v62, %v5639_v41  ;;  %v6224_v55 = vadd.f32 %v949_v38, %v811_v45  ;;  %v6233_v56 = vmul.f32 %v5673_v4, %v6165_v36 }
 0x1a8   : > { %10565 = vst [vmem:[#allocation62_spill] sm:$0xff] %v6211_v34  ;;  %v10573_v14 = vrot.slane %v5787_v63, 1  ;;  %v10574_v45 = vrot.slane %v6169_v46, 1  ;;  %v6253_v39 = vmul.f32 %v5685_v11, %v6165_v36 }
 0x1a9   : > { %v2413_v35 = vmax.f32 %v2381_v5, 0.0  ;;  %10566 = vst [vmem:[#allocation63_spill] sm:$0xff] %v6219_v21  ;;  %v10569_v5 = vrot.slane %v6156_v53, 2  ;;  %v10577_v53 = vmax.f32 %v6203_v50, 0.0 }
 0x1aa   : > { %10567 = vst [vmem:[#allocation64_spill] sm:$0xff] %v6222_v6  ;;  %v937_v62 = vsel %vm927_vm2, %v10573_v14, %v10572_v58  ;;  %v989_v38 = vsel %vm927_vm2, %v10574_v45, %v988_v54  ;;  %v1072_v14 = vmul.f32 %v5651_v48, %v5764_v24  ;;  %v1221_v54 = vrot.slane %v1104_v23, 2 }
 0x1ab   : > { %10568 = vst [vmem:[#allocation65_spill] sm:$0xff] %v6224_v55  ;;  %v6229_v32 = vsel %vm1160_vm3, %v10569_v5, %v1181_v13  ;;  %2480 = vrot.lane.b32.xlu1 %v2413_v35, %s5460_s21  ;;  %v6246_v13 = vadd.f32 %v588_v27, %v5639_v41  ;;  %v806_v5 = vmul.f32 %v5649_v47, %v5764_v24  ;;  %v10272_v27 = vmax.f32 %v6222_v6, 0.0 }
 0x1ac   : > { %10570 = vst [vmem:[#allocation66_spill] sm:$0xff] %v6229_v32  ;;  %v6260_v55 = vadd.f32 %v989_v38, %v827_v59  ;;  %v1168_v35 = vrot.slane %v1072_v14, 2  ;;  %v1372_v32 = vmul.f32 %v5671_v3, %v5949_v40  ;;  %v686_v63 = vrot.slane %v10577_v53, 7 }
 0x1ad   : > { %10571 = vst [vmem:[#allocation67_spill] sm:$0xff] %v6233_v56  ;;  %v1039_v45 = vadd.f32 %v937_v62, %v806_v5  ;;  %v1305_v24 = vmul.f32 %v5668_v1, %v5949_v40  ;;  %v1373_v23 = vmul.f32 %v5671_v3, %v5851_v31  ;;  %v10578_v59 = vmax.f32 %v6211_v34, 0.0 }
 0x1ae   : > { %10575 = vst [vmem:[#allocation68_spill] sm:$0xff] %v6246_v13  ;;  %v10579_v38 = vrot.slane %v5845_v26, 2  ;;  %v1613_v14 = vmul.f32 %v5673_v4, %v5949_v40  ;;  %v1614_v53 = vmul.f32 %v5673_v4, %v5851_v31  ;;  %v687_v46 = vrot.slane %v10272_v27, 7  ;;  %3648 = vrot.lane.b32.xlu0 %v5668_v1, %s5461_s1 }
 0x1af   : > { %10576 = vst [vmem:[#allocation69_spill] sm:$0xff] %v6260_v55  ;;  %v6274_v62 = vrot.slane %v10578_v59, 7  ;;  %v1472_v16 = vrot.slane %v1372_v32, 1  ;;  %v1473_v50 = vrot.slane %v1373_v23, 1  ;;  %v10580_v34 = vrot.slane %v6208_v15, 2 }
 0x1b0   : > { %v1170_v5 = vsel %vm1160_vm3, %v1168_v35, %v10579_v38  ;;  %v1714_v26 = vrot.slane %v1614_v53, 2  ;;  %v1918_v35 = vmul.f32 %v5685_v11, %v6086_v22  ;;  %v1919_v38 = vmul.f32 %v5685_v11, %v6106_v10 }
 0x1b1   : > { %v1272_v58 = vadd.f32 %v1170_v5, %v1039_v45  ;;  %v6288_v59 = vsel %vm1160_vm3, %v10580_v34, %v1221_v54  ;;  %v6295_v55 = vsel %vm673_vm1, 0.0, %v686_v63  ;;  %v10582_v27 = vmax.f32 %v6246_v13, 0.0 }
 0x1b2   : > { %10581 = vst [vmem:[#allocation70_spill] sm:$0xff] %v6288_v59  ;;  %v1474_v23 = vsel %vm927_vm2, %v1472_v16, %v1473_v50  ;;  %v6302_v34 = vsel %vm673_vm1, 0.0, %v6274_v62  ;;  %v1713_v54 = vrot.slane %v1613_v14, 2  ;;  %v2015_v5 = vrot.slane %v1919_v38, 1 }
 0x1b3   : > { %v711_v45 = vrot.slane %v10582_v27, 7  ;;  %v1337_v32 = vadd.f32 %v1305_v24, %v1272_v58  ;;  %v2152_v53 = vmul.f32 %v5870_v17, %v6106_v10  ;;  %v6307_v6 = vsel %vm673_vm1, %v686_v63, %v687_v46 }
 0x1b4   : > { %v1852_v13 = vmul.f32 %v5687_v12, %v6086_v22  ;;  %v2151_v58 = vmul.f32 %v5870_v17, %v6086_v22  ;;  %v1715_v16 = vsel %vm1160_vm3, %v1713_v54, %v1714_v26  ;;  %v2014_v27 = vrot.slane %v1918_v35, 1 }
 0x1b5   : > { %v1578_v59 = vadd.f32 %v1474_v23, %v1337_v32  ;;  %v1273_v24 = vadd.f32 %v5940_v7, %v5975_v0  ;;  %v1306_v14 = vmul.f32 %v5668_v1, %v5851_v31  ;;  %v6319_v38 = vsel %vm673_vm1, %v687_v46, 0.0 }
 0x1b6   : > { %v6323_v63 = vmul.f32 %v5641_v42, %v6307_v6  ;;  %v10584_v23 = vrot.slane %v5991_v19, 1  ;;  %v850_v35 = vmul.f32 %v5641_v42, %v6319_v38  ;;  %v2016_v7 = vsel %vm927_vm2, %v2014_v27, %v2015_v5  ;;  %4204 = vrot.lane.b32.xlu0 %v5687_v12, %s5461_s1 }
 0x1b7   : > { %v1819_v32 = vadd.f32 %v1715_v16, %v1578_v59  ;;  %v2248_v0 = vrot.slane %v2152_v53, 2  ;;  %v1338_v54 = vadd.f32 %v1306_v14, %v1273_v24  ;;  %v6333_v31 = vmul.f32 %v5641_v42, %v6295_v55  ;;  %v543_v16 = vpop.f32.mrf.mxu0 }
 0x1b8   : > { %10583 = vst [vmem:[#allocation71_spill] sm:$0xff] %v6323_v63  ;;  %v1476_v15 = vsel %vm927_vm2, %v1473_v50, %v10584_v23  ;;  %v2017_v56 = vrot.slane %v6194_v18, 1  ;;  %v2153_v59 = vmul.f32 %v5870_v17, %v6118_v33  ;;  %v6340_v19 = vmul.f32 %v5641_v42, %v6302_v34 }
 0x1b9   : > { %10585 = vst [vmem:[#allocation72_spill] sm:$0xff] %v6333_v31  ;;  %v1883_v46 = vadd.f32 %v1852_v13, %v1819_v32  ;;  %v2247_v50 = vrot.slane %v2151_v58, 2  ;;  %v1579_v23 = vadd.f32 %v1476_v15, %v1338_v54  ;;  %v1853_v53 = vmul.f32 %v5687_v12, %v6106_v10 }
 0x1ba   : > { %10586 = vst [vmem:[#allocation73_spill] sm:$0xff] %v6340_v19  ;;  %v813_v27 = vmul.f32 %v5649_v47, %v6307_v6  ;;  %v10278_v13 = vrot.slane %v6323_v63, 1  ;;  %v10587_v18 = vrot.slane %v6019_v28, 2  ;;  %v953_v14 = vrot.slane %v850_v35, 1 }
 0x1bb   : > { %v2116_v24 = vadd.f32 %v2016_v7, %v1883_v46  ;;  %v6352_v32 = vmul.f32 %v5651_v48, %v6307_v6  ;;  %v2249_v15 = vsel %vm1160_vm3, %v2247_v50, %v2248_v0  ;;  %v2018_v44 = vsel %vm927_vm2, %v2015_v5, %v2017_v56 }
 0x1bc   : > { %v1717_v33 = vsel %vm1160_vm3, %v1714_v26, %v10587_v18  ;;  %v2250_v2 = vrot.slane %v2153_v59, 2  ;;  %v1083_v28 = vmul.f32 %v5651_v48, %v6319_v38  ;;  %v6362_v26 = vmul.f32 %v5671_v3, %v6319_v38 }
 0x1bd   : > { %10588 = vst [vmem:[#allocation74_spill] sm:$0xff] %v6352_v32  ;;  %v1820_v58 = vadd.f32 %v1717_v33, %v1579_v23  ;;  %v2349_v21 = vadd.f32 %v2249_v15, %v2116_v24  ;;  %v6366_v46 = vmul.f32 %v5673_v4, %v6319_v38  ;;  %v6370_v50 = vmul.f32 %v5685_v11, %v6319_v38  ;;  %v591_v24 = vpop.f32.mrf.mxu1 }
 0x1be   : > { %v6374_v5 = vadd.f32 %v543_v16, %v5639_v41  ;;  %v954_v59 = vsel %vm927_vm2, %v10278_v13, %v953_v14  ;;  %v10282_v23 = vrot.slane %v6352_v32, 2  ;;  %v6385_v33 = vsel %vm673_vm1, %v711_v45, 0.0 }
 0x1bf   : > { %v1884_v35 = vadd.f32 %v1853_v53, %v1820_v58  ;;  %10589 = vst [vmem:[#allocation75_spill] sm:$0xff] %v6366_v46  ;;  %v2382_v56 = vadd.f32 %v5811_v52, %v2349_v21  ;;  %v6382_v53 = vsel %vm673_vm1, %v6274_v62, %v711_v45  ;;  %v2251_v15 = vsel %vm1160_vm3, %v2248_v0, %v2250_v2  ;;  %v546_v54 = vpop.f32.mrf.mxu0 }
 0x1c0   : > { %10590 = vst [vmem:[#allocation76_spill] sm:$0xff] %v6374_v5  ;;  %v6389_v21 = vmul.f32 %v5641_v42, %v6382_v53  ;;  %v874_v14 = vmul.f32 %v5641_v42, %v6385_v33  ;;  %v6396_v58 = vmul.f32 %v5651_v48, %v6382_v53  ;;  %v1186_v45 = vrot.slane %v1083_v28, 2 }
 0x1c1   : > { %v2117_v18 = vadd.f32 %v2018_v44, %v1884_v35  ;;  %v2414_v16 = vmax.f32 %v2382_v56, 0.0  ;;  %v1107_v44 = vmul.f32 %v5651_v48, %v6385_v33  ;;  %v10283_v56 = vmax.f32 %v6374_v5, 0.0 }
 0x1c2   : > { %10591 = vst [vmem:[#allocation77_spill] sm:$0xff] %v6389_v21  ;;  %v822_v2 = vmul.f32 %v5649_v47, %v5776_v8  ;;  %v6407_v7 = vadd.f32 %v591_v24, %v5639_v41  ;;  %v10594_v13 = vrot.slane %v5823_v61, 1  ;;  %v6420_v35 = vmul.f32 %v5671_v3, %v6385_v33 }
 0x1c3   : > { %10592 = vst [vmem:[#allocation78_spill] sm:$0xff] %v6396_v58  ;;  %v2350_v62 = vadd.f32 %v2251_v15, %v2117_v18  ;;  %2482 = vrot.lane.b32.xlu2 %v2414_v16, %s5460_s21  ;;  %v10595_v18 = vrot.slane %v5799_v49, 1  ;;  %v1096_v16 = vmul.f32 %v5651_v48, %v5776_v8  ;;  %v6416_v15 = vadd.f32 %v954_v59, %v813_v27 }
 0x1c4   : > { %10593 = vst [vmem:[#allocation79_spill] sm:$0xff] %v6407_v7  ;;  %v6424_v24 = vmul.f32 %v5673_v4, %v6385_v33  ;;  %v10285_v61 = vrot.slane %v6389_v21, 1  ;;  %v993_v49 = vrot.slane %v874_v14, 1  ;;  %v6432_v27 = vsel %vm1160_vm3, %v10282_v23, %v1186_v45 }
 0x1c5   : > { %v977_v28 = vsel %vm927_vm2, %v10595_v18, %v10594_v13  ;;  %10596 = vst [vmem:[#allocation80_spill] sm:$0xff] %v6416_v15  ;;  %v2383_v0 = vadd.f32 %v5811_v52, %v2350_v62  ;;  %v1226_v18 = vrot.slane %v1107_v44, 2  ;;  %v689_v59 = vrot.slane %v10283_v56, 7 }
 0x1c6   : > { %10597 = vst [vmem:[#allocation81_spill] sm:$0xff] %v6420_v35  ;;  %v6437_v8 = vadd.f32 %v546_v54, %v5639_v41  ;;  %v1055_v19 = vadd.f32 %v977_v28, %v822_v2  ;;  %v6441_v62 = vmul.f32 %v5649_v47, %v6382_v53  ;;  %v6445_v14 = vmul.f32 %v5685_v11, %v6385_v33 }
 0x1c7   : > { %10598 = vst [vmem:[#allocation82_spill] sm:$0xff] %v6424_v24  ;;  %v10287_v44 = vmax.f32 %v6407_v7, 0.0  ;;  %v1208_v13 = vrot.slane %v1096_v16, 2  ;;  %v2415_v56 = vmax.f32 %v2383_v0, 0.0  ;;  %v1321_v54 = vmul.f32 %v5668_v1, %v5963_v9 }
 0x1c8   : > { %10599 = vst [vmem:[#allocation83_spill] sm:$0xff] %v6432_v27  ;;  %v994_v2 = vsel %vm927_vm2, %v10285_v61, %v993_v49  ;;  %v10601_v28 = vrot.slane %v6396_v58, 2  ;;  %v594_v27 = vpop.f32.mrf.mxu1  ;;  %v10603_v16 = vrot.slane %v5921_v20, 2  ;;  %v1396_v0 = vmul.f32 %v5671_v3, %v5963_v9 }
 0x1c9   : > { %10600 = vst [vmem:[#allocation84_spill] sm:$0xff] %v6437_v8  ;;  %v6466_v23 = vsel %vm673_vm1, 0.0, %v689_v59  ;;  %v10605_v7 = vmax.f32 %v6437_v8, 0.0 }
 0x1ca   : > { %v6458_v5 = vsel %vm1160_vm3, %v10601_v28, %v1226_v18  ;;  %v1210_v45 = vsel %vm1160_vm3, %v1208_v13, %v10603_v16  ;;  %v1397_v18 = vmul.f32 %v5671_v3, %v5978_v37  ;;  %v6474_v28 = vrot.slane %v10287_v44, 7 }
 0x1cb   : > { %10602 = vst [vmem:[#allocation85_spill] sm:$0xff] %v6458_v5  ;;  %2484 = vrot.lane.b32.xlu2 %v2415_v56, %s5460_s21  ;;  %v1288_v61 = vadd.f32 %v1210_v45, %v1055_v19  ;;  %v1512_v20 = vrot.slane %v1396_v0, 1  ;;  %v1637_v13 = vmul.f32 %v5673_v4, %v5963_v9  ;;  %v1638_v16 = vmul.f32 %v5673_v4, %v5978_v37 }
 0x1cc   : > { %v6481_v5 = vadd.f32 %v594_v27, %v5639_v41  ;;  %v1513_v49 = vrot.slane %v1397_v18, 1  ;;  %v1942_v19 = vmul.f32 %v5685_v11, %v6142_v60  ;;  %v1943_v44 = vmul.f32 %v5685_v11, %v6150_v43 }
 0x1cd   : > { %v1353_v56 = vadd.f32 %v1321_v54, %v1288_v61  ;;  %v1753_v45 = vrot.slane %v1637_v13, 2  ;;  %v1754_v58 = vrot.slane %v1638_v16, 2  ;;  %v2175_v0 = vmul.f32 %v5870_v17, %v6142_v60 }
 0x1ce   : > { %10604 = vst [vmem:[#allocation86_spill] sm:$0xff] %v6481_v5  ;;  %v690_v21 = vrot.slane %v10605_v7, 7  ;;  %v1514_v15 = vsel %vm927_vm2, %v1512_v20, %v1513_v49  ;;  %v2054_v27 = vrot.slane %v1942_v19, 1  ;;  %v2176_v61 = vmul.f32 %v5870_v17, %v6150_v43 }
 0x1cf   : > { %v1594_v54 = vadd.f32 %v1514_v15, %v1353_v56  ;;  %v1755_v18 = vsel %vm1160_vm3, %v1753_v45, %v1754_v58  ;;  %v1868_v13 = vmul.f32 %v5687_v12, %v6142_v60  ;;  %v2055_v16 = vrot.slane %v1943_v44, 1 }
 0x1d0   : > { %v6499_v32 = vmul.f32 %v5641_v42, %v6466_v23  ;;  %v6503_v7 = vsel %vm673_vm1, 0.0, %v6474_v28  ;;  %v2287_v20 = vrot.slane %v2175_v0, 2  ;;  %v2288_v19 = vrot.slane %v2176_v61, 2  ;;  %v549_v0 = vpop.f32.mrf.mxu0  ;;  %v10609_v61 = vld [vmem:[#allocation49_spill] sm:$0xff] }
 0x1d1   : > { %10607 = vst [vmem:[#allocation88_spill] sm:$0xff] %v6503_v7  ;;  %v6507_v8 = vmul.f32 %v5641_v42, %v6503_v7  ;;  %v1835_v15 = vadd.f32 %v1755_v18, %v1594_v54  ;;  %v1289_v56 = vadd.f32 %v6003_v57, %v5987_v25  ;;  %v1322_v44 = vmul.f32 %v5668_v1, %v5978_v37  ;;  %v10612_v37 = vld [vmem:[#allocation51_spill] sm:$0xff] }
 0x1d2   : > { %10606 = vst [vmem:[#allocation87_spill] sm:$0xff] %v6499_v32  ;;  %v6514_v45 = vsel %vm673_vm1, %v689_v59, %v690_v21  ;;  %v2056_v63 = vsel %vm927_vm2, %v2054_v27, %v2055_v16  ;;  %v10610_v24 = vrot.slane %v10609_v61, 1  ;;  %v6522_v54 = vsel %vm673_vm1, %v690_v21, 0.0  ;;  %v597_v61 = vpop.f32.mrf.mxu1 }
 0x1d3   : > { %10608 = vst [vmem:[#allocation89_spill] sm:$0xff] %v6507_v8  ;;  %v6526_v25 = vmul.f32 %v5641_v42, %v6514_v45  ;;  %v1899_v57 = vadd.f32 %v1868_v13, %v1835_v15  ;;  %v1354_v18 = vadd.f32 %v1322_v44, %v1289_v56  ;;  %v2289_v59 = vsel %vm1160_vm3, %v2287_v20, %v2288_v19 }
 0x1d4   : > { %v1516_v35 = vsel %vm927_vm2, %v1513_v49, %v10610_v24  ;;  %v10613_v31 = vrot.slane %v10612_v37, 2  ;;  %v2057_v7 = vrot.slane %v6253_v39, 1  ;;  %v2177_v24 = vmul.f32 %v5870_v17, %v6165_v36 }
 0x1d5   : > { %10611 = vst [vmem:[#allocation49_spill] sm:$0xff] %v6526_v25  ;;  %v853_v21 = vmul.f32 %v5641_v42, %v6522_v54  ;;  %v2132_v49 = vadd.f32 %v2056_v63, %v1899_v57  ;;  %v1595_v46 = vadd.f32 %v1516_v35, %v1354_v18  ;;  %v1869_v13 = vmul.f32 %v5687_v12, %v6150_v43 }
 0x1d6   : > { %v1757_v27 = vsel %vm1160_vm3, %v1754_v58, %v10613_v31  ;;  %v6540_v20 = vadd.f32 %v994_v2, %v6441_v62  ;;  %v2290_v39 = vrot.slane %v2177_v24, 2  ;;  %v6546_v36 = vmul.f32 %v5651_v48, %v6514_v45 }
 0x1d7   : > { %v10616_v58 = vmax.f32 %v6481_v5, 0.0  ;;  %v2365_v15 = vadd.f32 %v2289_v59, %v2132_v49  ;;  %v1836_v35 = vadd.f32 %v1757_v27, %v1595_v46  ;;  %v10301_v56 = vrot.slane %v6526_v25, 1 }
 0x1d8   : > { %10614 = vst [vmem:[#allocation51_spill] sm:$0xff] %v6540_v20  ;;  %v1086_v62 = vmul.f32 %v5651_v48, %v6522_v54  ;;  %v6555_v2 = vmul.f32 %v5671_v3, %v6522_v54  ;;  %v2058_v44 = vsel %vm927_vm2, %v2055_v16, %v2057_v7  ;;  %v958_v57 = vrot.slane %v853_v21, 1 }
 0x1d9   : > { %10615 = vst [vmem:[#allocation90_spill] sm:$0xff] %v6546_v36  ;;  %v714_v63 = vrot.slane %v10616_v58, 7  ;;  %v2398_v18 = vadd.f32 %v5811_v52, %v2365_v15  ;;  %v6560_v24 = vadd.f32 %v549_v0, %v5639_v41  ;;  %v1900_v58 = vadd.f32 %v1869_v13, %v1836_v35 }
 0x1da   : > { %10617 = vst [vmem:[#allocation91_spill] sm:$0xff] %v6555_v2  ;;  %v815_v46 = vmul.f32 %v5649_v47, %v6514_v45  ;;  %v6566_v59 = vmul.f32 %v5673_v4, %v6522_v54  ;;  %v6570_v27 = vmul.f32 %v5685_v11, %v6522_v54  ;;  %v2291_v16 = vsel %vm1160_vm3, %v2288_v19, %v2290_v39  ;;  %v552_v19 = vpop.f32.mrf.mxu0  ;;  %v10624_v39 = vld [vmem:[#allocation31_spill] sm:$0xff] }
 0x1db   : > { %10618 = vst [vmem:[#allocation92_spill] sm:$0xff] %v6560_v24  ;;  %v6575_v7 = vsel %vm673_vm1, %v6474_v28, %v714_v63  ;;  %v6578_v0 = vsel %vm673_vm1, %v714_v63, 0.0  ;;  %v2430_v21 = vmax.f32 %v2398_v18, 0.0  ;;  %v2133_v49 = vadd.f32 %v2058_v44, %v1900_v58 }
 0x1dc   : > { %10619 = vst [vmem:[#allocation93_spill] sm:$0xff] %v6566_v59  ;;  %v1191_v15 = vrot.slane %v1086_v62, 2  ;;  %v6583_v35 = vmul.f32 %v5641_v42, %v6575_v7  ;;  %v877_v31 = vmul.f32 %v5641_v42, %v6578_v0  ;;  %v959_v28 = vsel %vm927_vm2, %v10301_v56, %v958_v57 }
 0x1dd   : > { %2514 = vrot.lane.b32.xlu2 %v2430_v21, %s5460_s21  ;;  %v2366_v44 = vadd.f32 %v2291_v16, %v2133_v49  ;;  %v6596_v18 = vmul.f32 %v5651_v48, %v6575_v7  ;;  %v1110_v58 = vmul.f32 %v5651_v48, %v6578_v0  ;;  %v6601_v37 = vadd.f32 %v597_v61, %v5639_v41  ;;  %v600_v21 = vpop.f32.mrf.mxu1  ;;  %v10626_v49 = vld [vmem:[#allocation40_spill] sm:$0xff] }
 0x1de   : > { %10620 = vst [vmem:[#allocation94_spill] sm:$0xff] %v6583_v35  ;;  %v6605_v56 = vadd.f32 %v552_v19, %v5639_v41  ;;  %v10625_v16 = vrot.slane %v10624_v39, 1  ;;  %v10627_v62 = vrot.slane %v10626_v49, 1  ;;  %v1075_v13 = vmul.f32 %v5651_v48, %v5949_v40 }
 0x1df   : > { %10621 = vst [vmem:[#allocation95_spill] sm:$0xff] %v6596_v18  ;;  %v2399_v57 = vadd.f32 %v5811_v52, %v2366_v44  ;;  %v998_v8 = vrot.slane %v877_v31, 1  ;;  %v6617_v61 = vmul.f32 %v5671_v3, %v6578_v0  ;;  %v808_v19 = vmul.f32 %v5649_v47, %v5949_v40 }
 0x1e0   : > { %10622 = vst [vmem:[#allocation96_spill] sm:$0xff] %v6601_v37  ;;  %v942_v63 = vsel %vm927_vm2, %v10627_v62, %v10625_v16  ;;  %v6621_v44 = vadd.f32 %v959_v28, %v815_v46  ;;  %v10630_v39 = vrot.slane %v6546_v36, 2  ;;  %v831_v62 = vmul.f32 %v5649_v47, %v6575_v7 }
 0x1e1   : > { %10623 = vst [vmem:[#allocation97_spill] sm:$0xff] %v6605_v56  ;;  %v10632_v16 = vmax.f32 %v6560_v24, 0.0  ;;  %v6634_v5 = vmul.f32 %v5673_v4, %v6578_v0  ;;  %v6638_v40 = vmul.f32 %v5685_v11, %v6578_v0  ;;  %v10310_v46 = vmax.f32 %v6601_v37, 0.0 }
 0x1e2   : > { %10628 = vst [vmem:[#allocation31_spill] sm:$0xff] %v6617_v61  ;;  %v6626_v49 = vsel %vm1160_vm3, %v10630_v39, %v1191_v15  ;;  %v1041_v28 = vadd.f32 %v942_v63, %v808_v19  ;;  %v2431_v39 = vmax.f32 %v2399_v57, 0.0  ;;  %v10634_v24 = vrot.slane %v6583_v35, 1  ;;  %v10636_v63 = vld [vmem:[#allocation32_spill] sm:$0xff] }
 0x1e3   : > { %10629 = vst [vmem:[#allocation40_spill] sm:$0xff] %v6621_v44  ;;  %v692_v31 = vrot.slane %v10632_v16, 7  ;;  %v1173_v44 = vrot.slane %v1075_v13, 2  ;;  %v1231_v36 = vrot.slane %v1110_v58, 2  ;;  %v1307_v25 = vmul.f32 %v5668_v1, %v6086_v22 }
 0x1e4   : > { %10631 = vst [vmem:[#allocation98_spill] sm:$0xff] %v6626_v49  ;;  %v10311_v49 = vmax.f32 %v6605_v56, 0.0  ;;  %v999_v16 = vsel %vm927_vm2, %v10634_v24, %v998_v8  ;;  %v10637_v57 = vrot.slane %v10636_v63, 2  ;;  %v1375_v13 = vmul.f32 %v5671_v3, %v6086_v22 }
 0x1e5   : > { %10633 = vst [vmem:[#allocation99_spill] sm:$0xff] %v6634_v5  ;;  %v6650_v20 = vsel %vm673_vm1, 0.0, %v692_v31  ;;  %2516 = vrot.lane.b32.xlu2 %v2431_v39, %s5460_s21  ;;  %v1376_v8 = vmul.f32 %v5671_v3, %v6106_v10  ;;  %v716_v24 = vrot.slane %v10310_v46, 7  ;;  %v6663_v58 = vadd.f32 %v600_v21, %v5639_v41 }
 0x1e6   : > { %10635 = vst [vmem:[#allocation100_spill] sm:$0xff] %v6650_v20  ;;  %v1175_v19 = vsel %vm1160_vm3, %v1173_v44, %v10637_v57  ;;  %v1616_v39 = vmul.f32 %v5673_v4, %v6086_v22  ;;  %v693_v63 = vrot.slane %v10311_v49, 7  ;;  %v1477_v44 = vrot.slane %v1375_v13, 1 }
 0x1e7   : > { %10638 = vst [vmem:[#allocation32_spill] sm:$0xff] %v6663_v58  ;;  %v1274_v32 = vadd.f32 %v1175_v19, %v1041_v28  ;;  %v1478_v57 = vrot.slane %v1376_v8, 1  ;;  %v1617_v15 = vmul.f32 %v5673_v4, %v6106_v10  ;;  %v1921_v46 = vmul.f32 %v5685_v11, %v6295_v55  ;;  %v603_v8 = vpop.f32.mrf.mxu1 }
 0x1e8   : > { %v1718_v61 = vrot.slane %v1616_v39, 2  ;;  %v6675_v21 = vmul.f32 %v5685_v11, %v6307_v6  ;;  %v2154_v49 = vmul.f32 %v5870_v17, %v6295_v55  ;;  %v6682_v13 = vmul.f32 %v5870_v17, %v6307_v6 }
 0x1e9   : > { %v1339_v35 = vadd.f32 %v1307_v25, %v1274_v32  ;;  %v1479_v28 = vsel %vm927_vm2, %v1477_v44, %v1478_v57  ;;  %v1719_v19 = vrot.slane %v1617_v15, 2  ;;  %v1854_v25 = vmul.f32 %v5687_v12, %v6295_v55 }
 0x1ea   : > { %v2019_v39 = vrot.slane %v1921_v46, 1  ;;  %v2020_v37 = vrot.slane %v6675_v21, 1  ;;  %v6689_v56 = vmul.f32 %v5641_v42, %v6650_v20  ;;  %v2252_v44 = vrot.slane %v2154_v49, 2 }
 0x1eb   : > { %v1580_v32 = vadd.f32 %v1479_v28, %v1339_v35  ;;  %v1720_v15 = vsel %vm1160_vm3, %v1718_v61, %v1719_v19  ;;  %v2253_v59 = vrot.slane %v6682_v13, 2  ;;  %v10640_v17 = vrot.slane %v6596_v18, 2  ;;  %v10646_v35 = vld [vmem:[#allocation36_spill] sm:$0xff] }
 0x1ec   : > { %10639 = vst [vmem:[#allocation101_spill] sm:$0xff] %v6689_v56  ;;  %v10318_v46 = vmax.f32 %v6663_v58, 0.0  ;;  %v6700_v21 = vadd.f32 %v999_v16, %v831_v62  ;;  %v6703_v20 = vsel %vm673_vm1, %v692_v31, %v693_v63  ;;  %v6706_v61 = vsel %vm673_vm1, %v693_v63, 0.0 }
 0x1ed   : > { %v6696_v2 = vsel %vm1160_vm3, %v10640_v17, %v1231_v36  ;;  %v1821_v28 = vadd.f32 %v1720_v15, %v1580_v32  ;;  %10643 = vst [vmem:[#allocation104_spill] sm:$0xff] %v6706_v61  ;;  %v2021_v49 = vsel %vm927_vm2, %v2019_v39, %v2020_v37  ;;  %v6711_v13 = vmul.f32 %v5641_v42, %v6703_v20  ;;  %v10645_v17 = vld [vmem:[#allocation35_spill] sm:$0xff] }
 0x1ee   : > { %10641 = vst [vmem:[#allocation102_spill] sm:$0xff] %v6696_v2  ;;  %v1275_v2 = vadd.f32 %v10646_v35, %v10645_v17  ;;  %v1308_v62 = vmul.f32 %v5668_v1, %v6106_v10  ;;  %v6719_v31 = vsel %vm673_vm1, 0.0, %v716_v24  ;;  %v856_v63 = vmul.f32 %v5641_v42, %v6706_v61 }
 0x1ef   : > { %10642 = vst [vmem:[#allocation103_spill] sm:$0xff] %v6700_v21  ;;  %v1885_v36 = vadd.f32 %v1854_v25, %v1821_v28  ;;  %v2254_v32 = vsel %vm1160_vm3, %v2252_v44, %v2253_v59  ;;  %v717_v39 = vrot.slane %v10318_v46, 7  ;;  %v10647_v35 = vrot.slane %v6162_v30, 1  ;;  %v606_v58 = vpop.f32.mrf.mxu1 }
 0x1f0   : > { %10644 = vst [vmem:[#allocation105_spill] sm:$0xff] %v6711_v13  ;;  %v1340_v15 = vadd.f32 %v1308_v62, %v1275_v2  ;;  %v878_v10 = vmul.f32 %v5641_v42, %v6719_v31  ;;  %v817_v17 = vmul.f32 %v5649_v47, %v6703_v20  ;;  %v6735_v16 = vmul.f32 %v5651_v48, %v6703_v20 }
 0x1f1   : > { %v2118_v25 = vadd.f32 %v2021_v49, %v1885_v36  ;;  %v1481_v28 = vsel %vm927_vm2, %v1478_v57, %v10647_v35  ;;  %v1089_v44 = vmul.f32 %v5651_v48, %v6706_v61  ;;  %v6742_v30 = vmul.f32 %v5671_v3, %v6706_v61 }
 0x1f2   : > { %10648 = vst [vmem:[#allocation35_spill] sm:$0xff] %v6735_v16  ;;  %v6745_v57 = vadd.f32 %v603_v8, %v5639_v41  ;;  %v963_v36 = vrot.slane %v856_v63, 1  ;;  %v6749_v62 = vmul.f32 %v5673_v4, %v6706_v61  ;;  %v6753_v35 = vmul.f32 %v5685_v11, %v6706_v61 }
 0x1f3   : > { %10649 = vst [vmem:[#allocation36_spill] sm:$0xff] %v6742_v30  ;;  %v2351_v2 = vadd.f32 %v2254_v32, %v2118_v25  ;;  %v1581_v46 = vadd.f32 %v1481_v28, %v1340_v15  ;;  %v6756_v49 = vsel %vm673_vm1, %v716_v24, %v717_v39  ;;  %v10654_v32 = vrot.slane %v6185_v29, 2  ;;  %v6769_v28 = vld [vmem:[#allocation5 + $0x8] ss:$0 sm:$0xff] }
 0x1f4   : > { %10650 = vst [vmem:[#allocation106_spill] sm:$0xff] %v6745_v57  ;;  %v1855_v63 = vmul.f32 %v5687_v12, %v6307_v6  ;;  %v6766_v25 = vmul.f32 %v5641_v42, %v6756_v49  ;;  %v2022_v15 = vrot.slane %v6370_v50, 1  ;;  %v2156_v24 = vmul.f32 %v6769_v28, %v6319_v38 }
 0x1f5   : > { %10651 = vst [vmem:[#allocation107_spill] sm:$0xff] %v6749_v62  ;;  %v2384_v21 = vadd.f32 %v5811_v52, %v2351_v2  ;;  %v1722_v8 = vsel %vm1160_vm3, %v1719_v19, %v10654_v32  ;;  %v10326_v2 = vrot.slane %v6735_v16, 2  ;;  %v10325_v19 = vmax.f32 %v6745_v57, 0.0 }
 0x1f6   : > { %10652 = vst [vmem:[#allocation108_spill] sm:$0xff] %v6753_v35  ;;  %v1822_v18 = vadd.f32 %v1722_v8, %v1581_v46  ;;  %v6776_v32 = vadd.f32 %v606_v58, %v5639_v41  ;;  %v1196_v56 = vrot.slane %v1089_v44, 2  ;;  %v2023_v61 = vsel %vm927_vm2, %v2020_v37, %v2022_v15  ;;  %v10665_v15 = vld [vmem:[#allocation41_spill] sm:$0xff] }
 0x1f7   : > { %10653 = vst [vmem:[#allocation109_spill] sm:$0xff] %v6756_v49  ;;  %v2416_v29 = vmax.f32 %v2384_v21, 0.0  ;;  %v2255_v46 = vrot.slane %v2156_v24, 2  ;;  %v10657_v50 = vrot.slane %v6711_v13, 1  ;;  %v6785_v38 = vmul.f32 %v5651_v48, %v6756_v49 }
 0x1f8   : > { %10655 = vst [vmem:[#allocation110_spill] sm:$0xff] %v6766_v25  ;;  %v1886_v5 = vadd.f32 %v1855_v63, %v1822_v18  ;;  %v10324_v58 = vmax.f32 %v6776_v32, 0.0  ;;  %v10328_v21 = vrot.slane %v6766_v25, 1  ;;  %v555_v18 = vpop.f32.mrf.mxu0  ;;  %v1000_v44 = vrot.slane %v878_v10, 1 }
 0x1f9   : > { %10656 = vst [vmem:[#allocation111_spill] sm:$0xff] %v6776_v32  ;;  %v964_v8 = vsel %vm927_vm2, %v10657_v50, %v963_v36  ;;  %2486 = vrot.lane.b32.xlu2 %v2416_v29, %s5460_s21  ;;  %v2256_v63 = vsel %vm1160_vm3, %v2253_v59, %v2255_v46  ;;  %v719_v36 = vrot.slane %v10325_v19, 7  ;;  %v1111_v24 = vmul.f32 %v5651_v48, %v6719_v31 }
 0x1fa   : > { %10658 = vst [vmem:[#allocation112_spill] sm:$0xff] %v6785_v38  ;;  %v2119_v37 = vadd.f32 %v2023_v61, %v1886_v5  ;;  %v720_v29 = vrot.slane %v10324_v58, 7  ;;  %v6801_v50 = vsel %vm1160_vm3, %v10326_v2, %v1196_v56  ;;  %v6804_v5 = vsel %vm673_vm1, %v717_v39, 0.0 }
 0x1fb   : > { %10659 = vst [vmem:[#allocation113_spill] sm:$0xff] %v6801_v50  ;;  %v6807_v59 = vadd.f32 %v555_v18, %v5639_v41  ;;  %v6809_v10 = vadd.f32 %v964_v8, %v817_v17  ;;  %v6813_v46 = vmul.f32 %v5649_v47, %v6756_v49  ;;  %v832_v58 = vmul.f32 %v5649_v47, %v6719_v31 }
 0x1fc   : > { %v2352_v61 = vadd.f32 %v2256_v63, %v2119_v37  ;;  %v1099_v56 = vmul.f32 %v5651_v48, %v5963_v9  ;;  %v1002_v39 = vsel %vm927_vm2, %v1000_v44, %v10328_v21  ;;  %v824_v17 = vmul.f32 %v5649_v47, %v5963_v9  ;;  %v10663_v63 = vld [vmem:[#allocation45_spill] sm:$0xff] }
 0x1fd   : > { %10660 = vst [vmem:[#allocation114_spill] sm:$0xff] %v6807_v59  ;;  %v1233_v8 = vrot.slane %v1111_v24, 2  ;;  %v6827_v37 = vsel %vm673_vm1, %v719_v36, %v720_v29  ;;  %v10664_v2 = vrot.slane %v10663_v63, 1  ;;  %v10666_v35 = vrot.slane %v10665_v15, 1 }
 0x1fe   : > { %10661 = vst [vmem:[#allocation115_spill] sm:$0xff] %v6809_v10  ;;  %v2385_v18 = vadd.f32 %v5811_v52, %v2352_v61  ;;  %v1399_v19 = vmul.f32 %v5671_v3, %v6142_v60  ;;  %v6838_v44 = vmul.f32 %v5641_v42, %v6804_v5  ;;  %v6842_v61 = vmul.f32 %v5651_v48, %v6804_v5 }
 0x1ff   : > { %10662 = vst [vmem:[#allocation116_spill] sm:$0xff] %v6813_v46  ;;  %v982_v32 = vsel %vm927_vm2, %v10666_v35, %v10664_v2  ;;  %v1065_v57 = vadd.f32 %v1002_v39, %v832_v58  ;;  %v6846_v63 = vsel %vm673_vm1, %v720_v29, 0.0  ;;  %v1213_v15 = vrot.slane %v1099_v56, 2 }
 0x200   : > { %10667 = vst [vmem:[#allocation45_spill] sm:$0xff] %v6838_v44  ;;  %v2417_v21 = vmax.f32 %v2385_v18, 0.0  ;;  %v1400_v35 = vmul.f32 %v5671_v3, %v6150_v43  ;;  %v6851_v2 = vsel %vm673_vm1, 0.0, %v719_v36  ;;  %v6856_v46 = vmul.f32 %v5671_v3, %v6827_v37  ;;  %v558_v9 = vpop.f32.mrf.mxu0 }
 0x201   : > { %10668 = vst [vmem:[#allocation41_spill] sm:$0xff] %v6842_v61  ;;  %v1413_v18 = vmul.f32 %v5671_v3, %v6846_v63  ;;  %v1057_v58 = vadd.f32 %v982_v32, %v824_v17  ;;  %v10671_v29 = vrot.slane %v6785_v38, 2  ;;  %v1517_v39 = vrot.slane %v1399_v19, 1 }
 0x202   : > { %10669 = vst [vmem:[#allocation117_spill] sm:$0xff] %v6846_v63  ;;  %2488 = vrot.lane.b32.xlu2 %v2417_v21, %s5460_s21  ;;  %v1640_v24 = vmul.f32 %v5673_v4, %v6142_v60  ;;  %v1641_v36 = vmul.f32 %v5673_v4, %v6150_v43  ;;  %v6869_v21 = vmul.f32 %v5671_v3, %v6804_v5  ;;  %v10339_v61 = vrot.slane %v6856_v46, 1 }
 0x203   : > { %10670 = vst [vmem:[#allocation118_spill] sm:$0xff] %v6851_v2  ;;  %v1235_v56 = vsel %vm1160_vm3, %v1233_v8, %v10671_v29  ;;  %v1540_v63 = vrot.slane %v1413_v18, 1  ;;  %v1323_v32 = vmul.f32 %v5668_v1, %v6142_v60  ;;  %v10673_v19 = vmax.f32 %v6807_v59, 0.0 }
 0x204   : > { %10672 = vst [vmem:[#allocation119_spill] sm:$0xff] %v6869_v21  ;;  %v10674_v29 = vrot.slane %v6023_v51, 2  ;;  %v1518_v25 = vrot.slane %v1400_v35, 1  ;;  %v1298_v50 = vadd.f32 %v1235_v56, %v1065_v57  ;;  %v1331_v21 = vmul.f32 %v5668_v1, %v6851_v2 }
 0x205   : > { %v6877_v8 = vrot.slane %v10673_v19, 7  ;;  %v6887_v18 = vsel %vm927_vm2, %v10339_v61, %v1540_v63  ;;  %v6890_v17 = vadd.f32 %v558_v9, %v5639_v41  ;;  %v1758_v59 = vrot.slane %v1640_v24, 2  ;;  %v10678_v61 = vld [vmem:[#allocation59_spill] sm:$0xff] }
 0x206   : > { %v1215_v38 = vsel %vm1160_vm3, %v1213_v15, %v10674_v29  ;;  %10675 = vst [vmem:[#allocation120_spill] sm:$0xff] %v6887_v18  ;;  %v1519_v19 = vsel %vm927_vm2, %v1517_v39, %v1518_v25  ;;  %v1759_v51 = vrot.slane %v1641_v36, 2  ;;  %v1945_v57 = vmul.f32 %v5685_v11, %v6302_v34  ;;  %v10677_v29 = vld [vmem:[#allocation53_spill] sm:$0xff] }
 0x207   : > { %v1290_v10 = vadd.f32 %v1215_v38, %v1057_v58  ;;  %10676 = vst [vmem:[#allocation121_spill] sm:$0xff] %v6890_v17  ;;  %v1946_v15 = vmul.f32 %v5685_v11, %v6382_v53  ;;  %v2178_v35 = vmul.f32 %v6769_v28, %v6302_v34  ;;  %v6901_v38 = vmul.f32 %v5671_v3, %v6851_v2 }
 0x208   : > { %v6905_v9 = vmul.f32 %v5673_v4, %v6851_v2  ;;  %v1760_v24 = vsel %vm1160_vm3, %v1758_v59, %v1759_v51  ;;  %v1870_v58 = vmul.f32 %v5687_v12, %v6302_v34  ;;  %v2059_v56 = vrot.slane %v1945_v57, 1 }
 0x209   : > { %v1355_v44 = vadd.f32 %v1323_v32, %v1290_v10  ;;  %v2179_v10 = vmul.f32 %v6769_v28, %v6382_v53  ;;  %v2060_v39 = vrot.slane %v1946_v15, 1  ;;  %v2292_v36 = vrot.slane %v2178_v35, 2 }
 0x20a   : > { %v1291_v18 = vadd.f32 %v10678_v61, %v10677_v29  ;;  %v1324_v2 = vmul.f32 %v5668_v1, %v6150_v43  ;;  %v6918_v59 = vsel %vm673_vm1, 0.0, %v6877_v8  ;;  %v10348_v16 = vmax.f32 %v6890_v17, 0.0  ;;  %v10681_v43 = vld [vmem:[#allocation67_spill] sm:$0xff]  ;;  %v10723_v17 = vld [vmem:[#allocation104_spill] sm:$0xff] }
 0x20b   : > { %v1596_v63 = vadd.f32 %v1519_v19, %v1355_v44  ;;  %v2293_v32 = vrot.slane %v2179_v10, 2  ;;  %v10679_v19 = vld [vmem:[#allocation63_spill] sm:$0xff]  ;;  %v6924_v15 = vadd.f32 %v1331_v21, %v1298_v50  ;;  %v1537_v35 = vrot.slane %v6901_v38, 1 }
 0x20c   : > { %v10680_v13 = vrot.slane %v10679_v19, 1  ;;  %v2061_v61 = vsel %vm927_vm2, %v2059_v56, %v2060_v39  ;;  %v1356_v10 = vadd.f32 %v1324_v2, %v1291_v18  ;;  %v10682_v62 = vrot.slane %v10681_v43, 2 }
 0x20d   : > { %v1837_v44 = vadd.f32 %v1760_v24, %v1596_v63  ;;  %v2062_v49 = vrot.slane %v6445_v14, 1  ;;  %v2180_v24 = vmul.f32 %v6769_v28, %v6385_v33  ;;  %v1778_v63 = vrot.slane %v6905_v9, 2  ;;  %v10685_v9 = vld [vmem:[#allocation55_spill] sm:$0xff] }
 0x20e   : > { %v1521_v57 = vsel %vm927_vm2, %v1518_v25, %v10680_v13  ;;  %v1762_v30 = vsel %vm1160_vm3, %v1759_v51, %v10682_v62  ;;  %v2294_v13 = vsel %vm1160_vm3, %v2292_v36, %v2293_v32  ;;  %v1871_v50 = vmul.f32 %v5687_v12, %v6382_v53  ;;  %v10683_v51 = vld [vmem:[#allocation54_spill] sm:$0xff] }
 0x20f   : > { %v1901_v29 = vadd.f32 %v1870_v58, %v1837_v44  ;;  %v1597_v25 = vadd.f32 %v1521_v57, %v1356_v10  ;;  %v6940_v2 = vrot.slane %v10348_v16, 7  ;;  %v6944_v62 = vmul.f32 %v5673_v4, %v6827_v37 }
 0x210   : > { %v2295_v21 = vrot.slane %v2180_v24, 2  ;;  %v810_v33 = vmul.f32 %v5649_v47, %v6086_v22  ;;  %v10684_v38 = vrot.slane %v10683_v51, 1  ;;  %v10686_v58 = vrot.slane %v10685_v9, 1 }
 0x211   : > { %v2134_v14 = vadd.f32 %v2061_v61, %v1901_v29  ;;  %v1838_v18 = vadd.f32 %v1762_v30, %v1597_v25  ;;  %v1078_v36 = vmul.f32 %v5651_v48, %v6086_v22  ;;  %v2063_v19 = vsel %vm927_vm2, %v2060_v39, %v2062_v49 }
 0x212   : > { %v947_v56 = vsel %vm927_vm2, %v10686_v58, %v10684_v38  ;;  %v2296_v57 = vsel %vm1160_vm3, %v2293_v32, %v2295_v21  ;;  %v1309_v30 = vmul.f32 %v5668_v1, %v6295_v55  ;;  %v1378_v43 = vmul.f32 %v5671_v3, %v6295_v55 }
 0x213   : > { %v2367_v44 = vadd.f32 %v2294_v13, %v2134_v14  ;;  %v1902_v61 = vadd.f32 %v1871_v50, %v1838_v18  ;;  %v1043_v10 = vadd.f32 %v947_v56, %v810_v33  ;;  %v1178_v29 = vrot.slane %v1078_v36, 2  ;;  %v10687_v13 = vld [vmem:[#allocation57_spill] sm:$0xff] }
 0x214   : > { %v1379_v25 = vmul.f32 %v5671_v3, %v6307_v6  ;;  %v1619_v22 = vmul.f32 %v5673_v4, %v6295_v55  ;;  %v1620_v49 = vmul.f32 %v5673_v4, %v6307_v6  ;;  %v10351_v39 = vrot.slane %v6944_v62, 2 }
 0x215   : > { %v2400_v24 = vadd.f32 %v5811_v52, %v2367_v44  ;;  %v2135_v32 = vadd.f32 %v2063_v19, %v1902_v61  ;;  %v10688_v50 = vrot.slane %v10687_v13, 2  ;;  %v1482_v21 = vrot.slane %v1378_v43, 1 }
 0x216   : > { %v1483_v51 = vrot.slane %v1379_v25, 1  ;;  %v1723_v38 = vrot.slane %v1619_v22, 2  ;;  %v1724_v58 = vrot.slane %v1620_v49, 2  ;;  %v1924_v56 = vmul.f32 %v5685_v11, %v6466_v23 }
 0x217   : > { %v1180_v14 = vsel %vm1160_vm3, %v1178_v29, %v10688_v50  ;;  %v2432_v18 = vmax.f32 %v2400_v24, 0.0  ;;  %v2368_v9 = vadd.f32 %v2296_v57, %v2135_v32  ;;  %v1925_v36 = vmul.f32 %v5685_v11, %v6514_v45 }
 0x218   : > { %v1276_v33 = vadd.f32 %v1180_v14, %v1043_v10  ;;  %v1484_v19 = vsel %vm927_vm2, %v1482_v21, %v1483_v51  ;;  %v2157_v61 = vmul.f32 %v6769_v28, %v6466_v23  ;;  %v2158_v10 = vmul.f32 %v6769_v28, %v6514_v45 }
 0x219   : > { %2518 = vrot.lane.b32.xlu2 %v2432_v18, %s5460_s21  ;;  %v2401_v57 = vadd.f32 %v5811_v52, %v2368_v9  ;;  %v1725_v29 = vsel %vm1160_vm3, %v1723_v38, %v1724_v58  ;;  %v2024_v43 = vrot.slane %v1924_v56, 1  ;;  %v2025_v24 = vrot.slane %v1925_v36, 1 }
 0x21a   : > { %v1341_v44 = vadd.f32 %v1309_v30, %v1276_v33  ;;  %v1856_v22 = vmul.f32 %v5687_v12, %v6466_v23  ;;  %v2257_v49 = vrot.slane %v2157_v61, 2  ;;  %v2258_v30 = vrot.slane %v2158_v10, 2  ;;  %v10691_v61 = vld [vmem:[#allocation66_spill] sm:$0xff] }
 0x21b   : > { %v6988_v32 = vmul.f32 %v5641_v42, %v6918_v59  ;;  %v6993_v13 = vsel %vm673_vm1, %v6877_v8, %v6940_v2  ;;  %v2433_v50 = vmax.f32 %v2401_v57, 0.0  ;;  %v10689_v14 = vrot.slane %v6856_v46, 1 }
 0x21c   : > { %v1582_v25 = vadd.f32 %v1484_v19, %v1341_v44  ;;  %v2026_v33 = vsel %vm927_vm2, %v2024_v43, %v2025_v24  ;;  %v2259_v38 = vsel %vm1160_vm3, %v2257_v49, %v2258_v30  ;;  %v1780_v56 = vsel %vm1160_vm3, %v1778_v63, %v10351_v39  ;;  %v10690_v19 = vld [vmem:[#allocation65_spill] sm:$0xff] }
 0x21d   : > { %v1539_v21 = vsel %vm927_vm2, %v1537_v35, %v10689_v14  ;;  %v7005_v36 = vmul.f32 0.0, %v5687_v12  ;;  %v7008_v8 = vmul.f32 0.0, %v5685_v11  ;;  %v7011_v46 = vmul.f32 0.0, %v6769_v28 }
 0x21e   : > { %v1823_v18 = vadd.f32 %v1725_v29, %v1582_v25  ;;  %v1604_v9 = vadd.f32 %v1539_v21, %v6924_v15  ;;  %v1277_v10 = vadd.f32 %v10691_v61, %v10690_v19  ;;  %v1310_v15 = vmul.f32 %v5668_v1, %v6307_v6  ;;  %v10693_v25 = vld [vmem:[#allocation75_spill] sm:$0xff] }
 0x21f   : > { %v10350_v57 = vrot.slane %v7008_v8, 1  ;;  %v10349_v63 = vrot.slane %v7011_v46, 2  ;;  %v10692_v29 = vrot.slane %v6362_v26, 1  ;;  %v10694_v49 = vrot.slane %v10693_v25, 2  ;;  %v7046_v25 = vpop.permute.xlu2 %2474 }
 0x220   : > { %v1887_v35 = vadd.f32 %v1856_v22, %v1823_v18  ;;  %v1845_v44 = vadd.f32 %v1780_v56, %v1604_v9  ;;  %v1342_v18 = vadd.f32 %v1310_v15, %v1277_v10  ;;  %v1857_v6 = vmul.f32 %v5687_v12, %v6514_v45  ;;  %v10695_v56 = vld [vmem:[#allocation58_spill] sm:$0xff]  ;;  %10699 = vst [vmem:[#allocation53_spill] sm:$0xff] %v7046_v25  ;;  %v10735_v25 = vld [vmem:[#allocation85_spill] sm:$0xff] }
 0x221   : > { %v1486_v43 = vsel %vm927_vm2, %v1483_v51, %v10692_v29  ;;  %v1727_v14 = vsel %vm1160_vm3, %v1724_v58, %v10694_v49  ;;  %2520 = vrot.lane.b32.xlu2 %v2433_v50, %s5460_s21  ;;  %v2027_v9 = vrot.slane %v6570_v27, 1  ;;  %v2159_v26 = vmul.f32 %v6769_v28, %v6522_v54  ;;  %v10697_v58 = vld [vmem:[#allocation56_spill] sm:$0xff] }
 0x222   : > { %v2120_v22 = vadd.f32 %v2026_v33, %v1887_v35  ;;  %v1909_v21 = vadd.f32 %v7005_v36, %v1845_v44  ;;  %v826_v51 = vmul.f32 %v5649_v47, %v6142_v60  ;;  %v10696_v19 = vrot.slane %v10695_v56, 1  ;;  %v10700_v56 = vld [vmem:[#allocation61_spill] sm:$0xff] }
 0x223   : > { %v10698_v61 = vrot.slane %v10697_v58, 1  ;;  %v1583_v44 = vadd.f32 %v1486_v43, %v1342_v18  ;;  %v1102_v27 = vmul.f32 %v5651_v48, %v6142_v60  ;;  %v2028_v10 = vsel %vm927_vm2, %v2025_v24, %v2027_v9 }
 0x224   : > { %v2353_v33 = vadd.f32 %v2259_v38, %v2120_v22  ;;  %v2142_v35 = vadd.f32 %v10350_v57, %v1909_v21  ;;  %v2260_v54 = vrot.slane %v2159_v26, 2  ;;  %v1325_v29 = vmul.f32 %v5668_v1, %v6302_v34 }
 0x225   : > { %v987_v50 = vsel %vm927_vm2, %v10698_v61, %v10696_v19  ;;  %v1824_v22 = vadd.f32 %v1727_v14, %v1583_v44  ;;  %v1218_v21 = vrot.slane %v1102_v27, 2  ;;  %v1402_v60 = vmul.f32 %v5671_v3, %v6302_v34 }
 0x226   : > { %v1059_v15 = vadd.f32 %v987_v50, %v826_v51  ;;  %v2386_v49 = vadd.f32 %v5811_v52, %v2353_v33  ;;  %v2375_v38 = vadd.f32 %v10349_v63, %v2142_v35  ;;  %v2261_v43 = vsel %vm1160_vm3, %v2258_v30, %v2260_v54  ;;  %v10720_v63 = vld [vmem:[#allocation91_spill] sm:$0xff] }
 0x227   : > { %v1403_v24 = vmul.f32 %v5671_v3, %v6382_v53  ;;  %v1643_v18 = vmul.f32 %v5673_v4, %v6302_v34  ;;  %v1888_v51 = vadd.f32 %v1857_v6, %v1824_v22  ;;  %v10701_v19 = vrot.slane %v10700_v56, 2 }
 0x228   : > { %v2418_v9 = vmax.f32 %v2386_v49, 0.0  ;;  %v2408_v26 = vadd.f32 %v5811_v52, %v2375_v38  ;;  %v1522_v61 = vrot.slane %v1402_v60, 1  ;;  %v1644_v50 = vmul.f32 %v5673_v4, %v6382_v53  ;;  %v10702_v38 = vld [vmem:[#allocation88_spill] sm:$0xff] }
 0x229   : > { %v1220_v14 = vsel %vm1160_vm3, %v1218_v21, %v10701_v19  ;;  %v1523_v30 = vrot.slane %v1403_v24, 1  ;;  %v7066_v33 = vsel %vm673_vm1, %v6940_v2, 0.0  ;;  %v2121_v44 = vadd.f32 %v2028_v10, %v1888_v51 }
 0x22a   : > { %v1292_v58 = vadd.f32 %v1220_v14, %v1059_v15  ;;  %2490 = vrot.lane.b32.xlu2 %v2418_v9, %s5460_s21  ;;  %v2440_v35 = vmax.f32 %v2408_v26, 0.0  ;;  %v1763_v27 = vrot.slane %v1643_v18, 2  ;;  %v1764_v49 = vrot.slane %v1644_v50, 2  ;;  %v10703_v14 = vld [vmem:[#allocation69_spill] sm:$0xff] }
 0x22b   : > { %v1524_v54 = vsel %vm927_vm2, %v1522_v61, %v1523_v30  ;;  %v1948_v15 = vmul.f32 %v5685_v11, %v10702_v38  ;;  %v2354_v22 = vadd.f32 %v2261_v43, %v2121_v44  ;;  %v1949_v21 = vmul.f32 %v5685_v11, %v6575_v7 }
 0x22c   : > { %v1357_v6 = vadd.f32 %v1325_v29, %v1292_v58  ;;  %2534 = vrot.lane.b32.xlu1 %v2440_v35, %s5460_s21  ;;  %v2181_v2 = vmul.f32 %v6769_v28, %v10702_v38  ;;  %v2182_v10 = vmul.f32 %v6769_v28, %v6575_v7  ;;  %v1765_v29 = vsel %vm1160_vm3, %v1763_v27, %v1764_v49  ;;  %v10704_v58 = vld [vmem:[#allocation70_spill] sm:$0xff]  ;;  %v7091_v35 = vpop.permute.xlu2 %2476 }
 0x22d   : > { %v1872_v24 = vmul.f32 %v5687_v12, %v10702_v38  ;;  %v2064_v18 = vrot.slane %v1948_v15, 1  ;;  %v2387_v9 = vadd.f32 %v5811_v52, %v2354_v22  ;;  %v2065_v26 = vrot.slane %v1949_v21, 1  ;;  %10705 = vst [vmem:[#allocation59_spill] sm:$0xff] %v7091_v35  ;;  %v10708_v22 = vld [vmem:[#allocation82_spill] sm:$0xff] }
 0x22e   : > { %v1598_v60 = vadd.f32 %v1524_v54, %v1357_v6  ;;  %v2297_v43 = vrot.slane %v2181_v2, 2  ;;  %v2298_v51 = vrot.slane %v2182_v10, 2  ;;  %v7085_v56 = vmul.f32 %v5641_v42, %v6993_v13  ;;  %v10706_v6 = vld [vmem:[#allocation81_spill] sm:$0xff] }
 0x22f   : > { %v1293_v61 = vadd.f32 %v10704_v58, %v10703_v14  ;;  %v1326_v50 = vmul.f32 %v5668_v1, %v6382_v53  ;;  %v2419_v44 = vmax.f32 %v2387_v9, 0.0  ;;  %v2066_v27 = vsel %vm927_vm2, %v2064_v18, %v2065_v26  ;;  %v10710_v14 = vld [vmem:[#allocation71_spill] sm:$0xff]  ;;  %v10712_v58 = vld [vmem:[#allocation72_spill] sm:$0xff] }
 0x230   : > { %v1839_v19 = vadd.f32 %v1765_v29, %v1598_v60  ;;  %v10707_v54 = vrot.slane %v10706_v6, 1  ;;  %v10709_v21 = vrot.slane %v10708_v22, 2  ;;  %v2067_v29 = vrot.slane %v6638_v40, 1 }
 0x231   : > { %v1358_v60 = vadd.f32 %v1326_v50, %v1293_v61  ;;  %v2183_v53 = vmul.f32 %v6769_v28, %v6578_v0  ;;  %v2299_v9 = vsel %vm1160_vm3, %v2297_v43, %v2298_v51  ;;  %v812_v18 = vmul.f32 %v5649_v47, %v6295_v55 }
 0x232   : > { %v1526_v15 = vsel %vm927_vm2, %v1523_v30, %v10707_v54  ;;  %v1767_v2 = vsel %vm1160_vm3, %v1764_v49, %v10709_v21  ;;  %v1903_v10 = vadd.f32 %v1872_v24, %v1839_v19  ;;  %2492 = vrot.lane.b32.xlu2 %v2419_v44, %s5460_s21  ;;  %v10711_v30 = vrot.slane %v10710_v14, 1 }
 0x233   : > { %v10713_v6 = vrot.slane %v10712_v58, 1  ;;  %v1081_v24 = vmul.f32 %v5651_v48, %v6295_v55  ;;  %v1599_v19 = vadd.f32 %v1526_v15, %v1358_v60  ;;  %v1873_v0 = vmul.f32 %v5687_v12, %v6575_v7 }
 0x234   : > { %v2136_v40 = vadd.f32 %v2066_v27, %v1903_v10  ;;  %v2300_v61 = vrot.slane %v2183_v53, 2  ;;  %v2068_v43 = vsel %vm927_vm2, %v2065_v26, %v2067_v29  ;;  %v1311_v54 = vmul.f32 %v5668_v1, %v6466_v23  ;;  %v10714_v27 = vld [vmem:[#allocation74_spill] sm:$0xff]  ;;  %3143 = vrot.lane.b32.xlu1 %v5649_v47, %s5461_s1 }
 0x235   : > { %v952_v49 = vsel %vm927_vm2, %v10713_v6, %v10711_v30  ;;  %v1183_v44 = vrot.slane %v1081_v24, 2  ;;  %v1840_v21 = vadd.f32 %v1767_v2, %v1599_v19  ;;  %v1381_v55 = vmul.f32 %v5671_v3, %v6466_v23 }
 0x236   : > { %v1045_v50 = vadd.f32 %v952_v49, %v812_v18  ;;  %v2369_v22 = vadd.f32 %v2299_v9, %v2136_v40  ;;  %v2301_v14 = vsel %vm1160_vm3, %v2298_v51, %v2300_v61  ;;  %v10715_v15 = vrot.slane %v10714_v27, 2  ;;  %v7132_v18 = vpop.permute.xlu2 %2482  ;;  %v10717_v49 = vld [vmem:[#allocation100_spill] sm:$0xff] }
 0x237   : > { %v1382_v60 = vmul.f32 %v5671_v3, %v6514_v45  ;;  %v1622_v26 = vmul.f32 %v5673_v4, %v6466_v23  ;;  %v1623_v29 = vmul.f32 %v5673_v4, %v6514_v45  ;;  %v1904_v53 = vadd.f32 %v1873_v0, %v1840_v21  ;;  %10716 = vst [vmem:[#allocation63_spill] sm:$0xff] %v7132_v18 }
 0x238   : > { %v1185_v10 = vsel %vm1160_vm3, %v1183_v44, %v10715_v15  ;;  %v2402_v2 = vadd.f32 %v5811_v52, %v2369_v22  ;;  %v1487_v9 = vrot.slane %v1381_v55, 1  ;;  %v1858_v24 = vmul.f32 %v5687_v12, %v10717_v49 }
 0x239   : > { %v1278_v51 = vadd.f32 %v1185_v10, %v1045_v50  ;;  %v1488_v30 = vrot.slane %v1382_v60, 1  ;;  %v1728_v58 = vrot.slane %v1622_v26, 2  ;;  %v1729_v6 = vrot.slane %v1623_v29, 2  ;;  %v10722_v10 = vld [vmem:[#allocation108_spill] sm:$0xff] }
 0x23a   : > { %v2434_v40 = vmax.f32 %v2402_v2, 0.0  ;;  %v2137_v19 = vadd.f32 %v2068_v43, %v1904_v53  ;;  %v1927_v44 = vmul.f32 %v5685_v11, %v10717_v49  ;;  %v1928_v50 = vmul.f32 %v5685_v11, %v6703_v20 }
 0x23b   : > { %v1343_v61 = vadd.f32 %v1311_v54, %v1278_v51  ;;  %v1489_v27 = vsel %vm927_vm2, %v1487_v9, %v1488_v30  ;;  %v1730_v0 = vsel %vm1160_vm3, %v1728_v58, %v1729_v6  ;;  %v2160_v22 = vmul.f32 %v6769_v28, %v10717_v49 }
 0x23c   : > { %2522 = vrot.lane.b32.xlu2 %v2434_v40, %s5460_s21  ;;  %v2370_v21 = vadd.f32 %v2301_v14, %v2137_v19  ;;  %v2029_v15 = vrot.slane %v1927_v44, 1  ;;  %v2161_v43 = vmul.f32 %v6769_v28, %v6703_v20  ;;  %v7149_v54 = vmul.f32 %v5685_v11, %v6804_v5  ;;  %3413 = vrot.lane.b32.xlu1 %v5651_v48, %s5461_s1 }
 0x23d   : > { %v1584_v55 = vadd.f32 %v1489_v27, %v1343_v61  ;;  %v2030_v60 = vrot.slane %v1928_v50, 1  ;;  %v2262_v26 = vrot.slane %v2160_v22, 2  ;;  %v7154_v29 = vmul.f32 %v5649_v47, %v6993_v13  ;;  %v561_v27 = vpop.f32.mrf.mxu0 }
 0x23e   : > { %v2403_v2 = vadd.f32 %v5811_v52, %v2370_v21  ;;  %v2263_v53 = vrot.slane %v2161_v43, 2  ;;  %v7159_v51 = vmul.f32 %v5641_v42, %v7066_v33  ;;  %v7163_v9 = vmul.f32 %v5651_v48, %v6993_v13  ;;  %v10718_v21 = vld [vmem:[#allocation80_spill] sm:$0xff] }
 0x23f   : > { %v1825_v14 = vadd.f32 %v1730_v0, %v1584_v55  ;;  %v7167_v58 = vmul.f32 %v5651_v48, %v7066_v33  ;;  %v2031_v40 = vsel %vm927_vm2, %v2029_v15, %v2030_v60  ;;  %v7173_v61 = vmul.f32 %v5671_v3, %v7066_v33  ;;  %v10719_v55 = vld [vmem:[#allocation83_spill] sm:$0xff] }
 0x240   : > { %v7177_v44 = vmul.f32 %v5673_v4, %v7066_v33  ;;  %v2435_v50 = vmax.f32 %v2403_v2, 0.0  ;;  %v2264_v22 = vsel %vm1160_vm3, %v2262_v26, %v2263_v53  ;;  %v1279_v43 = vadd.f32 %v10719_v55, %v10718_v21  ;;  %v7194_v2 = vpop.permute.xlu2 %2484  ;;  %v10729_v55 = vld [vmem:[#allocation73_spill] sm:$0xff] }
 0x241   : > { %v1889_v0 = vadd.f32 %v1858_v24, %v1825_v14  ;;  %v1312_v15 = vmul.f32 %v5668_v1, %v6514_v45  ;;  %v10721_v57 = vrot.slane %v10720_v63, 1  ;;  %v2032_v19 = vrot.slane %v10722_v10, 1  ;;  %10724 = vst [vmem:[#allocation67_spill] sm:$0xff] %v7194_v2  ;;  %v10733_v24 = vld [vmem:[#allocation109_spill] sm:$0xff]  ;;  %v10734_v2 = vld [vmem:[#allocation51_spill] sm:$0xff] }
 0x242   : > { %v2162_v18 = vmul.f32 %v6769_v28, %v10723_v17  ;;  %v7192_v26 = vadd.f32 %v561_v27, %v5639_v41  ;;  %v828_v45 = vmul.f32 %v5649_v47, %v6302_v34  ;;  %v1859_v17 = vmul.f32 %v5687_v12, %v6703_v20  ;;  %v10727_v27 = vld [vmem:[#allocation77_spill] sm:$0xff] }
 0x243   : > { %v2122_v16 = vadd.f32 %v2031_v40, %v1889_v0  ;;  %v1491_v39 = vsel %vm927_vm2, %v1488_v30, %v10721_v57  ;;  %v1344_v14 = vadd.f32 %v1312_v15, %v1279_v43  ;;  %v10725_v57 = vld [vmem:[#allocation93_spill] sm:$0xff]  ;;  %v2033_v41 = vsel %vm927_vm2, %v2030_v60, %v2032_v19 }
 0x244   : > { %2524 = vrot.lane.b32.xlu2 %v2435_v50, %s5460_s21  ;;  %v10726_v30 = vrot.slane %v10725_v57, 2  ;;  %v2265_v40 = vrot.slane %v2162_v18, 2  ;;  %v10728_v21 = vrot.slane %v10727_v27, 1  ;;  %v10730_v43 = vrot.slane %v10729_v55, 1  ;;  %v10731_v27 = vld [vmem:[#allocation78_spill] sm:$0xff]  ;;  %3960 = vrot.lane.b32.xlu1 %v5673_v4, %s5461_s1 }
 0x245   : > { %v2355_v63 = vadd.f32 %v2264_v22, %v2122_v16  ;;  %v1585_v0 = vadd.f32 %v1491_v39, %v1344_v14  ;;  %v1105_v16 = vmul.f32 %v5651_v48, %v6302_v34  ;;  %v1405_v39 = vmul.f32 %v5671_v3, %v10702_v38 }
 0x246   : > { %v1732_v10 = vsel %vm1160_vm3, %v1729_v6, %v10726_v30  ;;  %v992_v15 = vsel %vm927_vm2, %v10730_v43, %v10728_v21  ;;  %v1327_v6 = vmul.f32 %v5668_v1, %v10702_v38  ;;  %v1406_v19 = vmul.f32 %v5671_v3, %v6575_v7 }
 0x247   : > { %v2388_v50 = vadd.f32 %v5811_v52, %v2355_v63  ;;  %v1061_v22 = vadd.f32 %v992_v15, %v828_v45  ;;  %v1826_v18 = vadd.f32 %v1732_v10, %v1585_v0  ;;  %v1223_v60 = vrot.slane %v1105_v16, 2 }
 0x248   : > { %v1646_v14 = vmul.f32 %v5673_v4, %v10702_v38  ;;  %v2266_v34 = vsel %vm1160_vm3, %v2263_v53, %v2265_v40  ;;  %v1527_v30 = vrot.slane %v1405_v39, 1  ;;  %v1647_v45 = vmul.f32 %v5673_v4, %v6575_v7 }
 0x249   : > { %v2420_v57 = vmax.f32 %v2388_v50, 0.0  ;;  %v1890_v63 = vadd.f32 %v1859_v17, %v1826_v18  ;;  %v10732_v21 = vrot.slane %v10731_v27, 2  ;;  %v1528_v10 = vrot.slane %v1406_v19, 1 }
 0x24a   : > { %v1768_v0 = vrot.slane %v1646_v14, 2  ;;  %v1769_v15 = vrot.slane %v1647_v45, 2  ;;  %v1951_v16 = vmul.f32 %v5685_v11, %v6719_v31  ;;  %v1952_v50 = vmul.f32 %v5685_v11, %v10733_v24  ;;  %v7241_v45 = vpop.permute.xlu2 %2514 }
 0x24b   : > { %v1225_v55 = vsel %vm1160_vm3, %v1223_v60, %v10732_v21  ;;  %v2123_v53 = vadd.f32 %v2033_v41, %v1890_v63  ;;  %v1529_v40 = vsel %vm927_vm2, %v1527_v30, %v1528_v10  ;;  %v2184_v17 = vmul.f32 %v6769_v28, %v6719_v31 }
 0x24c   : > { %v1294_v43 = vadd.f32 %v1225_v55, %v1061_v22  ;;  %v2185_v39 = vmul.f32 %v6769_v28, %v10733_v24  ;;  %v7238_v18 = vmul.f32 %v5685_v11, %v7066_v33  ;;  %2494 = vrot.lane.b32.xlu2 %v2420_v57, %s5460_s21  ;;  %v2069_v60 = vrot.slane %v1951_v16, 1 }
 0x24d   : > { %v2070_v19 = vrot.slane %v1952_v50, 1  ;;  %v2356_v14 = vadd.f32 %v2266_v34, %v2123_v53  ;;  %v1770_v41 = vsel %vm1160_vm3, %v1768_v0, %v1769_v15  ;;  %v2302_v30 = vrot.slane %v2184_v17, 2  ;;  %v10736_v50 = vld [vmem:[#allocation31_spill] sm:$0xff] }
 0x24e   : > { %v1359_v22 = vadd.f32 %v1327_v6, %v1294_v43  ;;  %v2303_v63 = vrot.slane %v2185_v39, 2  ;;  %v1874_v55 = vmul.f32 %v5687_v12, %v6719_v31  ;;  %v1295_v35 = vadd.f32 %v10735_v25, %v10734_v2  ;;  %v10738_v39 = vld [vmem:[#allocation99_spill] sm:$0xff] }
 0x24f   : > { %v10353_v57 = vmax.f32 %v7192_v26, 0.0  ;;  %v2389_v34 = vadd.f32 %v5811_v52, %v2356_v14  ;;  %v1328_v0 = vmul.f32 %v5668_v1, %v6575_v7  ;;  %v2071_v16 = vsel %vm927_vm2, %v2069_v60, %v2070_v19 }
 0x250   : > { %v1600_v21 = vadd.f32 %v1529_v40, %v1359_v22  ;;  %v10737_v53 = vrot.slane %v10736_v50, 1  ;;  %v2072_v17 = vrot.slane %v7149_v54, 1  ;;  %v2304_v25 = vsel %vm1160_vm3, %v2302_v30, %v2303_v63 }
 0x251   : > { %v1360_v2 = vadd.f32 %v1328_v0, %v1295_v35  ;;  %v10739_v22 = vrot.slane %v10738_v39, 2  ;;  %v2186_v14 = vmul.f32 %v6769_v28, %v6804_v5  ;;  %v2421_v7 = vmax.f32 %v2389_v34, 0.0 }
 0x252   : > { %v1841_v43 = vadd.f32 %v1770_v41, %v1600_v21  ;;  %v1531_v40 = vsel %vm927_vm2, %v1528_v10, %v10737_v53  ;;  %v814_v60 = vmul.f32 %v5649_v47, %v6466_v23  ;;  %v10740_v21 = vld [vmem:[#allocation49_spill] sm:$0xff]  ;;  %v10742_v10 = vld [vmem:[#allocation87_spill] sm:$0xff]  ;;  %v1875_v35 = vmul.f32 %v5687_v12, %v10733_v24 }
 0x253   : > { %v1772_v6 = vsel %vm1160_vm3, %v1769_v15, %v10739_v22  ;;  %v10741_v50 = vrot.slane %v10740_v21, 1  ;;  %v10743_v53 = vrot.slane %v10742_v10, 1  ;;  %v1601_v30 = vadd.f32 %v1531_v40, %v1360_v2 }
 0x254   : > { %v1905_v41 = vadd.f32 %v1874_v55, %v1841_v43  ;;  %v2073_v15 = vsel %vm927_vm2, %v2070_v19, %v2072_v17  ;;  %v1084_v0 = vmul.f32 %v5651_v48, %v6466_v23  ;;  %2496 = vrot.lane.b32.xlu2 %v2421_v7, %s5460_s21  ;;  %v2305_v34 = vrot.slane %v2186_v14, 2  ;;  %v7289_v7 = vpop.permute.xlu2 %2516 }
 0x255   : > { %v957_v54 = vsel %vm927_vm2, %v10743_v53, %v10741_v50  ;;  %v1384_v39 = vmul.f32 %v5671_v3, %v10717_v49  ;;  %v1842_v22 = vadd.f32 %v1772_v6, %v1601_v30  ;;  %v1313_v40 = vmul.f32 %v5668_v1, %v10717_v49 }
 0x256   : > { %v2138_v55 = vadd.f32 %v2071_v16, %v1905_v41  ;;  %v1047_v43 = vadd.f32 %v957_v54, %v814_v60  ;;  %v1188_v21 = vrot.slane %v1084_v0, 2  ;;  %v1385_v2 = vmul.f32 %v5671_v3, %v6703_v20  ;;  %v10744_v41 = vld [vmem:[#allocation90_spill] sm:$0xff] }
 0x257   : > { %v1492_v17 = vrot.slane %v1384_v39, 1  ;;  %v1625_v23 = vmul.f32 %v5673_v4, %v10717_v49  ;;  %v1626_v16 = vmul.f32 %v5673_v4, %v6703_v20  ;;  %v1906_v6 = vadd.f32 %v1875_v35, %v1842_v22 }
 0x258   : > { %v2371_v19 = vadd.f32 %v2304_v25, %v2138_v55  ;;  %v10745_v60 = vrot.slane %v10744_v41, 2  ;;  %v1493_v10 = vrot.slane %v1385_v2, 1  ;;  %v2306_v25 = vsel %vm1160_vm3, %v2303_v63, %v2305_v34 }
 0x259   : > { %v1733_v30 = vrot.slane %v1625_v23, 2  ;;  %v698_v0 = vrot.slane %v10353_v57, 7  ;;  %v2139_v55 = vadd.f32 %v2073_v15, %v1906_v6  ;;  %v1734_v27 = vrot.slane %v1626_v16, 2  ;;  %v10747_v23 = vld [vmem:[#allocation98_spill] sm:$0xff] }
 0x25a   : > { %v1190_v50 = vsel %vm1160_vm3, %v1188_v21, %v10745_v60  ;;  %v2404_v53 = vadd.f32 %v5811_v52, %v2371_v19  ;;  %v1494_v39 = vsel %vm927_vm2, %v1492_v17, %v1493_v10  ;;  %v1860_v22 = vmul.f32 %v5687_v12, %v6918_v59  ;;  %v10746_v17 = vld [vmem:[#allocation40_spill] sm:$0xff]  ;;  %v10797_v57 = vld [vmem:[#allocation94_spill] sm:$0xff] }
 0x25b   : > { %v1280_v54 = vadd.f32 %v1190_v50, %v1047_v43  ;;  %v1930_v21 = vmul.f32 %v5685_v11, %v6918_v59  ;;  %v2372_v2 = vadd.f32 %v2306_v25, %v2139_v55  ;;  %v1735_v63 = vsel %vm1160_vm3, %v1733_v30, %v1734_v27 }
 0x25c   : > { %v2436_v14 = vmax.f32 %v2404_v53, 0.0  ;;  %v1931_v34 = vmul.f32 %v5685_v11, %v6993_v13  ;;  %v2163_v15 = vmul.f32 %v6769_v28, %v6918_v59  ;;  %v1281_v16 = vadd.f32 %v10747_v23, %v10746_v17 }
 0x25d   : > { %v1345_v35 = vadd.f32 %v1313_v40, %v1280_v54  ;;  %v2034_v19 = vrot.slane %v1930_v21, 1  ;;  %v2164_v40 = vmul.f32 %v6769_v28, %v6993_v13  ;;  %v1741_v6 = vrot.slane %v7177_v44, 2 }
 0x25e   : > { %2526 = vrot.lane.b32.xlu2 %v2436_v14, %s5460_s21  ;;  %v2035_v41 = vrot.slane %v1931_v34, 1  ;;  %v2267_v60 = vrot.slane %v2163_v15, 2  ;;  %v1314_v50 = vmul.f32 %v5668_v1, %v6703_v20  ;;  %v2405_v53 = vadd.f32 %v5811_v52, %v2372_v2  ;;  %v10748_v14 = vld [vmem:[#allocation36_spill] sm:$0xff]  ;;  %v10751_v20 = vld [vmem:[#allocation107_spill] sm:$0xff] }
 0x25f   : > { %v1586_v43 = vadd.f32 %v1494_v39, %v1345_v35  ;;  %v2268_v54 = vrot.slane %v2164_v40, 2  ;;  %v10749_v30 = vrot.slane %v10748_v14, 1  ;;  %v10750_v39 = vld [vmem:[#allocation15_spill] sm:$0xff]  ;;  %v7325_v21 = vsel %vm673_vm1, 0.0, %v698_v0 }
 0x260   : > { %v7322_v35 = vsel %vm673_vm1, %v698_v0, %v10750_v39  ;;  %v2036_v34 = vsel %vm927_vm2, %v2034_v19, %v2035_v41  ;;  %v1346_v15 = vadd.f32 %v1314_v50, %v1281_v16  ;;  %v10752_v23 = vrot.slane %v10751_v20, 2  ;;  %v10753_v50 = vld [vmem:[#allocation105_spill] sm:$0xff] }
 0x261   : > { %v1827_v25 = vadd.f32 %v1735_v63, %v1586_v43  ;;  %v1496_v55 = vsel %vm927_vm2, %v1493_v10, %v10749_v30  ;;  %v1861_v63 = vmul.f32 %v5687_v12, %v6993_v13  ;;  %v2037_v10 = vrot.slane %v7238_v18, 1  ;;  %v7334_v43 = vpop.permute.xlu2 %2486  ;;  %v10755_v30 = vld [vmem:[#allocation101_spill] sm:$0xff] }
 0x262   : > { %v1737_v2 = vsel %vm1160_vm3, %v1734_v27, %v10752_v23  ;;  %v2269_v40 = vsel %vm1160_vm3, %v2267_v60, %v2268_v54  ;;  %v1587_v14 = vadd.f32 %v1496_v55, %v1346_v15  ;;  %v2165_v0 = vmul.f32 %v6769_v28, %v7066_v33 }
 0x263   : > { %v1891_v17 = vadd.f32 %v1860_v22, %v1827_v25  ;;  %v816_v22 = vmul.f32 %v5649_v47, %v10717_v49  ;;  %v2437_v19 = vmax.f32 %v2405_v53, 0.0  ;;  %v2038_v27 = vsel %vm927_vm2, %v2035_v41, %v2037_v10 }
 0x264   : > { %v10754_v25 = vrot.slane %v10753_v50, 1  ;;  %v10756_v39 = vrot.slane %v10755_v30, 1  ;;  %v1828_v20 = vadd.f32 %v1737_v2, %v1587_v14  ;;  %v2270_v23 = vrot.slane %v2165_v0, 2  ;;  %v10759_v50 = vld [vmem:[#allocation35_spill] sm:$0xff] }
 0x265   : > { %v2124_v16 = vadd.f32 %v2036_v34, %v1891_v17  ;;  %v1087_v55 = vmul.f32 %v5651_v48, %v10717_v49  ;;  %v1315_v53 = vmul.f32 %v5668_v1, %v6918_v59  ;;  %v1387_v41 = vmul.f32 %v5671_v3, %v6918_v59 }
 0x266   : > { %v962_v18 = vsel %vm927_vm2, %v10756_v39, %v10754_v25  ;;  %2528 = vrot.lane.b32.xlu2 %v2437_v19, %s5460_s21  ;;  %v1388_v34 = vmul.f32 %v5671_v3, %v6993_v13  ;;  %v1892_v15 = vadd.f32 %v1861_v63, %v1828_v20  ;;  %v2271_v17 = vsel %vm1160_vm3, %v2268_v54, %v2270_v23 }
 0x267   : > { %v1049_v60 = vadd.f32 %v962_v18, %v816_v22  ;;  %v2357_v33 = vadd.f32 %v2269_v40, %v2124_v16  ;;  %v1193_v2 = vrot.slane %v1087_v55, 2  ;;  %v1628_v10 = vmul.f32 %v5673_v4, %v6918_v59 }
 0x268   : > { %v1497_v14 = vrot.slane %v1387_v41, 1  ;;  %v1498_v40 = vrot.slane %v1388_v34, 1  ;;  %v1629_v0 = vmul.f32 %v5673_v4, %v6993_v13  ;;  %v10757_v22 = vrot.slane %v7159_v51, 1 }
 0x269   : > { %v2390_v49 = vadd.f32 %v5811_v52, %v2357_v33  ;;  %v10758_v19 = vrot.slane %v7085_v56, 1  ;;  %v2125_v63 = vadd.f32 %v2038_v27, %v1892_v15  ;;  %v10760_v54 = vrot.slane %v10759_v50, 2 }
 0x26a   : > { %v1738_v30 = vrot.slane %v1628_v10, 2  ;;  %v1499_v20 = vsel %vm927_vm2, %v1497_v14, %v1498_v40  ;;  %v1739_v23 = vrot.slane %v1629_v0, 2  ;;  %v1933_v33 = vmul.f32 %v5685_v11, %v7325_v21 }
 0x26b   : > { %v969_v16 = vsel %vm927_vm2, %v10758_v19, %v10757_v22  ;;  %v1195_v25 = vsel %vm1160_vm3, %v1193_v2, %v10760_v54  ;;  %v2422_v39 = vmax.f32 %v2390_v49, 0.0  ;;  %v2358_v55 = vadd.f32 %v2271_v17, %v2125_v63  ;;  %v10762_v2 = vld [vmem:[#allocation113_spill] sm:$0xff]  ;;  %v7382_v49 = vpop.permute.xlu2 %2488 }
 0x26c   : > { %v1282_v18 = vadd.f32 %v1195_v25, %v1049_v60  ;;  %v1934_v51 = vmul.f32 %v5685_v11, %v7322_v35  ;;  %v2166_v27 = vmul.f32 %v6769_v28, %v7325_v21  ;;  %v1740_v34 = vsel %vm1160_vm3, %v1738_v30, %v1739_v23  ;;  %v10761_v60 = vld [vmem:[#allocation115_spill] sm:$0xff] }
 0x26d   : > { %v2167_v15 = vmul.f32 %v6769_v28, %v7322_v35  ;;  %v1283_v10 = vadd.f32 %v10762_v2, %v10761_v60  ;;  %v2391_v17 = vadd.f32 %v5811_v52, %v2358_v55  ;;  %v2039_v14 = vrot.slane %v1933_v33, 1 }
 0x26e   : > { %v1347_v41 = vadd.f32 %v1315_v53, %v1282_v18  ;;  %v2040_v0 = vrot.slane %v1934_v51, 1  ;;  %v2272_v22 = vrot.slane %v2166_v27, 2  ;;  %2498 = vrot.lane.b32.xlu2 %v2422_v39, %s5460_s21  ;;  %v1862_v53 = vmul.f32 %v5687_v12, %v7325_v21 }
 0x26f   : > { %v2273_v63 = vrot.slane %v2167_v15, 2  ;;  %v1316_v50 = vmul.f32 %v5668_v1, %v6993_v13  ;;  %v1052_v54 = vadd.f32 %v969_v16, %v7154_v29  ;;  %v2423_v25 = vmax.f32 %v2391_v17, 0.0 }
 0x270   : > { %v1588_v19 = vadd.f32 %v1499_v20, %v1347_v41  ;;  %v2041_v30 = vsel %vm927_vm2, %v2039_v14, %v2040_v0  ;;  %v10763_v18 = vrot.slane %v7173_v61, 1  ;;  %v1742_v39 = vsel %vm1160_vm3, %v1739_v23, %v1741_v6  ;;  %v10766_v6 = vld [vmem:[#allocation25_spill] sm:$0xff] }
 0x271   : > { %v1348_v51 = vadd.f32 %v1316_v50, %v1283_v10  ;;  %v1863_v20 = vmul.f32 %v5687_v12, %v7322_v35  ;;  %v2274_v13 = vsel %vm1160_vm3, %v2272_v22, %v2273_v63  ;;  %v818_v29 = vmul.f32 %v5649_v47, %v6918_v59 }
 0x272   : > { %v1501_v55 = vsel %vm927_vm2, %v1498_v40, %v10763_v18  ;;  %v1829_v33 = vadd.f32 %v1740_v34, %v1588_v19  ;;  %v10764_v16 = vrot.slane %v7085_v56, 1  ;;  %v10765_v61 = vrot.slane %v6988_v32, 1  ;;  %v10767_v34 = vld [vmem:[#allocation19_spill] sm:$0xff] }
 0x273   : > { %v1090_v27 = vmul.f32 %v5651_v48, %v6918_v59  ;;  %v1589_v41 = vadd.f32 %v1501_v55, %v1348_v51  ;;  %v2042_v23 = vrot.slane %v10766_v6, 1  ;;  %v2168_v15 = vmul.f32 %v6769_v28, %v10767_v34  ;;  %v7428_v51 = vpop.permute.xlu2 %2518  ;;  %v10772_v34 = vld [vmem:[#allocation28_spill] sm:$0xff] }
 0x274   : > { %v967_v40 = vsel %vm927_vm2, %v10765_v61, %v10764_v16  ;;  %v1893_v44 = vadd.f32 %v1862_v53, %v1829_v33  ;;  %v1317_v10 = vmul.f32 %v5668_v1, %v7325_v21  ;;  %v1390_v32 = vmul.f32 %v5671_v3, %v7325_v21 }
 0x275   : > { %v1051_v60 = vadd.f32 %v967_v40, %v818_v29  ;;  %v1198_v2 = vrot.slane %v1090_v27, 2  ;;  %v1830_v17 = vadd.f32 %v1742_v39, %v1589_v41  ;;  %v1391_v59 = vmul.f32 %v5671_v3, %v7322_v35 }
 0x276   : > { %v2126_v56 = vadd.f32 %v2041_v30, %v1893_v44  ;;  %v1631_v14 = vmul.f32 %v5673_v4, %v7325_v21  ;;  %v2043_v22 = vsel %vm927_vm2, %v2040_v0, %v2042_v23  ;;  %v10768_v28 = vrot.slane %v7163_v9, 2  ;;  %2500 = vrot.lane.b32.xlu2 %v2423_v25, %s5460_s21  ;;  %v10769_v0 = vld [vmem:[#allocation26_spill] sm:$0xff] }
 0x277   : > { %v1502_v53 = vrot.slane %v1390_v32, 1  ;;  %v1632_v50 = vmul.f32 %v5673_v4, %v7322_v35  ;;  %v1894_v18 = vadd.f32 %v1863_v20, %v1830_v17  ;;  %v1503_v33 = vrot.slane %v1391_v59, 1 }
 0x278   : > { %v1200_v19 = vsel %vm1160_vm3, %v1198_v2, %v10768_v28  ;;  %v2359_v30 = vadd.f32 %v2274_v13, %v2126_v56  ;;  %v2275_v39 = vrot.slane %v2168_v15, 2  ;;  %v1743_v29 = vrot.slane %v1631_v14, 2  ;;  %v7445_v56 = vld [vmem:[#allocation5 + $0x8] ss:$0 sm:$0xff] }
 0x279   : > { %v1284_v55 = vadd.f32 %v1200_v19, %v1051_v60  ;;  %v1744_v16 = vrot.slane %v1632_v50, 2  ;;  %v1936_v61 = vmul.f32 %v5685_v11, %v10769_v0  ;;  %v10770_v40 = vrot.slane %v7167_v58, 2  ;;  %4507 = vrot.lane.b32.xlu1 %v7445_v56, %s5461_s1 }
 0x27a   : > { %v10771_v27 = vmov %v10768_v28  ;;  %v2392_v25 = vadd.f32 %v5811_v52, %v2359_v30  ;;  %v2127_v13 = vadd.f32 %v2043_v22, %v1894_v18  ;;  %v860_v41 = vmul.f32 %v5641_v42, %v7325_v21  ;;  %v10773_v30 = vld [vmem:[#allocation23_spill] sm:$0xff] }
 0x27b   : > { %v1202_v44 = vsel %vm1160_vm3, %v10771_v27, %v10770_v40  ;;  %v1349_v20 = vadd.f32 %v1317_v10, %v1284_v55  ;;  %v2276_v6 = vsel %vm1160_vm3, %v2273_v63, %v2275_v39  ;;  %v1504_v23 = vsel %vm927_vm2, %v1502_v53, %v1503_v33  ;;  %v10775_v39 = vld [vmem:[#allocation45_spill] sm:$0xff] }
 0x27c   : > { %v1937_v15 = vmul.f32 %v5685_v11, %v10772_v34  ;;  %v2360_v60 = vadd.f32 %v2276_v6, %v2127_v13  ;;  %v1745_v9 = vsel %vm1160_vm3, %v1743_v29, %v1744_v16  ;;  %v2044_v2 = vrot.slane %v1936_v61, 1  ;;  %v10777_v61 = vld [vmem:[#allocation110_spill] sm:$0xff] }
 0x27d   : > { %v1590_v58 = vadd.f32 %v1504_v23, %v1349_v20  ;;  %v2169_v10 = vmul.f32 %v7445_v56, %v10769_v0  ;;  %v2170_v17 = vmul.f32 %v7445_v56, %v10772_v34  ;;  %v1285_v63 = vadd.f32 %v1202_v44, %v1052_v54  ;;  %v7469_v20 = vpop.permute.xlu2 %2520 }
 0x27e   : > { %v2045_v32 = vrot.slane %v1937_v15, 1  ;;  %v2424_v59 = vmax.f32 %v2392_v25, 0.0  ;;  %v1864_v22 = vmul.f32 %v5687_v12, %v10769_v0  ;;  %v1318_v28 = vmul.f32 %v5668_v1, %v7322_v35 }
 0x27f   : > { %v1831_v14 = vadd.f32 %v1745_v9, %v1590_v58  ;;  %v2393_v19 = vadd.f32 %v5811_v52, %v2360_v60  ;;  %v2277_v53 = vrot.slane %v2169_v10, 2  ;;  %v2278_v50 = vrot.slane %v2170_v17, 2  ;;  %v10781_v60 = vld [vmem:[#allocation46_spill] sm:$0xff] }
 0x280   : > { %v10774_v18 = vrot.slane %v10773_v30, 1  ;;  %v10776_v29 = vrot.slane %v10775_v39, 1  ;;  %v10778_v54 = vrot.slane %v10777_v61, 1  ;;  %v7466_v27 = vmul.f32 %v5673_v4, %v6804_v5  ;;  %2502 = vrot.lane.b32.xlu2 %v2424_v59, %s5460_s21  ;;  %v10782_v17 = vld [vmem:[#allocation30_spill] sm:$0xff] }
 0x281   : > { %v1895_v44 = vadd.f32 %v1864_v22, %v1831_v14  ;;  %v1350_v25 = vadd.f32 %v1318_v28, %v1285_v63  ;;  %v970_v13 = vrot.slane %v860_v41, 1  ;;  %v2046_v6 = vsel %vm927_vm2, %v2044_v2, %v2045_v32 }
 0x282   : > { %v1506_v55 = vsel %vm927_vm2, %v1503_v33, %v10774_v18  ;;  %v1004_v40 = vsel %vm927_vm2, %v10778_v54, %v10776_v29  ;;  %v10779_v33 = vld [vmem:[#allocation24_spill] sm:$0xff]  ;;  %v2047_v58 = vrot.slane %v10781_v60, 1  ;;  %v2171_v5 = vmul.f32 %v7445_v56, %v10782_v17  ;;  %v10783_v17 = vld [vmem:[#allocation41_spill] sm:$0xff] }
 0x283   : > { %v10780_v23 = vrot.slane %v10779_v33, 2  ;;  %v2128_v9 = vadd.f32 %v2046_v6, %v1895_v44  ;;  %v1591_v10 = vadd.f32 %v1506_v55, %v1350_v25  ;;  %v861_v59 = vmul.f32 %v5641_v42, %v7322_v35 }
 0x284   : > { %v2425_v63 = vmax.f32 %v2393_v19, 0.0  ;;  %v2279_v41 = vsel %vm1160_vm3, %v2277_v53, %v2278_v50  ;;  %v1865_v2 = vmul.f32 %v5687_v12, %v10772_v34  ;;  %v1093_v14 = vmul.f32 %v5651_v48, %v7325_v21 }
 0x285   : > { %v1747_v15 = vsel %vm1160_vm3, %v1744_v16, %v10780_v23  ;;  %v2361_v16 = vadd.f32 %v2279_v41, %v2128_v9  ;;  %v971_v28 = vrot.slane %v861_v59, 1  ;;  %v1094_v30 = vmul.f32 %v5651_v48, %v7322_v35  ;;  %v10784_v41 = vld [vmem:[#allocation39_spill] sm:$0xff] }
 0x286   : > { %v1832_v22 = vadd.f32 %v1747_v15, %v1591_v10  ;;  %v2048_v18 = vsel %vm927_vm2, %v2045_v32, %v2047_v58  ;;  %v820_v55 = vmul.f32 %v5649_v47, %v7325_v21  ;;  %v1203_v19 = vrot.slane %v1093_v14, 2  ;;  %v10785_v14 = vld [vmem:[#allocation119_spill] sm:$0xff] }
 0x287   : > { %v1393_v53 = vmul.f32 %v5671_v3, %v10769_v0  ;;  %v2280_v29 = vrot.slane %v2171_v5, 2  ;;  %v972_v61 = vsel %vm927_vm2, %v970_v13, %v971_v28  ;;  %v1204_v54 = vrot.slane %v1094_v30, 2  ;;  %v7502_v13 = vpop.permute.xlu2 %2490 }
 0x288   : > { %v1896_v39 = vadd.f32 %v1865_v2, %v1832_v22  ;;  %v2394_v44 = vadd.f32 %v5811_v52, %v2361_v16  ;;  %v1053_v25 = vadd.f32 %v972_v61, %v820_v55  ;;  %v1394_v6 = vmul.f32 %v5671_v3, %v10772_v34  ;;  %2504 = vrot.lane.b32.xlu2 %v2425_v63, %s5460_s21 }
 0x289   : > { %v1634_v32 = vmul.f32 %v5673_v4, %v10769_v0  ;;  %v1205_v33 = vsel %vm1160_vm3, %v1203_v19, %v1204_v54  ;;  %v1507_v23 = vrot.slane %v1393_v53, 1  ;;  %v1635_v15 = vmul.f32 %v5673_v4, %v10772_v34  ;;  %v10787_v19 = vld [vmem:[#allocation116_spill] sm:$0xff]  ;;  %v10803_v53 = vld [vmem:[#allocation38_spill] sm:$0xff] }
 0x28a   : > { %v2129_v21 = vadd.f32 %v2048_v18, %v1896_v39  ;;  %v1286_v60 = vadd.f32 %v1205_v33, %v1053_v25  ;;  %v1319_v58 = vmul.f32 %v5668_v1, %v10769_v0  ;;  %v1508_v9 = vrot.slane %v1394_v6, 1  ;;  %v10786_v18 = vld [vmem:[#allocation42_spill] sm:$0xff]  ;;  %v10788_v33 = vld [vmem:[#allocation21_spill] sm:$0xff] }
 0x28b   : > { %v1748_v10 = vrot.slane %v1634_v32, 2  ;;  %v1236_v5 = vrot.slane %v10783_v17, 2  ;;  %v2281_v59 = vsel %vm1160_vm3, %v2278_v50, %v2280_v29  ;;  %v1749_v63 = vrot.slane %v1635_v15, 2 }
 0x28c   : > { %v1939_v2 = vmul.f32 %v5685_v11, %v10784_v41  ;;  %v2362_v22 = vadd.f32 %v2281_v59, %v2129_v21  ;;  %v1351_v30 = vadd.f32 %v1319_v58, %v1286_v60  ;;  %v7513_v55 = vmul.f32 %v5685_v11, %v10786_v18 }
 0x28d   : > { %v7516_v0 = vadd.f32 %v1004_v40, %v10787_v19  ;;  %v2426_v39 = vmax.f32 %v2394_v44, 0.0  ;;  %v1509_v50 = vsel %vm927_vm2, %v1507_v23, %v1508_v9  ;;  %v1750_v61 = vsel %vm1160_vm3, %v1748_v10, %v1749_v63  ;;  %v10790_v23 = vld [vmem:[#allocation112_spill] sm:$0xff] }
 0x28e   : > { %v1592_v29 = vadd.f32 %v1509_v50, %v1351_v30  ;;  %v2172_v25 = vmul.f32 %v7445_v56, %v10784_v41  ;;  %v2173_v6 = vmul.f32 %v7445_v56, %v10786_v18  ;;  %v2049_v32 = vrot.slane %v1939_v2, 1  ;;  %v10792_v2 = vld [vmem:[#allocation118_spill] sm:$0xff] }
 0x28f   : > { %v2050_v21 = vrot.slane %v7513_v55, 1  ;;  %v821_v40 = vmul.f32 %v5649_v47, %v7322_v35  ;;  %v10789_v15 = vrot.slane %v10788_v33, 1  ;;  %v10791_v60 = vrot.slane %v10790_v23, 2  ;;  %v7552_v50 = vpop.permute.xlu2 %2492  ;;  %v10796_v23 = vld [vmem:[#allocation43_spill] sm:$0xff] }
 0x290   : > { %v2395_v10 = vadd.f32 %v5811_v52, %v2362_v22  ;;  %v1833_v17 = vadd.f32 %v1750_v61, %v1592_v29  ;;  %v1866_v59 = vmul.f32 %v5687_v12, %v10784_v41  ;;  %v7541_v30 = vmul.f32 %v5685_v11, %v10792_v2  ;;  %2506 = vrot.lane.b32.xlu2 %v2426_v39, %s5460_s21  ;;  %v10794_v29 = vld [vmem:[#allocation22_spill] sm:$0xff] }
 0x291   : > { %v974_v44 = vsel %vm927_vm2, %v971_v28, %v10789_v15  ;;  %v7534_v58 = vsel %vm1160_vm3, %v10791_v60, %v1236_v5  ;;  %v2282_v35 = vrot.slane %v2172_v25, 2  ;;  %v2283_v55 = vrot.slane %v2173_v6, 2  ;;  %v10793_v5 = vld [vmem:[#allocation117_spill] sm:$0xff] }
 0x292   : > { %v1054_v28 = vadd.f32 %v974_v44, %v821_v40  ;;  %v7546_v19 = vmul.f32 %v5668_v1, %v6827_v37  ;;  %v7550_v22 = vmul.f32 %v5673_v4, %v10793_v5  ;;  %v1897_v41 = vadd.f32 %v1866_v59, %v1833_v17  ;;  %v10799_v59 = vld [vmem:[#allocation89_spill] sm:$0xff] }
 0x293   : > { %v10795_v61 = vrot.slane %v10794_v29, 2  ;;  %v2051_v39 = vsel %vm927_vm2, %v2049_v32, %v2050_v21  ;;  %v1320_v6 = vmul.f32 %v5668_v1, %v10772_v34  ;;  %v830_v40 = vmul.f32 %v5649_v47, %v10702_v38  ;;  %v2771_v47 = vld [vmem:[%s10215_s5 + $0x18] sm:$0xff] }
 0x294   : > { %v2427_v15 = vmax.f32 %v2395_v10, 0.0  ;;  %v2130_v44 = vadd.f32 %v2051_v39, %v1897_v41  ;;  %v2174_v60 = vmul.f32 %v7445_v56, %v10796_v23  ;;  %v10798_v17 = vrot.slane %v10797_v57, 1  ;;  %v10805_v41 = vld [vmem:[#allocation52_spill] sm:$0xff]  ;;  %5204 = vmatpush.msra.mxu3 %v2771_v47 }
 0x295   : > { %v1207_v33 = vsel %vm1160_vm3, %v1204_v54, %v10795_v61  ;;  %v10800_v29 = vrot.slane %v10799_v59, 1  ;;  %v2284_v32 = vsel %vm1160_vm3, %v2282_v35, %v2283_v55  ;;  %v10801_v61 = vld [vmem:[#allocation37_spill] sm:$0xff]  ;;  %v10804_v16 = vrot.slane %v10803_v53, 2  ;;  %v2676_v35 = vld [vmem:[%s10213_s3 + $0x18] sm:$0xff] }
 0x296   : > { %v1287_v25 = vadd.f32 %v1207_v33, %v1054_v28  ;;  %v10802_v33 = vrot.slane %v10801_v61, 1  ;;  %v2052_v39 = vrot.slane %v10805_v41, 1  ;;  %v1108_v57 = vmul.f32 %v5651_v48, %v10702_v38  ;;  %2695 = vmatpush.msrb.mxu1 %v2676_v35  ;;  %v2769_v48 = vld [vmem:[%s10215_s5 + $0x8] sm:$0xff] }
 0x297   : > { %v997_v54 = vsel %vm927_vm2, %v10800_v29, %v10798_v17  ;;  %v1752_v10 = vsel %vm1160_vm3, %v1749_v63, %v10804_v16  ;;  %v1408_v17 = vmul.f32 %v5671_v3, %v6719_v31  ;;  %v1649_v63 = vmul.f32 %v5673_v4, %v6719_v31  ;;  %v7600_v41 = vpop.permute.xlu2 %2522 }
 0x298   : > { %v1352_v28 = vadd.f32 %v1320_v6, %v1287_v25  ;;  %v1511_v34 = vsel %vm927_vm2, %v1508_v9, %v10802_v33  ;;  %v1063_v23 = vadd.f32 %v997_v54, %v830_v40  ;;  %v2363_v25 = vadd.f32 %v2284_v32, %v2130_v44  ;;  %2508 = vrot.lane.b32.xlu2 %v2427_v15, %s5460_s21  ;;  %v10806_v32 = vld [vmem:[#allocation95_spill] sm:$0xff] }
 0x299   : > { %v1409_v9 = vmul.f32 %v5671_v3, %v10733_v24  ;;  %v2285_v16 = vrot.slane %v2174_v60, 2  ;;  %v1228_v53 = vrot.slane %v1108_v57, 2  ;;  %v1532_v40 = vrot.slane %v1408_v17, 1 }
 0x29a   : > { %v1593_v6 = vadd.f32 %v1511_v34, %v1352_v28  ;;  %v1650_v38 = vmul.f32 %v5673_v4, %v10733_v24  ;;  %v1867_v44 = vmul.f32 %v5687_v12, %v10786_v18  ;;  %v1329_v29 = vmul.f32 %v5668_v1, %v6719_v31 }
 0x29b   : > { %v1533_v54 = vrot.slane %v1409_v9, 1  ;;  %v10807_v28 = vrot.slane %v10806_v32, 2  ;;  %v1773_v60 = vrot.slane %v1649_v63, 2  ;;  %v1955_v34 = vmul.f32 %v5685_v11, %v6827_v37 }
 0x29c   : > { %v1834_v59 = vadd.f32 %v1752_v10, %v1593_v6  ;;  %v1774_v33 = vrot.slane %v1650_v38, 2  ;;  %v2396_v15 = vadd.f32 %v5811_v52, %v2363_v25  ;;  %v2053_v18 = vsel %vm927_vm2, %v2050_v21, %v2052_v39 }
 0x29d   : > { %v1230_v61 = vsel %vm1160_vm3, %v1228_v53, %v10807_v28  ;;  %v2286_v31 = vsel %vm1160_vm3, %v2283_v55, %v2285_v16  ;;  %v1534_v17 = vsel %vm927_vm2, %v1532_v40, %v1533_v54  ;;  %v1876_v35 = vmul.f32 %v5687_v12, %v10792_v2  ;;  %v10809_v55 = vld [vmem:[#allocation102_spill] sm:$0xff] }
 0x29e   : > { %v1898_v10 = vadd.f32 %v1867_v44, %v1834_v59  ;;  %v1296_v57 = vadd.f32 %v1230_v61, %v1063_v23  ;;  %v2187_v6 = vmul.f32 %v7445_v56, %v10792_v2  ;;  %v2074_v53 = vrot.slane %v7541_v30, 1  ;;  %v10808_v23 = vld [vmem:[#allocation103_spill] sm:$0xff] }
 0x29f   : > { %v2188_v25 = vmul.f32 %v7445_v56, %v6827_v37  ;;  %v1775_v21 = vsel %vm1160_vm3, %v1773_v60, %v1774_v33  ;;  %v2075_v39 = vrot.slane %v1955_v34, 1  ;;  %v1297_v16 = vadd.f32 %v10809_v55, %v10808_v23 }
 0x2a0   : > { %v2131_v9 = vadd.f32 %v2053_v18, %v1898_v10  ;;  %v1361_v63 = vadd.f32 %v1329_v29, %v1296_v57  ;;  %v1330_v40 = vmul.f32 %v5668_v1, %v10733_v24  ;;  %v2428_v38 = vmax.f32 %v2396_v15, 0.0  ;;  %v7633_v57 = vpop.permute.xlu2 %2524  ;;  %v2768_v1 = vld [vmem:[%s10215_s5] sm:$0xff] }
 0x2a1   : > { %v10810_v2 = vrot.slane %v10785_v14, 1  ;;  %v1956_v30 = vmul.f32 %v5685_v11, %v10793_v5  ;;  %v2307_v32 = vrot.slane %v2187_v6, 2  ;;  %v2308_v28 = vrot.slane %v2188_v25, 2 }
 0x2a2   : > { %v2364_v59 = vadd.f32 %v2286_v31, %v2131_v9  ;;  %v1602_v44 = vadd.f32 %v1534_v17, %v1361_v63  ;;  %v1362_v61 = vadd.f32 %v1330_v40, %v1297_v16  ;;  %v1781_v60 = vrot.slane %v7550_v22, 2  ;;  %2510 = vrot.lane.b32.xlu2 %v2428_v38, %s5460_s21 }
 0x2a3   : > { %v1536_v29 = vsel %vm927_vm2, %v1533_v54, %v10810_v2  ;;  %v10811_v24 = vrot.slane %v7466_v27, 2  ;;  %v2076_v10 = vsel %vm927_vm2, %v2074_v53, %v2075_v39  ;;  %v1299_v54 = vadd.f32 %v7534_v58, %v7516_v0 }
 0x2a4   : > { %v1843_v34 = vadd.f32 %v1775_v21, %v1602_v44  ;;  %v1603_v14 = vadd.f32 %v1536_v29, %v1362_v61  ;;  %v2189_v18 = vmul.f32 %v7445_v56, %v10793_v5  ;;  %v2397_v22 = vadd.f32 %v5811_v52, %v2364_v59  ;;  %v10813_v5 = vld [vmem:[#allocation120_spill] sm:$0xff] }
 0x2a5   : > { %v1777_v15 = vsel %vm1160_vm3, %v1774_v33, %v10811_v24  ;;  %v1877_v17 = vmul.f32 %v5687_v12, %v6827_v37  ;;  %v2077_v27 = vrot.slane %v1956_v30, 1  ;;  %v2309_v33 = vsel %vm1160_vm3, %v2307_v32, %v2308_v28  ;;  %v2675_v32 = vld [vmem:[%s10213_s3 + $0x10] sm:$0xff] }
 0x2a6   : > { %v1907_v31 = vadd.f32 %v1876_v35, %v1843_v34  ;;  %v1844_v6 = vadd.f32 %v1777_v15, %v1603_v14  ;;  %v1364_v9 = vadd.f32 %v7546_v19, %v1299_v54  ;;  %v10812_v0 = vrot.slane %v6944_v62, 2  ;;  %2696 = vmatpush.msrb.mxu1 %v2675_v32  ;;  %v2479_v14 = vpop.permute.xlu0 %2478  ;;  %v10816_v54 = vld [vmem:[#allocation59_spill] sm:$0xff]  ;;  %v10830_v32 = vld [vmem:[#allocation29_spill] sm:$0xff] }
 0x2a7   : > { %v2429_v25 = vmax.f32 %v2397_v22, 0.0  ;;  %v2310_v35 = vrot.slane %v2189_v18, 2  ;;  %v2078_v55 = vsel %vm927_vm2, %v2075_v39, %v2077_v27  ;;  %v10814_v39 = vrot.slane %v7008_v8, 1  ;;  %v10817_v18 = vld [vmem:[#allocation12_spill] sm:$0xff] }
 0x2a8   : > { %v2140_v63 = vadd.f32 %v2076_v10, %v1907_v31  ;;  %v1782_v58 = vsel %vm1160_vm3, %v10812_v0, %v1781_v60  ;;  %v1605_v53 = vadd.f32 %v10813_v5, %v1364_v9  ;;  %v1908_v23 = vadd.f32 %v1877_v17, %v1844_v6  ;;  %v2495_v16 = vpop.permute.xlu2 %2494  ;;  %v2674_v10 = vld [vmem:[%s10213_s3 + $0x8] sm:$0xff]  ;;  %v10820_v17 = vld [vmem:[#allocation13_spill] sm:$0xff]  ;;  %v2481_v5 = vpop.permute.xlu1 %2480 }
 0x2a9   : > { %v2311_v38 = vsel %vm1160_vm3, %v2308_v28, %v2310_v35  ;;  %v10815_v60 = vrot.slane %v7011_v46, 2  ;;  %2697 = vmatpush.msrb.mxu1 %v2674_v10  ;;  %v10818_v22 = vmax.f32 %v10817_v18, 0.0  ;;  %v10821_v27 = vmax.f32 %v10820_v17, 0.0  ;;  %v10822_v6 = vld [vmem:[#allocation16_spill] sm:$0xff] }
 0x2aa   : > { %v2373_v21 = vadd.f32 %v2309_v33, %v2140_v63  ;;  %v1846_v37 = vadd.f32 %v1782_v58, %v1605_v53  ;;  %2512 = vrot.lane.b32.xlu2 %v2429_v25, %s5460_s21  ;;  %v2141_v19 = vadd.f32 %v2078_v55, %v1908_v23  ;;  %v10823_v9 = vmax.f32 %v10822_v6, 0.0  ;;  %v10824_v23 = vld [vmem:[#allocation20_spill] sm:$0xff] }
 0x2ab   : > { %v7672_v31 = vsel %vm399_vm0, %v10818_v22, %v10816_v54  ;;  %v10825_v35 = vmax.f32 %v10824_v23, 0.0 }
 0x2ac   : > { %v2406_v40 = vadd.f32 %v5811_v52, %v2373_v21  ;;  %v2374_v59 = vadd.f32 %v2311_v38, %v2141_v19  ;;  %v1910_v44 = vadd.f32 %v7005_v36, %v1846_v37  ;;  %v7683_v63 = vsel %vm399_vm0, %v10823_v9, %v2479_v14  ;;  %v10826_v19 = vld [vmem:[#allocation63_spill] sm:$0xff]  ;;  %v10834_v14 = vld [vmem:[#allocation48_spill] sm:$0xff] }
 0x2ad   : > { %v2604_v0 = vsel %vm2602_vm4, %v7672_v31, 0.0  ;;  %v2606_v53 = vsel %vm2602_vm4, %v7683_v63, 0.0  ;;  %v7694_v55 = vsel %vm399_vm0, %v10825_v35, %v2481_v5  ;;  %v10827_v38 = vld [vmem:[#allocation27_spill] sm:$0xff]  ;;  %v10835_v54 = vmax.f32 %v10834_v14, 0.0  ;;  %v10840_v35 = vld [vmem:[#allocation76_spill] sm:$0xff] }
 0x2ae   : > { %v2438_v62 = vmax.f32 %v2406_v40, 0.0  ;;  %v2407_v29 = vadd.f32 %v5811_v52, %v2374_v59  ;;  %v2143_v30 = vadd.f32 %v10814_v39, %v1910_v44  ;;  %v2608_v40 = vsel %vm2602_vm4, %v7694_v55, 0.0 }
 0x2af   : > { %v7722_v18 = vsel %vm399_vm0, %v10835_v54, %v7382_v49  ;;  %v10838_v49 = vld [vmem:[#allocation64_spill] sm:$0xff] }
 0x2b0   : > { %v2497_v2 = vpop.permute.xlu2 %2496  ;;  %v2439_v61 = vmax.f32 %v2407_v29, 0.0  ;;  %v2376_v28 = vadd.f32 %v10815_v60, %v2143_v30  ;;  %v10829_v30 = vld [vmem:[#allocation67_spill] sm:$0xff]  ;;  %v2616_v9 = vsel %vm2602_vm4, %v7722_v18, 0.0  ;;  %v10839_v5 = vmax.f32 %v10838_v49, 0.0 }
 0x2b2   : > { %2530 = vrot.lane.b32.xlu2 %v2438_v62, %s5460_s21  ;;  %v2409_v34 = vadd.f32 %v5811_v52, %v2376_v28  ;;  %v10819_v52 = vld [vmem:[#allocation53_spill] sm:$0xff]  ;;  %v10828_v62 = vmax.f32 %v10827_v38, 0.0  ;;  %v10832_v28 = vld [vmem:[#allocation44_spill] sm:$0xff] }
 0x2b3   : > { %v7678_v33 = vsel %vm399_vm0, %v10821_v27, %v10819_v52  ;;  %v10836_v27 = vld [vmem:[#allocation60_spill] sm:$0xff] }
 0x2b4   : > { %v2441_v24 = vmax.f32 %v2409_v34, 0.0  ;;  %v2603_v58 = vsel %vm2602_vm4, %v7678_v33, 0.0  ;;  %v7702_v59 = vsel %vm399_vm0, %v10828_v62, %v10826_v19  ;;  %v10833_v34 = vmax.f32 %v10832_v28, 0.0  ;;  %v10842_v38 = vld [vmem:[#allocation84_spill] sm:$0xff] }
 0x2b5   : > { %v2605_v21 = vadd.f32 %v2604_v0, %v2603_v58  ;;  %v2610_v39 = vsel %vm2602_vm4, %v7702_v59, 0.0  ;;  %v10837_v6 = vmax.f32 %v10836_v27, 0.0  ;;  %v10843_v62 = vmax.f32 %v10842_v38, 0.0 }
 0x2b7   : > { %v2607_v37 = vadd.f32 %v2606_v53, %v2605_v21  ;;  %v7740_v53 = vsel %vm399_vm0, %v10839_v5, %v7552_v50 }
 0x2b8   : > { %v7659_v36 = vpop.permute.xlu2 %2526 }
 0x2b9   : > { %v2609_v44 = vadd.f32 %v2608_v40, %v2607_v37  ;;  %v10841_v37 = vmax.f32 %v10840_v35, 0.0  ;;  %v2620_v40 = vsel %vm2602_vm4, %v7740_v53, 0.0 }
 0x2ba   : > { %2532 = vrot.lane.b32.xlu2 %v2439_v61, %s5460_s21  ;;  %v10831_v61 = vmax.f32 %v10830_v32, 0.0 }
 0x2bb   : > { %v2611_v10 = vadd.f32 %v2610_v39, %v2609_v44  ;;  %v7754_v44 = vsel %vm399_vm0, %v10843_v62, %v2497_v2 }
 0x2bc   : > { %v7710_v60 = vsel %vm399_vm0, %v10831_v61, %v10829_v30  ;;  %v10844_v30 = vld [vmem:[#allocation92_spill] sm:$0xff] }
 0x2bd   : > { %v2612_v22 = vsel %vm2602_vm4, %v7710_v60, 0.0  ;;  %v10845_v32 = vmax.f32 %v10844_v30, 0.0 }
 0x2be   : > { %v2613_v17 = vadd.f32 %v2612_v22, %v2611_v10  ;;  %v10846_v10 = vld [vmem:[#allocation97_spill] sm:$0xff] }
 0x2bf   : > { %v10847_v14 = vmax.f32 %v10846_v10, 0.0 }
 0x2c0   : > { %v7663_v8 = vpop.permute.xlu2 %2528 }
 0x2c2   : > { %2536 = vrot.lane.b32.xlu2 %v2441_v24, %s5460_s21  ;;  %v7716_v24 = vsel %vm399_vm0, %v10833_v34, %v7334_v43  ;;  %v7732_v43 = vsel %vm399_vm0, %v10837_v6, %v7502_v13  ;;  %v7747_v13 = vsel %vm399_vm0, %v10841_v37, %v2495_v16  ;;  %v2624_v16 = vsel %vm2602_vm4, %v7754_v44, 0.0 }
 0x2c3   : > { %v2614_v52 = vsel %vm2602_vm4, %v7716_v24, 0.0  ;;  %v2618_v21 = vsel %vm2602_vm4, %v7732_v43, 0.0  ;;  %v2622_v50 = vsel %vm2602_vm4, %v7747_v13, 0.0 }
 0x2c4   : > { %v2615_v58 = vadd.f32 %v2614_v52, %v2613_v17  ;;  %v10848_v52 = vld [vmem:[#allocation114_spill] sm:$0xff] }
 0x2c5   : > { %v10849_v17 = vmax.f32 %v10848_v52, 0.0  ;;  %v10859_v52 = vld [vmem:[#allocation18_spill] sm:$0xff] }
 0x2c6   : > { %v2617_v23 = vadd.f32 %v2616_v9, %v2615_v58  ;;  %v10850_v9 = vld [vmem:[#allocation121_spill] sm:$0xff] }
 0x2c7   : > { %v10851_v58 = vmax.f32 %v10850_v9, 0.0  ;;  %v10861_v9 = vld [vmem:[#allocation34_spill] sm:$0xff] }
 0x2c8   : > { %v2499_v15 = vpop.permute.xlu2 %2498  ;;  %v2619_v19 = vadd.f32 %v2618_v21, %v2617_v23 }
 0x2c9   : > { %v7761_v61 = vsel %vm399_vm0, %v10845_v32, %v2499_v15 }
 0x2ca   : > { %v2621_v39 = vadd.f32 %v2620_v40, %v2619_v19  ;;  %v2626_v2 = vsel %vm2602_vm4, %v7761_v61, 0.0  ;;  %v10853_v40 = vld [vmem:[#allocation14_spill] sm:$0xff]  ;;  %3178 = vrot.lane.b32.xlu2 %v5641_v42, %s5461_s1  ;;  %v2770_v42 = vld [vmem:[%s10215_s5 + $0x10] sm:$0xff] }
 0x2cb   : > { %v10854_v19 = vmax.f32 %v10853_v40, 0.0  ;;  %v10865_v40 = vld [vmem:[#allocation50_spill] sm:$0xff]  ;;  %5205 = vmatpush.msra.mxu3 %v2770_v42 }
 0x2cc   : > { %v2623_v34 = vadd.f32 %v2622_v50, %v2621_v39  ;;  %v10855_v39 = vld [vmem:[#allocation17_spill] sm:$0xff] }
 0x2cd   : > { %v10856_v30 = vmax.f32 %v10855_v39, 0.0  ;;  %5206 = vmatpush.msra.mxu3 %v2769_v48 }
 0x2ce   : > { %v2625_v22 = vadd.f32 %v2624_v16, %v2623_v34 }
 0x2cf   : > { %5207 = vmatpush.msra.mxu3 %v2768_v1 }
 0x2d0   : > { %v2501_v46 = vpop.permute.xlu2 %2500  ;;  %v2627_v6 = vadd.f32 %v2626_v2, %v2625_v22 }
 0x2d1   : > { %v7768_v54 = vsel %vm399_vm0, %v10847_v14, %v2501_v46  ;;  %v2673_v46 = vld [vmem:[%s10213_s3] sm:$0xff] }
 0x2d2   : > { %v2628_v15 = vsel %vm2602_vm4, %v7768_v54, 0.0  ;;  %2698 = vmatpush.msrb.mxu1 %v2673_v46  ;;  %3716 = vrot.lane.b32.xlu2 %v5671_v3, %s5461_s1 }
 0x2d3   : > { %v2629_v21 = vadd.f32 %v2628_v15, %v2627_v6 }
 0x2da   : > { %v2503_v25 = vpop.permute.xlu2 %2502  ;;  %4271 = vrot.lane.b32.xlu2 %v5685_v11, %s5461_s1  ;;  %s5201_s1 = sshll.u32 %s5525_s28, 5 }
 0x2db   : > { %v7775_v27 = vsel %vm399_vm0, %v10849_v17, %v2503_v25  ;;  %v10852_v25 = vmax.f32 %v7192_v26, 0.0  ;;  %v10860_v17 = vmax.f32 %v10859_v52, 0.0  ;;  %s5019_s22 = scalar_lea.hbm %s10217_s7, %s5201_s1 }
 0x2dc   : > { %v2630_v5 = vsel %vm2602_vm4, %v7775_v27, 0.0  ;;  %s5022_s29 = sshll.u32 %s5019_s22, 4  ;;  %s5023_s29 = int_to_ptr.hbm [resolvable:$true] %s5022_s29 }
 0x2dd   : > { %s5397_s9 = sshra.s32 %s5023_s29, 4  ;;  %s5398_s9 = int_to_ptr.hbm [resolvable:$true] %s5397_s9 }
 0x2de   : > { %s5399_s28 = scalar_lea.hbm %s5398_s9, 32  ;;  %p5404_p3 = scmp.lt.s32.totalorder %s5398_s9, %s10217_s7 }
 0x2df   : > { %p5400_p0 = scmp.ne.s32.totalorder %s5398_s9, %s5399_s28  ;;  %p5405_p4 = scmp.lt.s32.totalorder %s5403_s18, %s5399_s28 }
 0x2e1   : > { %p5401_p1 = pnand %p5400_p0, %p5542_p5  ;;  %p5406_p7 = por %p5405_p4, %p5404_p3 }
 0x2e2   : > { %v2505_v29 = vpop.permute.xlu2 %2504 }
 0x2e3   : > { %v7782_v49 = vsel %vm399_vm0, %v10851_v58, %v2505_v29  ;;  %v2631_v29 = vadd.f32 %v2630_v5, %v2629_v21  ;;  %v10862_v58 = vmax.f32 %v10861_v9, 0.0  ;;  %v10863_v21 = vld [vmem:[#allocation47_spill] sm:$0xff]  ;;  %v10873_v9 = vld [vmem:[#allocation86_spill] sm:$0xff]  ;;  %p5402_p2 = pneg %p5401_p1 }
 0x2e4   : > { %v2632_v35 = vsel %vm2602_vm4, %v7782_v49, 0.0 }
 0x2e5   : > { %v2633_v50 = vadd.f32 %v2632_v35, %v2631_v29  ;;  %v7829_v46 = vsel %vm399_vm0, %v10862_v58, %v7289_v7  ;;  %v10874_v58 = vmax.f32 %v10873_v9, 0.0  ;;  %p5407_p8 = pnand %p5406_p7, %p5402_p2 }
 0x2e6   : > { %v2644_v29 = vsel %vm2602_vm4, %v7829_v46, 0.0 }
 0x2ea   : > { %v2507_v0 = vpop.permute.xlu2 %2506 }
 0x2eb   : > { %v7792_v23 = vsel %vm399_vm0, %v10852_v25, %v2507_v0  ;;  %v10864_v25 = vmax.f32 %v10863_v21, 0.0 }
 0x2ec   : > { %v2634_v62 = vsel %vm2602_vm4, %v7792_v23, 0.0 }
 0x2ed   : > { %v2635_v32 = vadd.f32 %v2634_v62, %v2633_v50  ;;  %v7837_v35 = vsel %vm399_vm0, %v10864_v25, %v7428_v51  ;;  %v10875_v25 = vld [vmem:[#allocation96_spill] sm:$0xff] }
 0x2ee   : > { %v2646_v50 = vsel %vm2602_vm4, %v7837_v35, 0.0 }
 0x2f2   : > { %v2509_v28 = vpop.permute.xlu2 %2508 }
 0x2f3   : > { %v7799_v38 = vsel %vm399_vm0, %v10854_v19, %v2509_v28  ;;  %v10857_v28 = vld [vmem:[#allocation33_spill] sm:$0xff]  ;;  %v10866_v19 = vmax.f32 %v10865_v40, 0.0  ;;  %v2535_v40 = vpop.permute.xlu1 %2534 }
 0x2f4   : > { %v2636_v0 = vsel %vm2602_vm4, %v7799_v38, 0.0  ;;  %v10858_v14 = vmax.f32 %v10857_v28, 0.0 }
 0x2f5   : > { %v2637_v34 = vadd.f32 %v2636_v0, %v2635_v32  ;;  %v7845_v7 = vsel %vm399_vm0, %v10866_v19, %v7469_v20 }
 0x2f6   : > { %v7816_v2 = vsel %vm399_vm0, %v10858_v14, %v7241_v45 }
 0x2f7   : > { %v2642_v45 = vsel %vm2602_vm4, %v7816_v2, 0.0 }
 0x2fc   : > { %v2511_v37 = vpop.permute.xlu2 %2510 }
 0x2fd   : > { %v7806_v26 = vsel %vm399_vm0, %v10856_v30, %v2511_v37  ;;  %v10867_v30 = vld [vmem:[#allocation62_spill] sm:$0xff] }
 0x2fe   : > { %v2638_v16 = vsel %vm2602_vm4, %v7806_v26, 0.0  ;;  %v10868_v0 = vmax.f32 %v10867_v30, 0.0 }
 0x2ff   : > { %v2639_v22 = vadd.f32 %v2638_v16, %v2637_v34  ;;  %v2648_v16 = vsel %vm2602_vm4, %v7845_v7, 0.0  ;;  %v10869_v34 = vld [vmem:[#allocation68_spill] sm:$0xff] }
 0x300   : > { %v7853_v51 = vsel %vm399_vm0, %v10868_v0, %v7600_v41 }
 0x301   : > { %v2650_v14 = vsel %vm2602_vm4, %v7853_v51, 0.0 }
 0x304   : > { %v2513_v10 = vpop.permute.xlu2 %2512 }
 0x305   : > { %v7821_v15 = vsel %vm399_vm0, %v10860_v17, %v2513_v10  ;;  %v10870_v10 = vmax.f32 %v10869_v34, 0.0 }
 0x306   : > { %v2640_v6 = vsel %vm2602_vm4, %v7821_v15, 0.0 }
 0x307   : > { %v2641_v5 = vadd.f32 %v2640_v6, %v2639_v22  ;;  %v7861_v20 = vsel %vm399_vm0, %v10870_v10, %v7633_v57  ;;  %v10871_v22 = vld [vmem:[#allocation79_spill] sm:$0xff]  ;;  %v7877_v57 = vsel %vm399_vm0, %v10874_v58, %v7663_v8 }
 0x308   : > { %v10872_v52 = vmax.f32 %v10871_v22, 0.0  ;;  %v2652_v6 = vsel %vm2602_vm4, %v7861_v20, 0.0  ;;  %v2656_v19 = vsel %vm2602_vm4, %v7877_v57, 0.0 }
 0x309   : > { %v2643_v37 = vadd.f32 %v2642_v45, %v2641_v5 }
 0x30a   : > { %v7869_v41 = vsel %vm399_vm0, %v10872_v52, %v7659_v36  ;;  %v10881_v52 = vld [vmem:[#allocation111_spill] sm:$0xff] }
 0x30b   : > { %v2645_v62 = vadd.f32 %v2644_v29, %v2643_v37  ;;  %v2654_v45 = vsel %vm2602_vm4, %v7869_v41, 0.0  ;;  %v10876_v37 = vmax.f32 %v10875_v25, 0.0 }
 0x30c   : > { %v2531_v39 = vpop.permute.xlu2 %2530 }
 0x30d   : > { %v2647_v32 = vadd.f32 %v2646_v50, %v2645_v62  ;;  %v7884_v36 = vsel %vm399_vm0, %v10876_v37, %v2531_v39  ;;  %v10877_v50 = vld [vmem:[#allocation32_spill] sm:$0xff] }
 0x30e   : > { %v10878_v30 = vmax.f32 %v10877_v50, 0.0  ;;  %v2658_v0 = vsel %vm2602_vm4, %v7884_v36, 0.0  ;;  %v7915_v50 = vld [vmem:[#allocation7] sm:$0x3f] }
 0x30f   : > { %v2649_v28 = vadd.f32 %v2648_v16, %v2647_v32  ;;  %v10879_v32 = vld [vmem:[#allocation106_spill] sm:$0xff]  ;;  %v2705_v3 = vrot.slane %v7915_v50, 3 }
 0x310   : > { %v10880_v16 = vmax.f32 %v10879_v32, 0.0 }
 0x311   : > { %v2651_v17 = vadd.f32 %v2650_v14, %v2649_v28 }
 0x312   : > { %v7898_v34 = vsel %vm399_vm0, %v10880_v16, %v2535_v40 }
 0x313   : > { %v2653_v5 = vadd.f32 %v2652_v6, %v2651_v17  ;;  %v2662_v14 = vsel %vm2602_vm4, %v7898_v34, 0.0  ;;  %v10882_v17 = vmax.f32 %v10881_v52, 0.0 }
 0x314   : > { %v2533_v21 = vpop.permute.xlu2 %2532 }
 0x315   : > { %v2655_v29 = vadd.f32 %v2654_v45, %v2653_v5  ;;  %v7891_v8 = vsel %vm399_vm0, %v10878_v30, %v2533_v21  ;;  %v2678_v30 = vrot.slane %v7915_v50, 2 }
 0x316   : > { %v2660_v10 = vsel %vm2602_vm4, %v7891_v8, 0.0 }
 0x317   : > { %v2657_v62 = vadd.f32 %v2656_v19, %v2655_v29 }
 0x319   : > { %v2659_v39 = vadd.f32 %v2658_v0, %v2657_v62  ;;  %v2704_v62 = vld [vmem:[%s10214_s4] sm:$0xff] }
 0x31a   : > { %2726 = vmatpush.msra.mxu2 %v2704_v62 }
 0x31b   : > { %v2661_v28 = vadd.f32 %v2660_v10, %v2659_v39 }
 0x31c   : > { %v2537_v22 = vpop.permute.xlu2 %2536  ;;  %2881 = vmatpush.msrb.mxu2 %v2771_v47 }
 0x31d   : > { %v7907_v6 = vsel %vm399_vm0, %v10882_v17, %v2537_v22  ;;  %v2663_v9 = vadd.f32 %v2662_v14, %v2661_v28 }
 0x31e   : > { %v2664_v58 = vsel %vm2602_vm4, %v7907_v6, 0.0  ;;  %2882 = vmatpush.msrb.mxu2 %v2770_v42  ;;  %v8064_v42 = vpop.permute.xlu0 %3648 }
 0x31f   : > { %v2665_v5 = vadd.f32 %v2664_v58, %v2663_v9  ;;  %v8038_v9 = vpop.permute.xlu1 %3143 }
 0x320   : > { %2883 = vmatpush.msrb.mxu2 %v2769_v48 }
 0x321   : > { %v2666_v45 = vrot.slane %v2665_v5, 4 }
 0x322   : > { %2884 = vmatpush.msrb.mxu2 %v2768_v1 }
 0x323   : > { %v2667_v21 = vadd.f32 %v2666_v45, %v2665_v5 }
 0x324   : > { %v8044_v58 = vpop.permute.xlu2 %3178 }
 0x325   : > { %v2668_v25 = vrot.slane %v2667_v21, 2  ;;  %v3181_v5 = vmul.f32 0.0, %v8044_v58 }
 0x327   : > { %v2669_v37 = vadd.f32 %v2668_v25, %v2667_v21  ;;  %v3146_v21 = vmul.f32 0.0, %v8038_v9 }
 0x329   : > { %v2670_v29 = vrot.slane %v2669_v37, 1 }
 0x32b   : > { %v2671_v40 = vadd.f32 %v2670_v29, %v2669_v37 }
 0x32d   : > { %v2672_v19 = vmul.f32 0.00390625, %v2671_v40 }
 0x32f   : > { %5161 = vmatmul.msk.f32.vlgmr.msrb.gmra.mxu1 %vm2602_vm4, %v2672_v19 }
 0x3ac   : > { %v2700_v0 = vpop.f32.mrf.mxu1 }
 0x3ad   : > { %v2701_v32 = vadd.f32 %v2700_v0, %v2678_v30 }
 0x3af   : > { %v2703_v16 = vmax.f32 %v2701_v32, 0.0 }
 0x3b1   : > { %5162 = vmatmul.msk.f32.vlgmr.msra.gmra.mxu2 %vm2707_vm5, %v2703_v16 }
 0x434   : > { %v2728_v4 = vpop.f32.mrf.mxu2 }
 0x435   : > { %v2729_v11 = vadd.f32 %v2728_v4, %v2705_v3  ;;  %v8071_v4 = vpop.permute.xlu2 %3716 }
 0x437   : > { %v2731_v12 = vadd.f32 3.0, %v2729_v11 }
 0x439   : > { %v2732_v56 = vmax.f32 %v2731_v12, 0.0 }
 0x43b   : > { %v2733_v39 = vmin.f32 %v2732_v56, 6.0 }
 0x43d   : > { %v2734_v10 = vmul.f32 0.16666667, %v2733_v39 }
 0x43f   : > { %v7941_v28 = vperm.slane %v2734_v10, 0 }
 0x441   : > { %v2736_v14 = vmul.f32 %v7941_v28, %v7678_v33  ;;  %v2752_v22 = vmul.f32 %v7941_v28, %v7792_v23  ;;  %v2737_v52 = vmul.f32 %v7941_v28, %v7672_v31  ;;  %v2753_v17 = vmul.f32 %v7941_v28, %v7799_v38 }
 0x442   : > { %v2738_v33 = vmul.f32 %v7941_v28, %v7683_v63  ;;  %v2754_v23 = vmul.f32 %v7941_v28, %v7806_v26  ;;  %v2739_v31 = vmul.f32 %v7941_v28, %v7694_v55  ;;  %v2755_v38 = vmul.f32 %v7941_v28, %v7821_v15 }
 0x443   : > { %5163 = vmatmul.msk.f32.vlgmr.msrb.gmra.mxu2 %vm2602_vm4, %v2736_v14  ;;  %5179 = vmatmul.msk.f32.vlgmr.msra.gmra.mxu3 %vm2602_vm4, %v2752_v22  ;;  %v2740_v63 = vmul.f32 %v7941_v28, %v7702_v59  ;;  %v2756_v26 = vmul.f32 %v7941_v28, %v7816_v2  ;;  %v2741_v55 = vmul.f32 %v7941_v28, %v7710_v60 }
 0x444   : > { %v2757_v15 = vmul.f32 %v7941_v28, %v7829_v46  ;;  %v2742_v59 = vmul.f32 %v7941_v28, %v7716_v24  ;;  %v2758_v2 = vmul.f32 %v7941_v28, %v7837_v35  ;;  %v2743_v60 = vmul.f32 %v7941_v28, %v7722_v18 }
 0x445   : > { %v2759_v46 = vmul.f32 %v7941_v28, %v7845_v7  ;;  %v2744_v24 = vmul.f32 %v7941_v28, %v7732_v43  ;;  %v2760_v35 = vmul.f32 %v7941_v28, %v7853_v51  ;;  %v2745_v18 = vmul.f32 %v7941_v28, %v7740_v53 }
 0x446   : > { %v2761_v7 = vmul.f32 %v7941_v28, %v7861_v20  ;;  %v2746_v43 = vmul.f32 %v7941_v28, %v7747_v13  ;;  %v2762_v51 = vmul.f32 %v7941_v28, %v7869_v41  ;;  %v2747_v53 = vmul.f32 %v7941_v28, %v7754_v44 }
 0x447   : > { %v2763_v20 = vmul.f32 %v7941_v28, %v7877_v57  ;;  %v2748_v13 = vmul.f32 %v7941_v28, %v7761_v61  ;;  %v2764_v41 = vmul.f32 %v7941_v28, %v7884_v36  ;;  %v2749_v44 = vmul.f32 %v7941_v28, %v7768_v54 }
 0x448   : > { %v2765_v57 = vmul.f32 %v7941_v28, %v7891_v8  ;;  %v2750_v61 = vmul.f32 %v7941_v28, %v7775_v27  ;;  %v2766_v36 = vmul.f32 %v7941_v28, %v7898_v34  ;;  %v2751_v54 = vmul.f32 %v7941_v28, %v7782_v49  ;;  %v8050_v49 = vpop.permute.xlu1 %3413 }
 0x449   : > { %v2767_v8 = vmul.f32 %v7941_v28, %v7907_v6  ;;  %v8042_v27 = vperm.slane %v7915_v50, 4  ;;  %v3273_v6 = vrot.slane %v3181_v5, 1  ;;  %v3416_v25 = vmul.f32 0.0, %v8050_v49 }
 0x44b   : > { %5164 = vmatmul.msk.f32.gmra.mxu2 %vm2602_vm4, %v2737_v52  ;;  %5180 = vmatmul.msk.f32.gmra.mxu3 %vm2602_vm4, %v2753_v17  ;;  %v3381_v19 = vadd.f32 %v3273_v6, %v3146_v21  ;;  %v3508_v62 = vrot.slane %v3416_v25, 2 }
 0x44d   : > { %v8069_v1 = vadd.f32 %v3508_v62, %v3381_v19 }
 0x450   : > { %v8079_v10 = vpop.permute.xlu1 %3960 }
 0x453   : > { %5165 = vmatmul.msk.f32.gmra.mxu2 %vm2602_vm4, %v2738_v33  ;;  %5181 = vmatmul.msk.f32.gmra.mxu3 %vm2602_vm4, %v2754_v23 }
 0x45b   : > { %5166 = vmatmul.msk.f32.gmra.mxu2 %vm2602_vm4, %v2739_v31  ;;  %5182 = vmatmul.msk.f32.gmra.mxu3 %vm2602_vm4, %v2755_v38 }
 0x463   : > { %5167 = vmatmul.msk.f32.gmra.mxu2 %vm2602_vm4, %v2740_v63  ;;  %5183 = vmatmul.msk.f32.gmra.mxu3 %vm2602_vm4, %v2756_v26 }
 0x46b   : > { %5168 = vmatmul.msk.f32.gmra.mxu2 %vm2602_vm4, %v2741_v55  ;;  %5184 = vmatmul.msk.f32.gmra.mxu3 %vm2602_vm4, %v2757_v15 }
 0x473   : > { %5169 = vmatmul.msk.f32.gmra.mxu2 %vm2602_vm4, %v2742_v59  ;;  %5185 = vmatmul.msk.f32.gmra.mxu3 %vm2602_vm4, %v2758_v2 }
 0x47b   : > { %5170 = vmatmul.msk.f32.gmra.mxu2 %vm2602_vm4, %v2743_v60  ;;  %5186 = vmatmul.msk.f32.gmra.mxu3 %vm2602_vm4, %v2759_v46 }
 0x483   : > { %5171 = vmatmul.msk.f32.gmra.mxu2 %vm2602_vm4, %v2744_v24  ;;  %5187 = vmatmul.msk.f32.gmra.mxu3 %vm2602_vm4, %v2760_v35 }
 0x48b   : > { %5172 = vmatmul.msk.f32.gmra.mxu2 %vm2602_vm4, %v2745_v18  ;;  %5188 = vmatmul.msk.f32.gmra.mxu3 %vm2602_vm4, %v2761_v7 }
 0x493   : > { %5173 = vmatmul.msk.f32.gmra.mxu2 %vm2602_vm4, %v2746_v43  ;;  %5189 = vmatmul.msk.f32.gmra.mxu3 %vm2602_vm4, %v2762_v51 }
 0x49b   : > { %5174 = vmatmul.msk.f32.gmra.mxu2 %vm2602_vm4, %v2747_v53  ;;  %5190 = vmatmul.msk.f32.gmra.mxu3 %vm2602_vm4, %v2763_v20 }
 0x4a3   : > { %5175 = vmatmul.msk.f32.gmra.mxu2 %vm2602_vm4, %v2748_v13  ;;  %5191 = vmatmul.msk.f32.gmra.mxu3 %vm2602_vm4, %v2764_v41 }
 0x4ab   : > { %5176 = vmatmul.msk.f32.gmra.mxu2 %vm2602_vm4, %v2749_v44  ;;  %5192 = vmatmul.msk.f32.gmra.mxu3 %vm2602_vm4, %v2765_v57 }
 0x4b3   : > { %5177 = vmatmul.msk.f32.gmra.mxu2 %vm2602_vm4, %v2750_v61  ;;  %5193 = vmatmul.msk.f32.gmra.mxu3 %vm2602_vm4, %v2766_v36 }
 0x4bb   : > { %5178 = vmatmul.msk.f32.gmra.mxu2 %vm2602_vm4, %v2751_v54  ;;  %5194 = vmatmul.msk.f32.gmra.mxu3 %vm2602_vm4, %v2767_v8 }
 0x4c6   : > { %v2886_v34 = vpop.f32.mrf.mxu2  ;;  %v2934_v37 = vpop.f32.mrf.mxu3 }
 0x4c7   : > { %v8048_v45 = vadd.f32 %v2886_v34, %v8042_v27  ;;  %v8056_v40 = vadd.f32 %v2934_v37, %v8042_v27 }
 0x4c9   : > { %10883 = vst [vmem:[#allocation54_spill] sm:$0xff] %v8048_v45  ;;  %v3014_v29 = vrot.slane %v8048_v45, 7  ;;  %v3038_v16 = vrot.slane %v8056_v40, 7 }
 0x4ca   : > { %10884 = vst [vmem:[#allocation55_spill] sm:$0xff] %v8056_v40 }
 0x4cb   : > { %v3110_v0 = vsel %vm673_vm1, 0.0, %v3014_v29  ;;  %v8098_v23 = vsel %vm673_vm1, 0.0, %v3038_v16 }
 0x4cc   : > { %v8067_v48 = vmul.f32 %v8044_v58, %v3110_v0  ;;  %v8074_v11 = vmul.f32 %v8050_v49, %v3110_v0  ;;  %v3651_v12 = vmul.f32 %v8064_v42, %v3110_v0  ;;  %v8082_v28 = vmul.f32 %v8071_v4, %v3110_v0  ;;  %10887 = vst [vmem:[#allocation66_spill] sm:$0xff] %v8098_v23 }
 0x4cd   : > { %v8092_v17 = vmul.f32 %v8038_v9, %v3110_v0  ;;  %v8095_v33 = vmul.f32 %v8079_v10, %v3110_v0  ;;  %v8117_v35 = vmul.f32 %v8044_v58, %v8098_v23 }
 0x4ce   : > { %v2889_v30 = vpop.f32.mrf.mxu2  ;;  %v2937_v3 = vpop.f32.mrf.mxu3  ;;  %v8111_v60 = vadd.f32 %v3651_v12, %v8069_v1  ;;  %v3815_v24 = vrot.slane %v8082_v28, 1 }
 0x4cf   : > { %v8060_v32 = vadd.f32 %v2889_v30, %v8042_v27  ;;  %v8089_v52 = vadd.f32 %v2937_v3, %v8042_v27  ;;  %10888 = vst [vmem:[#allocation75_spill] sm:$0xff] %v8117_v35  ;;  %v4059_v5 = vrot.slane %v8095_v33, 2 }
 0x4d1   : > { %10885 = vst [vmem:[#allocation57_spill] sm:$0xff] %v8060_v32  ;;  %v3015_v47 = vrot.slane %v8060_v32, 7  ;;  %v3039_v18 = vrot.slane %v8089_v52, 7 }
 0x4d2   : > { %10886 = vst [vmem:[#allocation65_spill] sm:$0xff] %v8089_v52 }
 0x4d3   : > { %v3016_v56 = vsel %vm673_vm1, %v3014_v29, %v3015_v47  ;;  %v3126_v39 = vsel %vm673_vm1, %v3015_v47, 0.0  ;;  %v8133_v44 = vsel %vm673_vm1, %v3038_v16, %v3039_v18  ;;  %v8136_v57 = vsel %vm673_vm1, %v3039_v18, 0.0 }
 0x4d4   : > { %v8085_v14 = vmul.f32 %v8044_v58, %v3016_v56  ;;  %v3184_v22 = vmul.f32 %v8044_v58, %v3126_v39  ;;  %v8101_v31 = vmul.f32 %v8050_v49, %v3016_v56  ;;  %v3419_v26 = vmul.f32 %v8050_v49, %v3126_v39  ;;  %10890 = vst [vmem:[#allocation56_spill] sm:$0xff] %v8133_v44 }
 0x4d5   : > { %v8106_v55 = vmul.f32 %v8071_v4, %v3016_v56  ;;  %v3721_v46 = vmul.f32 %v8071_v4, %v3126_v39  ;;  %v3148_v43 = vmul.f32 %v8038_v9, %v3016_v56  ;;  %v8129_v20 = vmul.f32 %v8079_v10, %v3016_v56  ;;  %10891 = vst [vmem:[#allocation61_spill] sm:$0xff] %v8136_v57 }
 0x4d6   : > { %v10357_v38 = vrot.slane %v8085_v14, 1  ;;  %v3278_v63 = vrot.slane %v3184_v22, 1  ;;  %v2892_v15 = vpop.f32.mrf.mxu2  ;;  %v10356_v53 = vrot.slane %v8101_v31, 2  ;;  %v3513_v13 = vrot.slane %v3419_v26, 2  ;;  %v2940_v61 = vpop.f32.mrf.mxu3 }
 0x4d7   : > { %v8121_v7 = vadd.f32 %v2892_v15, %v8042_v27  ;;  %v3816_v41 = vrot.slane %v8106_v55, 1  ;;  %v3818_v36 = vrot.slane %v3721_v46, 1  ;;  %v8140_v54 = vmul.f32 %v8044_v58, %v8133_v44  ;;  %v8182_v15 = vpop.permute.xlu2 %4271 }
 0x4d8   : > { %v3279_v51 = vsel %vm927_vm2, %v10357_v38, %v3278_v63  ;;  %v3208_v8 = vmul.f32 %v8044_v58, %v8136_v57  ;;  %v3965_v25 = vmul.f32 %v8079_v10, %v3126_v39  ;;  %v3652_v37 = vmul.f32 %v8064_v42, %v3016_v56 }
 0x4d9   : > { %10889 = vst [vmem:[#allocation58_spill] sm:$0xff] %v8121_v7  ;;  %v3017_v34 = vrot.slane %v8121_v7, 7  ;;  %v3383_v6 = vadd.f32 %v3279_v51, %v3148_v43  ;;  %v4060_v29 = vrot.slane %v8129_v20, 2  ;;  %v8152_v19 = vmul.f32 %v8050_v49, %v8133_v44 }
 0x4da   : > { %10892 = vst [vmem:[#allocation88_spill] sm:$0xff] %v8140_v54  ;;  %v3443_v62 = vmul.f32 %v8050_v49, %v8136_v57  ;;  %v3514_v30 = vsel %vm1160_vm3, %v10356_v53, %v3513_v13  ;;  %v10354_v0 = vrot.slane %v8140_v54, 1  ;;  %v3318_v16 = vrot.slane %v3208_v8, 1 }
 0x4db   : > { %10893 = vst [vmem:[#allocation69_spill] sm:$0xff] %v8152_v19  ;;  %v8162_v47 = vmul.f32 %v8071_v4, %v8136_v57  ;;  %v3819_v12 = vsel %vm927_vm2, %v3816_v41, %v3818_v36  ;;  %v8166_v56 = vsel %vm673_vm1, 0.0, %v3017_v34  ;;  %v8169_v39 = vadd.f32 %v2940_v61, %v8042_v27 }
 0x4dc   : > { %v8174_v33 = vadd.f32 %v3514_v30, %v3383_v6  ;;  %v4062_v63 = vrot.slane %v3965_v25, 2  ;;  %v3164_v26 = vmul.f32 %v8038_v9, %v8133_v44  ;;  %v8180_v55 = vmul.f32 %v8079_v10, %v8136_v57 }
 0x4dd   : > { %10894 = vst [vmem:[#allocation70_spill] sm:$0xff] %v8162_v47  ;;  %v10355_v46 = vrot.slane %v8152_v19, 2  ;;  %v3553_v18 = vrot.slane %v3443_v62, 2  ;;  %v3041_v43 = vrot.slane %v8169_v39, 7  ;;  %v3319_v20 = vsel %vm927_vm2, %v10354_v0, %v3318_v16 }
 0x4de   : > { %v2895_v3 = vpop.f32.mrf.mxu2  ;;  %10895 = vst [vmem:[#allocation81_spill] sm:$0xff] %v8169_v39  ;;  %v8193_v61 = vmul.f32 %v8182_v15, %v8136_v57  ;;  %v8197_v36 = vmul.f32 %v8044_v58, %v8166_v56  ;;  %v2943_v8 = vpop.f32.mrf.mxu3  ;;  %v3684_v30 = vadd.f32 %v3652_v37, %v8069_v1  ;;  %v8219_v0 = vadd.f32 %v3319_v20, %v3164_v26 }
 0x4df   : > { %v8172_v22 = vadd.f32 %v2895_v3, %v8042_v27  ;;  %10897 = vst [vmem:[#allocation71_spill] sm:$0xff] %v8180_v55  ;;  %v8200_v6 = vsel %vm673_vm1, 0.0, %v3041_v43  ;;  %v8217_v21 = vadd.f32 %v2943_v8, %v8042_v27  ;;  %v4063_v37 = vsel %vm1160_vm3, %v4060_v29, %v4062_v63 }
 0x4e0   : > { %10898 = vst [vmem:[#allocation72_spill] sm:$0xff] %v8193_v61  ;;  %v8228_v1 = vmul.f32 %v8044_v58, %v8200_v6  ;;  %v8234_v26 = vperm.slane %v7915_v50, 5  ;;  %v8245_v63 = vsel %vm927_vm2, %v3815_v24, %v3816_v41  ;;  %v8265_v41 = vsel %vm1160_vm3, %v4059_v5, %v4060_v29 }
 0x4e1   : > { %10896 = vst [vmem:[#allocation82_spill] sm:$0xff] %v8172_v22  ;;  %v3018_v51 = vrot.slane %v8172_v22, 7  ;;  %v3042_v53 = vrot.slane %v8217_v21, 7 }
 0x4e2   : > { %10899 = vst [vmem:[#allocation74_spill] sm:$0xff] %v8200_v6 }
 0x4e3   : > { %v8203_v25 = vsel %vm673_vm1, %v3017_v34, %v3018_v51  ;;  %v8206_v62 = vsel %vm673_vm1, %v3018_v51, 0.0  ;;  %10900 = vst [vmem:[#allocation100_spill] sm:$0xff] %v8217_v21  ;;  %v8224_v34 = vsel %vm1160_vm3, %v10355_v46, %v3553_v18  ;;  %v3928_v46 = vadd.f32 %v3819_v12, %v3684_v30  ;;  %v8247_v51 = vpop.permute.xlu0 %4204 }
 0x4e4   : > { %v8212_v3 = vmul.f32 %v8044_v58, %v8203_v25  ;;  %v3187_v13 = vmul.f32 %v8044_v58, %v8206_v62  ;;  %10901 = vst [vmem:[#allocation80_spill] sm:$0xff] %v8219_v0  ;;  %v8238_v20 = vmul.f32 %v8050_v49, %v8203_v25  ;;  %v3422_v18 = vmul.f32 %v8050_v49, %v8206_v62 }
 0x4e5   : > { %10902 = vst [vmem:[#allocation83_spill] sm:$0xff] %v8224_v34  ;;  %v8255_v50 = vmul.f32 %v8079_v10, %v8206_v62  ;;  %v3150_v24 = vmul.f32 %v8038_v9, %v8203_v25  ;;  %v8269_v12 = vmul.f32 %v8247_v51, %v8166_v56  ;;  %v8277_v38 = vsel %vm673_vm1, %v3041_v43, %v3042_v53 }
 0x4e6   : > { %10903 = vst [vmem:[#allocation91_spill] sm:$0xff] %v8228_v1  ;;  %v10360_v16 = vrot.slane %v8212_v3, 1  ;;  %v3283_v2 = vrot.slane %v3187_v13, 1  ;;  %v2898_v8 = vpop.f32.mrf.mxu2  ;;  %v8251_v13 = vmul.f32 %v8071_v4, %v8206_v62  ;;  %v8280_v28 = vsel %vm673_vm1, %v3042_v53, 0.0  ;;  %v2946_v21 = vpop.f32.mrf.mxu3 }
 0x4e7   : > { %v8259_v59 = vadd.f32 %v2898_v8, %v8042_v27  ;;  %v4276_v8 = vmul.f32 %v8182_v15, %v8206_v62  ;;  %10905 = vst [vmem:[#allocation104_spill] sm:$0xff] %v8277_v38  ;;  %v8285_v29 = vmul.f32 %v8044_v58, %v8277_v38  ;;  %v3211_v39 = vmul.f32 %v8044_v58, %v8280_v28 }
 0x4e8   : > { %v3284_v30 = vsel %vm927_vm2, %v10360_v16, %v3283_v2  ;;  %10906 = vst [vmem:[#allocation93_spill] sm:$0xff] %v8280_v28  ;;  %v3518_v16 = vrot.slane %v3422_v18, 2  ;;  %v4172_v22 = vadd.f32 %v4063_v37, %v3928_v46  ;;  %v8296_v5 = vmul.f32 %v8050_v49, %v8277_v38 }
 0x4e9   : > { %10904 = vst [vmem:[#allocation108_spill] sm:$0xff] %v8259_v59  ;;  %v3020_v2 = vrot.slane %v8259_v59, 7  ;;  %v8292_v53 = vadd.f32 %v3284_v30, %v3150_v24  ;;  %v3446_v7 = vmul.f32 %v8050_v49, %v8280_v28  ;;  %v4208_v32 = vmul.f32 %v8247_v51, %v8203_v25 }
 0x4ea   : > { %10907 = vst [vmem:[#allocation77_spill] sm:$0xff] %v8285_v29  ;;  %v8305_v18 = vmul.f32 %v8071_v4, %v8280_v28  ;;  %v8309_v46 = vmul.f32 %v8079_v10, %v8280_v28  ;;  %v8313_v24 = vmul.f32 %v8182_v15, %v8203_v25  ;;  %v3323_v30 = vrot.slane %v3211_v39, 1 }
 0x4eb   : > { %10908 = vst [vmem:[#allocation73_spill] sm:$0xff] %v8296_v5  ;;  %v8316_v43 = vsel %vm673_vm1, 0.0, %v3020_v2  ;;  %v8319_v52 = vadd.f32 %v2946_v21, %v8042_v27  ;;  %v10913_v45 = vrot.slane %v8238_v20, 2  ;;  %v3166_v55 = vmul.f32 %v8038_v9, %v8277_v38 }
 0x4ec   : > { %10909 = vst [vmem:[#allocation78_spill] sm:$0xff] %v8305_v18  ;;  %v8333_v39 = vmul.f32 %v8182_v15, %v8280_v28  ;;  %v4369_v47 = vrot.slane %v4276_v8, 1  ;;  %v3558_v21 = vrot.slane %v3446_v7, 2  ;;  %v4367_v28 = vrot.slane %v8313_v24, 1 }
 0x4ed   : > { %10910 = vst [vmem:[#allocation109_spill] sm:$0xff] %v8309_v46  ;;  %v8327_v40 = vsel %vm1160_vm3, %v10913_v45, %v3518_v16  ;;  %v3044_v0 = vrot.slane %v8319_v52, 7  ;;  %v8342_v16 = vmul.f32 %v8044_v58, %v8316_v43  ;;  %v10916_v8 = vrot.slane %v8285_v29, 1 }
 0x4ee   : > { %v2901_v37 = vpop.f32.mrf.mxu2  ;;  %10911 = vst [vmem:[#allocation51_spill] sm:$0xff] %v8319_v52  ;;  %v2949_v35 = vpop.f32.mrf.mxu3  ;;  %v4239_v19 = vadd.f32 %v4208_v32, %v4172_v22  ;;  %v3927_v29 = vadd.f32 %v8245_v63, %v8111_v60  ;;  %v4274_v38 = vmul.f32 %v8182_v15, %v8166_v56  ;;  %v10923_v6 = vrot.slane %v8296_v5, 2 }
 0x4ef   : > { %v8322_v59 = vadd.f32 %v2901_v37, %v8042_v27  ;;  %10914 = vst [vmem:[#allocation31_spill] sm:$0xff] %v8333_v39  ;;  %v3324_v34 = vsel %vm927_vm2, %v10916_v8, %v3323_v30  ;;  %v8357_v45 = vsel %vm673_vm1, 0.0, %v3044_v0  ;;  %v8366_v30 = vadd.f32 %v2949_v35, %v8042_v27 }
 0x4f0   : > { %10915 = vst [vmem:[#allocation99_spill] sm:$0xff] %v8342_v16  ;;  %v8378_v8 = vadd.f32 %v3324_v34, %v3166_v55  ;;  %v4370_v35 = vsel %vm927_vm2, %v4367_v28, %v4369_v47  ;;  %v8384_v1 = vmul.f32 %v8044_v58, %v8357_v45 }
 0x4f1   : > { %10912 = vst [vmem:[#allocation85_spill] sm:$0xff] %v8322_v59  ;;  %v3021_v37 = vrot.slane %v8322_v59, 7  ;;  %v8354_v59 = vpop.permute.xlu1 %4507  ;;  %v4475_v44 = vadd.f32 %v4370_v35, %v4239_v19 }
 0x4f2   : > { %10917 = vst [vmem:[#allocation49_spill] sm:$0xff] %v8357_v45  ;;  %v4511_v22 = vmul.f32 %v8354_v59, %v8203_v25  ;;  %v4510_v55 = vmul.f32 %v8354_v59, %v8166_v56 }
 0x4f3   : > { %v8349_v7 = vsel %vm673_vm1, %v3020_v2, %v3021_v37  ;;  %v8352_v52 = vsel %vm673_vm1, %v3021_v37, 0.0  ;;  %10919 = vst [vmem:[#allocation90_spill] sm:$0xff] %v8366_v30  ;;  %v4512_v37 = vmul.f32 %v8354_v59, %v8206_v62  ;;  %v8408_v62 = vsel %vm1160_vm3, %v10923_v6, %v3558_v21 }
 0x4f4   : > { %v8361_v39 = vmul.f32 %v8044_v58, %v8349_v7  ;;  %v3190_v24 = vmul.f32 %v8044_v58, %v8352_v52  ;;  %v8370_v2 = vmul.f32 %v8050_v49, %v8349_v7  ;;  %v3425_v32 = vmul.f32 %v8050_v49, %v8352_v52  ;;  %10921 = vst [vmem:[#allocation98_spill] sm:$0xff] %v8378_v8 }
 0x4f5   : > { %10922 = vst [vmem:[#allocation36_spill] sm:$0xff] %v8384_v1  ;;  %v8395_v34 = vmul.f32 %v8071_v4, %v8352_v52  ;;  %v8399_v47 = vmul.f32 %v8079_v10, %v8352_v52  ;;  %v4603_v8 = vrot.slane %v4511_v22, 2  ;;  %v4605_v45 = vrot.slane %v4512_v37, 2 }
 0x4f6   : > { %10918 = vst [vmem:[#allocation87_spill] sm:$0xff] %v8361_v39  ;;  %v10393_v46 = vrot.slane %v8361_v39, 1  ;;  %v3288_v18 = vrot.slane %v3190_v24, 1  ;;  %v2904_v54 = vpop.f32.mrf.mxu2  ;;  %v3045_v24 = vrot.slane %v8366_v30, 7  ;;  %v3523_v63 = vrot.slane %v3425_v32, 2  ;;  %v2952_v23 = vpop.f32.mrf.mxu3 }
 0x4f7   : > { %10920 = vst [vmem:[#allocation40_spill] sm:$0xff] %v8370_v2  ;;  %v3152_v61 = vmul.f32 %v8038_v9, %v8349_v7  ;;  %v4171_v32 = vadd.f32 %v8265_v41, %v3927_v29  ;;  %v8427_v19 = vmul.f32 %v8182_v15, %v8352_v52  ;;  %v10927_v37 = vrot.slane %v8370_v2, 2 }
 0x4f8   : > { %v3289_v60 = vsel %vm927_vm2, %v10393_v46, %v3288_v18  ;;  %10924 = vst [vmem:[#allocation15_spill] sm:$0xff] %v8408_v62  ;;  %v8415_v39 = vsel %vm673_vm1, %v3044_v0, %v3045_v24  ;;  %v8418_v18 = vsel %vm673_vm1, %v3045_v24, 0.0  ;;  %v4606_v35 = vsel %vm1160_vm3, %v4603_v8, %v4605_v45 }
 0x4f9   : > { %10925 = vst [vmem:[#allocation107_spill] sm:$0xff] %v8415_v39  ;;  %v8421_v22 = vadd.f32 %v3289_v60, %v3152_v61  ;;  %v8432_v0 = vsel %vm1160_vm3, %v10927_v37, %v3523_v63  ;;  %v4366_v24 = vrot.slane %v4274_v38, 1  ;;  %v4602_v30 = vrot.slane %v4510_v55, 2 }
 0x4fa   : > { %10926 = vst [vmem:[#allocation105_spill] sm:$0xff] %v8418_v18  ;;  %v3168_v61 = vmul.f32 %v8038_v9, %v8415_v39  ;;  %v8439_v41 = vmul.f32 %v8044_v58, %v8415_v39  ;;  %v3214_v29 = vmul.f32 %v8044_v58, %v8418_v18  ;;  %v4711_v60 = vadd.f32 %v4606_v35, %v4475_v44 }
 0x4fb   : > { %v8445_v63 = vmul.f32 %v8050_v49, %v8415_v39  ;;  %v3449_v38 = vmul.f32 %v8050_v49, %v8418_v18  ;;  %v4238_v45 = vadd.f32 %v8269_v12, %v4171_v32  ;;  %v4368_v55 = vsel %vm927_vm2, %v4366_v24, %v4367_v28 }
 0x4fc   : > { %10928 = vst [vmem:[#allocation101_spill] sm:$0xff] %v8439_v41  ;;  %v8453_v37 = vmul.f32 %v8071_v4, %v8418_v18  ;;  %v8457_v46 = vmul.f32 %v8079_v10, %v8418_v18  ;;  %v4744_v44 = vadd.f32 %v8234_v26, %v4711_v60  ;;  %v8461_v35 = vadd.f32 %v2904_v54, %v8042_v27 }
 0x4fd   : > { %10929 = vst [vmem:[#allocation35_spill] sm:$0xff] %v8445_v63  ;;  %v8465_v21 = vmul.f32 %v8182_v15, %v8418_v18  ;;  %v4474_v12 = vadd.f32 %v4368_v55, %v4238_v45  ;;  %v8468_v28 = vadd.f32 %v2952_v23, %v8042_v27  ;;  %v4604_v60 = vsel %vm1160_vm3, %v4602_v30, %v4603_v8 }
 0x4fe   : > { %v2907_v57 = vpop.f32.mrf.mxu2  ;;  %10930 = vst [vmem:[#allocation115_spill] sm:$0xff] %v8453_v37  ;;  %4809 = vrot.lane.b32.xlu2 %v4744_v44, %s5462_s15  ;;  %v3023_v54 = vrot.slane %v8461_v35, 7  ;;  %v10936_v6 = vrot.slane %v8085_v14, 1  ;;  %v10937_v1 = vrot.slane %v8067_v48, 1  ;;  %v3328_v23 = vrot.slane %v3214_v29, 1  ;;  %v2955_v24 = vpop.f32.mrf.mxu3 }
 0x4ff   : > { %10931 = vst [vmem:[#allocation113_spill] sm:$0xff] %v8457_v46  ;;  %v8471_v32 = vadd.f32 %v2907_v57, %v8042_v27  ;;  %v4710_v55 = vadd.f32 %v4604_v60, %v4474_v12  ;;  %v3047_v57 = vrot.slane %v8468_v28, 7  ;;  %v3563_v44 = vrot.slane %v3449_v38, 2 }
 0x500   : > { %10932 = vst [vmem:[#allocation25_spill] sm:$0xff] %v8461_v35  ;;  %v3277_v45 = vsel %vm927_vm2, %v10937_v1, %v10936_v6  ;;  %v8489_v48 = vsel %vm673_vm1, 0.0, %v3023_v54  ;;  %v8506_v60 = vadd.f32 %v2955_v24, %v8042_v27  ;;  %v10944_v30 = vrot.slane %v8101_v31, 2 }
 0x501   : > { %10933 = vst [vmem:[#allocation19_spill] sm:$0xff] %v8465_v21  ;;  %v3024_v62 = vrot.slane %v8471_v32, 7  ;;  %v4743_v14 = vadd.f32 %v8234_v26, %v4710_v55  ;;  %v3382_v6 = vadd.f32 %v3277_v45, %v8092_v17  ;;  %v8496_v29 = vsel %vm673_vm1, 0.0, %v3047_v57 }
 0x502   : > { %10934 = vst [vmem:[#allocation26_spill] sm:$0xff] %v8468_v28  ;;  %v3723_v45 = vmul.f32 %v8071_v4, %v8203_v25  ;;  %v10942_v55 = vrot.slane %v8439_v41, 1  ;;  %v10945_v18 = vrot.slane %v8074_v11, 2  ;;  %v3048_v31 = vrot.slane %v8506_v60, 7 }
 0x503   : > { %10935 = vst [vmem:[#allocation28_spill] sm:$0xff] %v8471_v32  ;;  %v8492_v1 = vsel %vm673_vm1, %v3023_v54, %v3024_v62  ;;  %v8499_v12 = vsel %vm673_vm1, %v3024_v62, 0.0  ;;  %4807 = vrot.lane.b32.xlu0 %v4743_v14, %s5462_s15  ;;  %v8524_v14 = vmul.f32 %v8044_v58, %v8489_v48  ;;  %v8534_v32 = vmul.f32 %v8044_v58, %v8496_v29 }
 0x504   : > { %10938 = vst [vmem:[#allocation23_spill] sm:$0xff] %v8496_v29  ;;  %v8503_v38 = vmul.f32 %v8044_v58, %v8492_v1  ;;  %v3193_v54 = vmul.f32 %v8044_v58, %v8499_v12  ;;  %v8513_v17 = vmul.f32 %v8050_v49, %v8492_v1  ;;  %v3428_v62 = vmul.f32 %v8050_v49, %v8499_v12 }
 0x505   : > { %10940 = vst [vmem:[#allocation110_spill] sm:$0xff] %v8506_v60  ;;  %v3329_v24 = vsel %vm927_vm2, %v10942_v55, %v3328_v23  ;;  %v3512_v28 = vsel %vm1160_vm3, %v10945_v18, %v10944_v30  ;;  %v3653_v23 = vmul.f32 %v8064_v42, %v8166_v56  ;;  %v3722_v55 = vmul.f32 %v8071_v4, %v8166_v56 }
 0x506   : > { %10939 = vst [vmem:[#allocation45_spill] sm:$0xff] %v8503_v38  ;;  %v3293_v35 = vrot.slane %v3193_v54, 1  ;;  %v8542_v8 = vmul.f32 %v8071_v4, %v8499_v12  ;;  %v8546_v11 = vmul.f32 %v8079_v10, %v8499_v12  ;;  %v3617_v18 = vadd.f32 %v3512_v28, %v3382_v6  ;;  %v2910_v37 = vpop.f32.mrf.mxu2  ;;  %v2958_v54 = vpop.f32.mrf.mxu3 }
 0x507   : > { %10941 = vst [vmem:[#allocation24_spill] sm:$0xff] %v8513_v17  ;;  %v8549_v30 = vadd.f32 %v3329_v24, %v3168_v61  ;;  %v3528_v41 = vrot.slane %v3428_v62, 2  ;;  %v3821_v46 = vrot.slane %v3723_v45, 1  ;;  %v10948_v21 = vrot.slane %v8445_v63, 2 }
 0x508   : > { %10943 = vst [vmem:[#allocation46_spill] sm:$0xff] %v8524_v14  ;;  %v3154_v39 = vmul.f32 %v8038_v9, %v8492_v1  ;;  %v10950_v60 = vrot.slane %v8503_v38, 1  ;;  %v8565_v6 = vsel %vm673_vm1, %v3047_v57, %v3048_v31  ;;  %v8568_v62 = vsel %vm673_vm1, %v3048_v31, 0.0 }
 0x509   : > { %10946 = vst [vmem:[#allocation30_spill] sm:$0xff] %v8534_v32  ;;  %v8555_v29 = vsel %vm1160_vm3, %v10948_v21, %v3563_v44  ;;  %v3820_v45 = vrot.slane %v3722_v55, 1  ;;  %v8574_v24 = vmul.f32 %v8182_v15, %v8499_v12  ;;  %v3685_v5 = vadd.f32 %v3653_v23, %v3617_v18 }
 0x50a   : > { %10947 = vst [vmem:[#allocation41_spill] sm:$0xff] %v8549_v30  ;;  %v3294_v61 = vsel %vm927_vm2, %v10950_v60, %v3293_v35  ;;  %v10954_v60 = vrot.slane %v8513_v17, 2  ;;  %v3966_v55 = vmul.f32 %v8079_v10, %v8166_v56  ;;  %v8588_v28 = vmul.f32 %v8038_v9, %v8565_v6 }
 0x50b   : > { %10949 = vst [vmem:[#allocation39_spill] sm:$0xff] %v8555_v29  ;;  %v8576_v35 = vadd.f32 %v3294_v61, %v3154_v39  ;;  %v3822_v31 = vsel %vm927_vm2, %v3820_v45, %v3821_v46  ;;  %v8592_v23 = vmul.f32 %v8044_v58, %v8565_v6  ;;  %v8596_v39 = vmul.f32 %v8044_v58, %v8568_v62 }
 0x50c   : > { %10951 = vst [vmem:[#allocation119_spill] sm:$0xff] %v8565_v6  ;;  %v8581_v57 = vsel %vm1160_vm3, %v10954_v60, %v3528_v41  ;;  %v8600_v41 = vmul.f32 %v8050_v49, %v8565_v6  ;;  %v8604_v18 = vmul.f32 %v8050_v49, %v8568_v62  ;;  %v8608_v61 = vmul.f32 %v8071_v4, %v8568_v62 }
 0x50d   : > { %10952 = vst [vmem:[#allocation42_spill] sm:$0xff] %v8568_v62  ;;  %v8612_v45 = vmul.f32 %v8079_v10, %v8568_v62  ;;  %v3967_v60 = vmul.f32 %v8079_v10, %v8203_v25  ;;  %v8618_v44 = vmul.f32 %v8182_v15, %v8568_v62  ;;  %v3929_v21 = vadd.f32 %v3822_v31, %v3685_v5 }
 0x50e   : > { %10953 = vst [vmem:[#allocation116_spill] sm:$0xff] %v8576_v35  ;;  %v4277_v32 = vmul.f32 %v8182_v15, %v8316_v43  ;;  %v4278_v63 = vmul.f32 %v8182_v15, %v8349_v7  ;;  %v4064_v29 = vrot.slane %v3966_v55, 2  ;;  %v4514_v6 = vmul.f32 %v8354_v59, %v8349_v7  ;;  %v2913_v38 = vpop.f32.mrf.mxu2 }
 0x50f   : > { %10955 = vst [vmem:[#allocation21_spill] sm:$0xff] %v8581_v57  ;;  %v4065_v30 = vrot.slane %v3967_v60, 2  ;;  %v3654_v57 = vmul.f32 %v8064_v42, %v8203_v25  ;;  %v4209_v62 = vmul.f32 %v8247_v51, %v8316_v43  ;;  %v10961_v31 = vrot.slane %v8251_v13, 1 }
 0x510   : > { %10956 = vst [vmem:[#allocation112_spill] sm:$0xff] %v8592_v23  ;;  %v4372_v5 = vrot.slane %v4278_v63, 1  ;;  %v4371_v55 = vrot.slane %v4277_v32, 1  ;;  %v4513_v60 = vmul.f32 %v8354_v59, %v8316_v43  ;;  %v4608_v2 = vrot.slane %v4514_v6, 2 }
 0x511   : > { %10957 = vst [vmem:[#allocation118_spill] sm:$0xff] %v8600_v41  ;;  %v4066_v17 = vsel %vm1160_vm3, %v4064_v29, %v4065_v30  ;;  %v3686_v14 = vadd.f32 %v3654_v57, %v8174_v33  ;;  %v4210_v35 = vmul.f32 %v8247_v51, %v8349_v7  ;;  %v4374_v63 = vrot.slane %v8427_v19, 1  ;;  %v2961_v19 = vpop.f32.mrf.mxu3 }
 0x512   : > { %10958 = vst [vmem:[#allocation117_spill] sm:$0xff] %v8608_v61  ;;  %v4173_v25 = vadd.f32 %v4066_v17, %v3929_v21  ;;  %v4373_v13 = vsel %vm927_vm2, %v4371_v55, %v4372_v5  ;;  %v8645_v32 = vadd.f32 %v2910_v37, %v8042_v27  ;;  %v10963_v33 = vrot.slane %v8255_v50, 2 }
 0x513   : > { %10959 = vst [vmem:[#allocation22_spill] sm:$0xff] %v8612_v45  ;;  %v8651_v6 = vadd.f32 %v2958_v54, %v8042_v27  ;;  %v8654_v21 = vadd.f32 %v2913_v38, %v8042_v27  ;;  %v4607_v57 = vrot.slane %v4513_v60, 2  ;;  %v4375_v37 = vsel %vm927_vm2, %v4372_v5, %v4374_v63 }
 0x514   : > { %10960 = vst [vmem:[#allocation43_spill] sm:$0xff] %v8618_v44  ;;  %v3824_v44 = vsel %vm927_vm2, %v3821_v46, %v10961_v31  ;;  %v4515_v46 = vmul.f32 %v8354_v59, %v8352_v52  ;;  %v4240_v29 = vadd.f32 %v4209_v62, %v4173_v25  ;;  %v4068_v17 = vsel %vm1160_vm3, %v4065_v30, %v10963_v33 }
 0x515   : > { %v3930_v16 = vadd.f32 %v3824_v44, %v3686_v14  ;;  %10962 = vst [vmem:[#allocation94_spill] sm:$0xff] %v8645_v32  ;;  %v3026_v52 = vrot.slane %v8645_v32, 7  ;;  %v3050_v62 = vrot.slane %v8651_v6, 7  ;;  %v3027_v50 = vrot.slane %v8654_v21, 7 }
 0x516   : > { %10964 = vst [vmem:[#allocation89_spill] sm:$0xff] %v8651_v6  ;;  %v4610_v44 = vrot.slane %v4515_v46, 2  ;;  %v4476_v31 = vadd.f32 %v4373_v13, %v4240_v29  ;;  %v3333_v30 = vrot.slane %v8596_v39, 1  ;;  %v4609_v54 = vsel %vm1160_vm3, %v4607_v57, %v4608_v2 }
 0x517   : > { %10965 = vst [vmem:[#allocation37_spill] sm:$0xff] %v8654_v21  ;;  %v4174_v14 = vadd.f32 %v4068_v17, %v3930_v16  ;;  %v8663_v38 = vadd.f32 %v2961_v19, %v8042_v27  ;;  %v10418_v16 = vrot.slane %v8600_v41, 2  ;;  %v3568_v60 = vrot.slane %v8604_v18, 2 }
 0x518   : > { %v4712_v25 = vadd.f32 %v4609_v54, %v4476_v31  ;;  %v8668_v13 = vsel %vm673_vm1, %v3026_v52, %v3027_v50  ;;  %v4611_v63 = vsel %vm1160_vm3, %v4608_v2, %v4610_v44  ;;  %v8672_v46 = vsel %vm673_vm1, 0.0, %v3026_v52 }
 0x519   : > { %v4241_v55 = vadd.f32 %v4210_v35, %v4174_v14  ;;  %10966 = vst [vmem:[#allocation38_spill] sm:$0xff] %v8663_v38  ;;  %v8675_v39 = vsel %vm673_vm1, %v3027_v50, 0.0  ;;  %v8679_v29 = vsel %vm673_vm1, 0.0, %v3050_v62  ;;  %v8683_v18 = vmul.f32 %v8044_v58, %v8668_v13 }
 0x51a   : > { %v4745_v35 = vadd.f32 %v8234_v26, %v4712_v25  ;;  %10967 = vst [vmem:[#allocation52_spill] sm:$0xff] %v8679_v29  ;;  %v3196_v33 = vmul.f32 %v8044_v58, %v8675_v39  ;;  %v8689_v2 = vmul.f32 %v8050_v49, %v8668_v13  ;;  %v3431_v19 = vmul.f32 %v8050_v49, %v8675_v39 }
 0x51b   : > { %v4477_v5 = vadd.f32 %v4375_v37, %v4241_v55  ;;  %v3051_v57 = vrot.slane %v8663_v38, 7  ;;  %v10968_v14 = vrot.slane %v8592_v23, 1  ;;  %v8700_v52 = vmul.f32 %v8044_v58, %v8672_v46 }
 0x51c   : > { %4811 = vrot.lane.b32.xlu1 %v4745_v35, %s5462_s15  ;;  %v10420_v31 = vrot.slane %v8683_v18, 1  ;;  %v3298_v37 = vrot.slane %v3196_v33, 1  ;;  %v8707_v55 = vmul.f32 %v8044_v58, %v8679_v29  ;;  %v8717_v35 = vmul.f32 %v8079_v10, %v8675_v39 }
 0x51d   : > { %v4713_v17 = vadd.f32 %v4611_v63, %v4477_v5  ;;  %v3334_v44 = vsel %vm927_vm2, %v10968_v14, %v3333_v30  ;;  %v8711_v30 = vmul.f32 %v8071_v4, %v8675_v39  ;;  %v10419_v5 = vrot.slane %v8689_v2, 2 }
 0x51e   : > { %10969 = vst [vmem:[#allocation95_spill] sm:$0xff] %v8707_v55  ;;  %v3533_v63 = vrot.slane %v3431_v19, 2  ;;  %v8720_v33 = vadd.f32 %v3334_v44, %v8588_v28  ;;  %v3299_v14 = vsel %vm927_vm2, %v10420_v31, %v3298_v37  ;;  %v8732_v19 = vsel %vm673_vm1, %v3050_v62, %v3051_v57 }
 0x51f   : > { %v4746_v54 = vadd.f32 %v8234_v26, %v4713_v17  ;;  %v8725_v17 = vsel %vm1160_vm3, %v10418_v16, %v3568_v60  ;;  %10972 = vst [vmem:[#allocation120_spill] sm:$0xff] %v8732_v19  ;;  %v3156_v28 = vmul.f32 %v8038_v9, %v8668_v13  ;;  %v8738_v44 = vsel %vm673_vm1, %v3051_v57, 0.0 }
 0x520   : > { %10970 = vst [vmem:[#allocation103_spill] sm:$0xff] %v8720_v33  ;;  %v3620_v60 = vadd.f32 %v8327_v40, %v8292_v53  ;;  %v8746_v37 = vmul.f32 %v8182_v15, %v8675_v39  ;;  %v3656_v62 = vmul.f32 %v8064_v42, %v8349_v7  ;;  %v8755_v57 = vsel %vm1160_vm3, %v10419_v5, %v3533_v63  ;;  %v2964_v5 = vpop.f32.mrf.mxu3 }
 0x521   : > { %10971 = vst [vmem:[#allocation102_spill] sm:$0xff] %v8725_v17  ;;  %4813 = vrot.lane.b32.xlu0 %v4746_v54, %s5462_s15  ;;  %v8750_v50 = vadd.f32 %v3299_v14, %v3156_v28  ;;  %v8760_v53 = vmul.f32 %v8038_v9, %v8732_v19  ;;  %v8764_v54 = vmul.f32 %v8044_v58, %v8732_v19  ;;  %v2916_v28 = vpop.f32.mrf.mxu2  ;;  %v4379_v17 = vrot.slane %v8574_v24, 1 }
 0x522   : > { %10973 = vst [vmem:[#allocation59_spill] sm:$0xff] %v8738_v44  ;;  %v8768_v25 = vmul.f32 %v8044_v58, %v8738_v44  ;;  %v8772_v14 = vmul.f32 %v8050_v49, %v8732_v19  ;;  %v3726_v63 = vmul.f32 %v8071_v4, %v8349_v7  ;;  %v8778_v31 = vmul.f32 %v8050_v49, %v8738_v44 }
 0x523   : > { %10974 = vst [vmem:[#allocation12_spill] sm:$0xff] %v8764_v54  ;;  %v8782_v40 = vmul.f32 %v8071_v4, %v8738_v44  ;;  %v3688_v16 = vadd.f32 %v3656_v62, %v3620_v60  ;;  %v3970_v38 = vmul.f32 %v8079_v10, %v8349_v7  ;;  %v8788_v6 = vmul.f32 %v8079_v10, %v8738_v44 }
 0x524   : > { %10975 = vst [vmem:[#allocation53_spill] sm:$0xff] %v8772_v14  ;;  %v3826_v21 = vrot.slane %v3726_v63, 1  ;;  %v4281_v32 = vmul.f32 %v8182_v15, %v8492_v1  ;;  %v8795_v41 = vmul.f32 %v8354_v59, %v8492_v1  ;;  %v4518_v60 = vmul.f32 %v8354_v59, %v8499_v12 }
 0x525   : > { %10976 = vst [vmem:[#allocation13_spill] sm:$0xff] %v8782_v40  ;;  %v4070_v33 = vrot.slane %v3970_v38, 2  ;;  %v3149_v7 = vmul.f32 %v8038_v9, %v8166_v56  ;;  %v10978_v62 = vrot.slane %v8395_v34, 1  ;;  %v10979_v55 = vrot.slane %v8212_v3, 1 }
 0x526   : > { %10977 = vst [vmem:[#allocation16_spill] sm:$0xff] %v8788_v6  ;;  %v4377_v23 = vrot.slane %v4281_v32, 1  ;;  %v10980_v24 = vrot.slane %v8197_v36, 1  ;;  %v3420_v29 = vmul.f32 %v8050_v49, %v8166_v56  ;;  %v10981_v61 = vrot.slane %v8399_v47, 2 }
 0x527   : > { %v3829_v63 = vsel %vm927_vm2, %v3826_v21, %v10978_v62  ;;  %v4212_v34 = vmul.f32 %v8247_v51, %v8492_v1  ;;  %v4613_v32 = vrot.slane %v8795_v41, 2  ;;  %v4615_v3 = vrot.slane %v4518_v60, 2 }
 0x528   : > { %v3282_v38 = vsel %vm927_vm2, %v10980_v24, %v10979_v55  ;;  %v3932_v12 = vadd.f32 %v3829_v63, %v3688_v16  ;;  %v4073_v19 = vsel %vm1160_vm3, %v4070_v33, %v10981_v61  ;;  %v3515_v36 = vrot.slane %v3420_v29, 2 }
 0x529   : > { %v3384_v62 = vadd.f32 %v3282_v38, %v3149_v7  ;;  %v3338_v55 = vrot.slane %v8768_v25, 1  ;;  %v3655_v56 = vmul.f32 %v8064_v42, %v8316_v43  ;;  %v3725_v16 = vmul.f32 %v8071_v4, %v8316_v43 }
 0x52a   : > { %v4176_v24 = vadd.f32 %v4073_v19, %v3932_v12  ;;  %v4380_v61 = vsel %vm927_vm2, %v4377_v23, %v4379_v17  ;;  %v10982_v63 = vrot.slane %v8238_v20, 2  ;;  %v3969_v29 = vmul.f32 %v8079_v10, %v8316_v43  ;;  %v2919_v17 = vpop.f32.mrf.mxu2 }
 0x52b   : > { %v3573_v25 = vrot.slane %v8778_v31, 2  ;;  %v3825_v7 = vrot.slane %v3725_v16, 1  ;;  %v4616_v38 = vsel %vm1160_vm3, %v4613_v32, %v4615_v3  ;;  %v4280_v12 = vmul.f32 %v8182_v15, %v8489_v48 }
 0x52c   : > { %v3517_v41 = vsel %vm1160_vm3, %v3515_v36, %v10982_v63  ;;  %v4243_v19 = vadd.f32 %v4212_v34, %v4176_v24  ;;  %v8835_v47 = vadd.f32 %v2916_v28, %v8042_v27  ;;  %v8838_v20 = vadd.f32 %v2964_v5, %v8042_v27  ;;  %v2967_v36 = vpop.f32.mrf.mxu3 }
 0x52d   : > { %v3619_v60 = vadd.f32 %v3517_v41, %v3384_v62  ;;  %v3827_v31 = vsel %vm927_vm2, %v3825_v7, %v3826_v21  ;;  %v4211_v34 = vmul.f32 %v8247_v51, %v8489_v48  ;;  %v4069_v62 = vrot.slane %v3969_v29, 2 }
 0x52e   : > { %10983 = vst [vmem:[#allocation20_spill] sm:$0xff] %v8835_v47  ;;  %v4479_v63 = vadd.f32 %v4380_v61, %v4243_v19  ;;  %v4516_v3 = vmul.f32 %v8354_v59, %v8489_v48  ;;  %v3029_v24 = vrot.slane %v8835_v47, 7  ;;  %v3053_v28 = vrot.slane %v8838_v20, 7 }
 0x52f   : > { %10984 = vst [vmem:[#allocation63_spill] sm:$0xff] %v8838_v20  ;;  %v3687_v45 = vadd.f32 %v3655_v56, %v3619_v60  ;;  %v8848_v41 = vadd.f32 %v2919_v17, %v8042_v27  ;;  %v8851_v56 = vadd.f32 %v2967_v36, %v8042_v27  ;;  %v8856_v61 = vmul.f32 %v8182_v15, %v8738_v44 }
 0x530   : > { %v4715_v16 = vadd.f32 %v4616_v38, %v4479_v63  ;;  %v4071_v29 = vsel %vm1160_vm3, %v4069_v62, %v4070_v33  ;;  %v4376_v19 = vrot.slane %v4280_v12, 1  ;;  %v10988_v60 = vrot.slane %v8764_v54, 1 }
 0x531   : > { %v3931_v5 = vadd.f32 %v3827_v31, %v3687_v45  ;;  %10985 = vst [vmem:[#allocation27_spill] sm:$0xff] %v8848_v41  ;;  %v10989_v36 = vrot.slane %v8772_v14, 2  ;;  %v4612_v21 = vrot.slane %v4516_v3, 2  ;;  %v3030_v33 = vrot.slane %v8848_v41, 7  ;;  %v11007_v14 = vld [vmem:[#allocation99_spill] sm:$0xff] }
 0x532   : > { %10986 = vst [vmem:[#allocation67_spill] sm:$0xff] %v8851_v56  ;;  %v3339_v7 = vsel %vm927_vm2, %v10988_v60, %v3338_v55  ;;  %v4748_v38 = vadd.f32 %v8234_v26, %v4715_v16  ;;  %v4378_v31 = vsel %vm927_vm2, %v4376_v19, %v4377_v23  ;;  %v8873_v55 = vsel %vm673_vm1, 0.0, %v3029_v24 }
 0x533   : > { %10987 = vst [vmem:[#allocation29_spill] sm:$0xff] %v8856_v61  ;;  %v4175_v17 = vadd.f32 %v4071_v29, %v3931_v5  ;;  %v8867_v63 = vsel %vm1160_vm3, %v10989_v36, %v3573_v25  ;;  %v8876_v62 = vsel %vm673_vm1, 0.0, %v3053_v28  ;;  %v3054_v16 = vrot.slane %v8851_v56, 7 }
 0x534   : > { %10990 = vst [vmem:[#allocation44_spill] sm:$0xff] %v8867_v63  ;;  %4817 = vrot.lane.b32.xlu1 %v4748_v38, %s5462_s15  ;;  %v8880_v5 = vadd.f32 %v3339_v7, %v8760_v53  ;;  %v4614_v25 = vsel %vm1160_vm3, %v4612_v21, %v4613_v32  ;;  %v8884_v23 = vsel %vm673_vm1, %v3029_v24, %v3030_v33  ;;  %v8887_v3 = vsel %vm673_vm1, %v3030_v33, 0.0 }
 0x535   : > { %v4242_v12 = vadd.f32 %v4211_v34, %v4175_v17  ;;  %10991 = vst [vmem:[#allocation48_spill] sm:$0xff] %v8876_v62  ;;  %v8891_v29 = vmul.f32 %v8044_v58, %v8884_v23  ;;  %v3199_v19 = vmul.f32 %v8044_v58, %v8887_v3  ;;  %v3658_v53 = vmul.f32 %v8064_v42, %v8492_v1 }
 0x536   : > { %10992 = vst [vmem:[#allocation60_spill] sm:$0xff] %v8880_v5  ;;  %v8899_v32 = vmul.f32 %v8044_v58, %v8873_v55  ;;  %v8903_v24 = vmul.f32 %v8044_v58, %v8876_v62  ;;  %v8907_v21 = vmul.f32 %v8050_v49, %v8884_v23  ;;  %v3434_v60 = vmul.f32 %v8050_v49, %v8887_v3 }
 0x537   : > { %v4478_v34 = vadd.f32 %v4378_v31, %v4242_v12  ;;  %10993 = vst [vmem:[#allocation64_spill] sm:$0xff] %v8891_v29  ;;  %v10436_v38 = vrot.slane %v8891_v29, 1  ;;  %v3303_v17 = vrot.slane %v3199_v19, 1  ;;  %v8913_v36 = vsel %vm673_vm1, %v3053_v28, %v3054_v16 }
 0x538   : > { %10994 = vst [vmem:[#allocation76_spill] sm:$0xff] %v8899_v32  ;;  %v8917_v31 = vmul.f32 %v8071_v4, %v8887_v3  ;;  %v8921_v33 = vmul.f32 %v8079_v10, %v8887_v3  ;;  %v3622_v12 = vadd.f32 %v8432_v0, %v8421_v22  ;;  %v10439_v28 = vrot.slane %v8907_v21, 2 }
 0x539   : > { %10995 = vst [vmem:[#allocation84_spill] sm:$0xff] %v8903_v24  ;;  %v4714_v7 = vadd.f32 %v4614_v25, %v4478_v34  ;;  %v8927_v25 = vmul.f32 %v8071_v4, %v8492_v1  ;;  %v3538_v19 = vrot.slane %v3434_v60, 2  ;;  %v8933_v45 = vmul.f32 %v8079_v10, %v8492_v1 }
 0x53a   : > { %10996 = vst [vmem:[#allocation92_spill] sm:$0xff] %v8907_v21  ;;  %v3304_v56 = vsel %vm927_vm2, %v10436_v38, %v3303_v17  ;;  %v8939_v20 = vsel %vm673_vm1, %v3054_v16, 0.0  ;;  %v8943_v22 = vmul.f32 %v8044_v58, %v8913_v36  ;;  %v3690_v0 = vadd.f32 %v3658_v53, %v3622_v12  ;;  %v2970_v16 = vpop.f32.mrf.mxu3 }
 0x53b   : > { %10997 = vst [vmem:[#allocation97_spill] sm:$0xff] %v8913_v36  ;;  %v4747_v34 = vadd.f32 %v8234_v26, %v4714_v7  ;;  %v3158_v1 = vmul.f32 %v8038_v9, %v8884_v23  ;;  %v8952_v17 = vmul.f32 %v8182_v15, %v8887_v3  ;;  %v8958_v53 = vmul.f32 %v8038_v9, %v8913_v36 }
 0x53c   : > { %10998 = vst [vmem:[#allocation114_spill] sm:$0xff] %v8939_v20  ;;  %v3831_v12 = vrot.slane %v8927_v25, 1  ;;  %v8966_v7 = vsel %vm1160_vm3, %v10439_v28, %v3538_v19  ;;  %v8970_v41 = vmul.f32 %v8044_v58, %v8939_v20  ;;  %v4075_v38 = vrot.slane %v8933_v45, 2 }
 0x53d   : > { %10999 = vst [vmem:[#allocation121_spill] sm:$0xff] %v8943_v22  ;;  %4815 = vrot.lane.b32.xlu2 %v4747_v34, %s5462_s15  ;;  %v2922_v34 = vpop.f32.mrf.mxu2  ;;  %v8961_v60 = vadd.f32 %v3304_v56, %v3158_v1  ;;  %v8976_v25 = vmul.f32 %v8050_v49, %v8913_v36  ;;  %v11003_v56 = vrot.slane %v8542_v8, 1  ;;  %v4284_v19 = vmul.f32 %v8182_v15, %v8668_v13 }
 0x53e   : > { %11001 = vst [vmem:[#allocation17_spill] sm:$0xff] %v8966_v7  ;;  %v8985_v28 = vmul.f32 %v8050_v49, %v8939_v20  ;;  %v11004_v45 = vrot.slane %v8546_v11, 2  ;;  %v4214_v63 = vmul.f32 %v8247_v51, %v8668_v13  ;;  %v4384_v8 = vrot.slane %v8746_v37, 1 }
 0x53f   : > { %11000 = vst [vmem:[#allocation14_spill] sm:$0xff] %v8961_v60  ;;  %v3834_v1 = vsel %vm927_vm2, %v3831_v12, %v11003_v56  ;;  %v4382_v5 = vrot.slane %v4284_v19, 1  ;;  %v4520_v56 = vmul.f32 %v8354_v59, %v8668_v13  ;;  %v4521_v6 = vmul.f32 %v8354_v59, %v8675_v39 }
 0x540   : > { %11002 = vst [vmem:[#allocation33_spill] sm:$0xff] %v8976_v25  ;;  %v3934_v24 = vadd.f32 %v3834_v1, %v3690_v0  ;;  %v4078_v47 = vsel %vm1160_vm3, %v4075_v38, %v11004_v45  ;;  %v3151_v0 = vmul.f32 %v8038_v9, %v8316_v43  ;;  %v11005_v1 = vld [vmem:[#allocation87_spill] sm:$0xff]  ;;  %v11008_v45 = vrot.slane %v11007_v14, 1 }
 0x541   : > { %v11006_v11 = vrot.slane %v11005_v1, 1  ;;  %v3423_v19 = vmul.f32 %v8050_v49, %v8316_v43  ;;  %v9008_v37 = vmul.f32 %v8071_v4, %v8939_v20  ;;  %v4385_v62 = vsel %vm927_vm2, %v4382_v5, %v4384_v8 }
 0x542   : > { %v4178_v40 = vadd.f32 %v4078_v47, %v3934_v24  ;;  %v4618_v39 = vrot.slane %v4520_v56, 2  ;;  %v4620_v47 = vrot.slane %v4521_v6, 2  ;;  %v3728_v1 = vmul.f32 %v8071_v4, %v8489_v48  ;;  %v11011_v56 = vld [vmem:[#allocation40_spill] sm:$0xff] }
 0x543   : > { %v3287_v36 = vsel %vm927_vm2, %v11008_v45, %v11006_v11  ;;  %11009 = vst [vmem:[#allocation18_spill] sm:$0xff] %v9008_v37  ;;  %v3520_v44 = vrot.slane %v3423_v19, 2  ;;  %v3343_v14 = vrot.slane %v8970_v41, 1  ;;  %v9017_v43 = vmul.f32 %v8079_v10, %v8939_v20 }
 0x544   : > { %v4245_v24 = vadd.f32 %v4214_v63, %v4178_v40  ;;  %v3386_v54 = vadd.f32 %v3287_v36, %v3151_v0  ;;  %v3657_v45 = vmul.f32 %v8064_v42, %v8489_v48  ;;  %v11012_v6 = vrot.slane %v11011_v56, 2  ;;  %v2973_v56 = vpop.f32.mrf.mxu3 }
 0x545   : > { %11010 = vst [vmem:[#allocation34_spill] sm:$0xff] %v9017_v43  ;;  %v3830_v63 = vrot.slane %v3728_v1, 1  ;;  %v3972_v36 = vmul.f32 %v8079_v10, %v8489_v48  ;;  %v9028_v41 = vmul.f32 %v8182_v15, %v8939_v20  ;;  %v4621_v0 = vsel %vm1160_vm3, %v4618_v39, %v4620_v47  ;;  %v2925_v61 = vpop.f32.mrf.mxu2 }
 0x546   : > { %v4481_v8 = vadd.f32 %v4385_v62, %v4245_v24  ;;  %v3522_v40 = vsel %vm1160_vm3, %v3520_v44, %v11012_v6  ;;  %v9032_v11 = vadd.f32 %v2922_v34, %v8042_v27  ;;  %v4283_v44 = vmul.f32 %v8182_v15, %v8672_v46 }
 0x547   : > { %11013 = vst [vmem:[#allocation47_spill] sm:$0xff] %v9028_v41  ;;  %v3621_v19 = vadd.f32 %v3522_v40, %v3386_v54  ;;  %v3832_v24 = vsel %vm927_vm2, %v3830_v63, %v3831_v12  ;;  %v4519_v1 = vmul.f32 %v8354_v59, %v8672_v46  ;;  %v3578_v6 = vrot.slane %v8985_v28, 2 }
 0x548   : > { %11014 = vst [vmem:[#allocation50_spill] sm:$0xff] %v9032_v11  ;;  %v4717_v62 = vadd.f32 %v4621_v0, %v4481_v8  ;;  %v3032_v47 = vrot.slane %v9032_v11, 7  ;;  %v9042_v54 = vadd.f32 %v2970_v16, %v8042_v27  ;;  %v4074_v12 = vrot.slane %v3972_v36, 2 }
 0x549   : > { %v3689_v20 = vadd.f32 %v3657_v45, %v3621_v19  ;;  %v9047_v40 = vadd.f32 %v2925_v61, %v8042_v27  ;;  %v4213_v28 = vmul.f32 %v8247_v51, %v8672_v46  ;;  %v9053_v45 = vadd.f32 %v2973_v56, %v8042_v27 }
 0x54a   : > { %11015 = vst [vmem:[#allocation62_spill] sm:$0xff] %v9042_v54  ;;  %v4750_v8 = vadd.f32 %v8234_v26, %v4717_v62  ;;  %v4076_v16 = vsel %vm1160_vm3, %v4074_v12, %v4075_v38  ;;  %v4381_v19 = vrot.slane %v4283_v44, 1  ;;  %v4617_v34 = vrot.slane %v4519_v1, 2 }
 0x54b   : > { %11016 = vst [vmem:[#allocation68_spill] sm:$0xff] %v9047_v40  ;;  %v3933_v0 = vadd.f32 %v3832_v24, %v3689_v20  ;;  %v3033_v36 = vrot.slane %v9047_v40, 7  ;;  %v11018_v61 = vrot.slane %v8943_v22, 1  ;;  %v9062_v20 = vsel %vm673_vm1, 0.0, %v3032_v47  ;;  %v11026_v40 = vld [vmem:[#allocation46_spill] sm:$0xff] }
 0x54c   : > { %11017 = vst [vmem:[#allocation79_spill] sm:$0xff] %v9053_v45  ;;  %4821 = vrot.lane.b32.xlu2 %v4750_v8, %s5462_s15  ;;  %v3056_v24 = vrot.slane %v9042_v54, 7  ;;  %v4383_v56 = vsel %vm927_vm2, %v4381_v19, %v4382_v5  ;;  %v4619_v8 = vsel %vm1160_vm3, %v4617_v34, %v4618_v39  ;;  %v9082_v5 = vmul.f32 %v8044_v58, %v9062_v20 }
 0x54d   : > { %v3344_v62 = vsel %vm927_vm2, %v11018_v61, %v3343_v14  ;;  %v4177_v63 = vadd.f32 %v4076_v16, %v3933_v0  ;;  %v9068_v38 = vsel %vm673_vm1, %v3032_v47, %v3033_v36  ;;  %v9071_v44 = vsel %vm673_vm1, %v3033_v36, 0.0 }
 0x54e   : > { %v9075_v14 = vmul.f32 %v8044_v58, %v9068_v38  ;;  %v3202_v12 = vmul.f32 %v8044_v58, %v9071_v44  ;;  %v3057_v0 = vrot.slane %v9053_v45, 7  ;;  %11020 = vst [vmem:[#allocation96_spill] sm:$0xff] %v9082_v5  ;;  %v9086_v39 = vmul.f32 %v8050_v49, %v9068_v38  ;;  %v11024_v45 = vld [vmem:[#allocation45_spill] sm:$0xff] }
 0x54f   : > { %v4244_v1 = vadd.f32 %v4213_v28, %v4177_v63  ;;  %v3437_v47 = vmul.f32 %v8050_v49, %v9071_v44  ;;  %v3153_v34 = vmul.f32 %v8038_v9, %v8489_v48  ;;  %v9093_v28 = vsel %vm673_vm1, 0.0, %v3056_v24 }
 0x550   : > { %11019 = vst [vmem:[#allocation86_spill] sm:$0xff] %v9075_v14  ;;  %v3308_v19 = vrot.slane %v3202_v12, 1  ;;  %v9098_v36 = vmul.f32 %v8071_v4, %v9071_v44  ;;  %v9102_v61 = vmul.f32 %v8079_v10, %v9071_v44  ;;  %v11025_v54 = vrot.slane %v11024_v45, 1 }
 0x551   : > { %11021 = vst [vmem:[#allocation32_spill] sm:$0xff] %v9086_v39  ;;  %v4480_v63 = vadd.f32 %v4383_v56, %v4244_v1  ;;  %v11027_v11 = vrot.slane %v11026_v40, 1  ;;  %v3426_v1 = vmul.f32 %v8050_v49, %v8489_v48  ;;  %v10458_v12 = vrot.slane %v9086_v39, 2 }
 0x552   : > { %11022 = vst [vmem:[#allocation106_spill] sm:$0xff] %v9098_v36  ;;  %v3543_v16 = vrot.slane %v3437_v47, 2  ;;  %v9113_v22 = vsel %vm673_vm1, %v3056_v24, %v3057_v0  ;;  %v9116_v37 = vadd.f32 %v3344_v62, %v8958_v53  ;;  %v11030_v41 = vrot.slane %v8976_v25, 2 }
 0x553   : > { %11023 = vst [vmem:[#allocation111_spill] sm:$0xff] %v9102_v61  ;;  %v3292_v56 = vsel %vm927_vm2, %v11027_v11, %v11025_v54  ;;  %v4716_v43 = vadd.f32 %v4619_v8, %v4480_v63  ;;  %v9125_v11 = vmul.f32 %v8044_v58, %v9093_v28  ;;  %v11032_v48 = vrot.slane %v9075_v14, 1  ;;  %v11040_v61 = vld [vmem:[#allocation21_spill] sm:$0xff] }
 0x554   : > { %11028 = vst [vmem:[#allocation87_spill] sm:$0xff] %v9113_v22  ;;  %v9121_v45 = vsel %vm1160_vm3, %v11030_v41, %v3578_v6  ;;  %v3160_v24 = vmul.f32 %v8038_v9, %v9068_v38  ;;  %v9134_v53 = vsel %vm673_vm1, %v3057_v0, 0.0  ;;  %v3388_v62 = vadd.f32 %v3292_v56, %v3153_v34 }
 0x555   : > { %11029 = vst [vmem:[#allocation99_spill] sm:$0xff] %v9116_v37  ;;  %v3309_v54 = vsel %vm927_vm2, %v11032_v48, %v3308_v19  ;;  %v4749_v40 = vadd.f32 %v8234_v26, %v4716_v43  ;;  %v9140_v8 = vmul.f32 %v8182_v15, %v9071_v44  ;;  %v9144_v47 = vmul.f32 %v8044_v58, %v9113_v22 }
 0x556   : > { %11031 = vst [vmem:[#allocation40_spill] sm:$0xff] %v9121_v45  ;;  %v9147_v43 = vadd.f32 %v3309_v54, %v3160_v24  ;;  %v9152_v0 = vsel %vm1160_vm3, %v10458_v12, %v3543_v16  ;;  %v3525_v63 = vrot.slane %v3426_v1, 2  ;;  %v9157_v19 = vmul.f32 %v8038_v9, %v9113_v22  ;;  %v11036_v24 = vld [vmem:[#allocation24_spill] sm:$0xff] }
 0x557   : > { %11033 = vst [vmem:[#allocation45_spill] sm:$0xff] %v9134_v53  ;;  %4819 = vrot.lane.b32.xlu0 %v4749_v40, %s5462_s15  ;;  %v9161_v56 = vmul.f32 %v8044_v58, %v9134_v53  ;;  %v3659_v48 = vmul.f32 %v8064_v42, %v8672_v46  ;;  %v3731_v54 = vmul.f32 %v8071_v4, %v8672_v46  ;;  %v2928_v40 = vpop.f32.mrf.mxu2  ;;  %v11037_v12 = vrot.slane %v11036_v24, 2 }
 0x558   : > { %11034 = vst [vmem:[#allocation46_spill] sm:$0xff] %v9147_v43  ;;  %v9169_v16 = vmul.f32 %v8050_v49, %v9113_v22  ;;  %v9173_v1 = vmul.f32 %v8050_v49, %v9134_v53  ;;  %v3732_v34 = vmul.f32 %v8071_v4, %v8668_v13  ;;  %v3346_v6 = vrot.slane %v9144_v47, 1 }
 0x559   : > { %11035 = vst [vmem:[#allocation122_spill] sm:$0xff] %v9152_v0  ;;  %v3527_v41 = vsel %vm1160_vm3, %v3525_v63, %v11037_v12  ;;  %v9183_v25 = vmul.f32 %v8071_v4, %v9134_v53  ;;  %v3975_v37 = vmul.f32 %v8079_v10, %v8672_v46  ;;  %v3835_v22 = vrot.slane %v3731_v54, 1 }
 0x55a   : > { %v3623_v45 = vadd.f32 %v3527_v41, %v3388_v62  ;;  %v3836_v0 = vrot.slane %v3732_v34, 1  ;;  %v3976_v24 = vmul.f32 %v8079_v10, %v8668_v13  ;;  %v4286_v12 = vmul.f32 %v8182_v15, %v8873_v55 }
 0x55b   : > { %v9193_v63 = vmul.f32 %v8079_v10, %v9134_v53  ;;  %v4079_v43 = vrot.slane %v3975_v37, 2  ;;  %v4287_v62 = vmul.f32 %v8182_v15, %v8884_v23  ;;  %v4522_v34 = vmul.f32 %v8354_v59, %v8873_v55 }
 0x55c   : > { %v3691_v47 = vadd.f32 %v3659_v48, %v3623_v45  ;;  %v3837_v41 = vsel %vm927_vm2, %v3835_v22, %v3836_v0  ;;  %v4080_v39 = vrot.slane %v3976_v24, 2  ;;  %v4523_v54 = vmul.f32 %v8354_v59, %v8884_v23  ;;  %v2976_v48 = vpop.f32.mrf.mxu3  ;;  %v11039_v24 = vld [vmem:[#allocation116_spill] sm:$0xff] }
 0x55d   : > { %v9204_v5 = vmul.f32 %v8182_v15, %v9134_v53  ;;  %v4215_v37 = vmul.f32 %v8247_v51, %v8873_v55  ;;  %v4387_v45 = vrot.slane %v4287_v62, 1  ;;  %v4386_v22 = vrot.slane %v4286_v12, 1 }
 0x55e   : > { %v3935_v14 = vadd.f32 %v3837_v41, %v3691_v47  ;;  %v4081_v21 = vsel %vm1160_vm3, %v4079_v43, %v4080_v39  ;;  %v3624_v36 = vadd.f32 %v11040_v61, %v11039_v24  ;;  %v3660_v32 = vmul.f32 %v8064_v42, %v8668_v13 }
 0x55f   : > { %11038 = vst [vmem:[#allocation24_spill] sm:$0xff] %v9204_v5  ;;  %v3348_v29 = vrot.slane %v9161_v56, 1  ;;  %v4623_v53 = vrot.slane %v4523_v54, 2  ;;  %v11041_v47 = vrot.slane %v8711_v30, 1  ;;  %v4388_v62 = vsel %vm927_vm2, %v4386_v22, %v4387_v45 }
 0x560   : > { %v4179_v7 = vadd.f32 %v4081_v21, %v3935_v14  ;;  %v4622_v5 = vrot.slane %v4522_v34, 2  ;;  %v3692_v60 = vadd.f32 %v3660_v32, %v3624_v36  ;;  %v4389_v43 = vrot.slane %v8952_v17, 1  ;;  %v2931_v14 = vpop.f32.mrf.mxu2 }
 0x561   : > { %v3839_v41 = vsel %vm927_vm2, %v3836_v0, %v11041_v47  ;;  %v4524_v61 = vmul.f32 %v8354_v59, %v8887_v3  ;;  %v9222_v13 = vadd.f32 %v2928_v40, %v8042_v27  ;;  %v9225_v21 = vadd.f32 %v2976_v48, %v8042_v27 }
 0x562   : > { %v4246_v12 = vadd.f32 %v4215_v37, %v4179_v7  ;;  %v3581_v30 = vrot.slane %v9169_v16, 2  ;;  %v3583_v0 = vrot.slane %v9173_v1, 2  ;;  %v3936_v56 = vadd.f32 %v3839_v41, %v3692_v60 }
 0x563   : > { %11042 = vst [vmem:[#allocation116_spill] sm:$0xff] %v9222_v13  ;;  %v4216_v32 = vmul.f32 %v8247_v51, %v8884_v23  ;;  %v4624_v7 = vsel %vm1160_vm3, %v4622_v5, %v4623_v53  ;;  %v11044_v3 = vrot.slane %v8717_v35, 2  ;;  %v3035_v40 = vrot.slane %v9222_v13, 7 }
 0x564   : > { %11043 = vst [vmem:[#allocation21_spill] sm:$0xff] %v9225_v21  ;;  %v4482_v17 = vadd.f32 %v4388_v62, %v4246_v12  ;;  %v3059_v54 = vrot.slane %v9225_v21, 7  ;;  %v3345_v16 = vrot.slane %v9125_v11, 1  ;;  %v9239_v1 = vadd.f32 %v2931_v14, %v8042_v27  ;;  %v2979_v62 = vpop.f32.mrf.mxu3 }
 0x565   : > { %v4083_v36 = vsel %vm1160_vm3, %v4080_v39, %v11044_v3  ;;  %v4390_v37 = vsel %vm927_vm2, %v4387_v45, %v4389_v43  ;;  %v4625_v48 = vrot.slane %v4524_v61, 2  ;;  %v3459_v5 = vmul.f32 %v8050_v49, %v9093_v28 }
 0x566   : > { %v4180_v34 = vadd.f32 %v4083_v36, %v3936_v56  ;;  %11045 = vst [vmem:[#allocation123_spill] sm:$0xff] %v9239_v1  ;;  %v4718_v60 = vadd.f32 %v4624_v7, %v4482_v17  ;;  %v9246_v22 = vsel %vm673_vm1, 0.0, %v3035_v40  ;;  %v3347_v24 = vsel %vm927_vm2, %v3345_v16, %v3346_v6 }
 0x567   : > { %v3349_v11 = vsel %vm927_vm2, %v3346_v6, %v3348_v29  ;;  %v3175_v45 = vmul.f32 %v8038_v9, %v9093_v28  ;;  %v9255_v43 = vsel %vm1160_vm3, %v3581_v30, %v3583_v0  ;;  %v9258_v61 = vsel %vm673_vm1, 0.0, %v3059_v54 }
 0x568   : > { %v4247_v39 = vadd.f32 %v4216_v32, %v4180_v34  ;;  %v4751_v41 = vadd.f32 %v8234_v26, %v4718_v60  ;;  %11046 = vst [vmem:[#allocation124_spill] sm:$0xff] %v9255_v43  ;;  %v3036_v14 = vrot.slane %v9239_v1, 7  ;;  %v4626_v29 = vsel %vm1160_vm3, %v4623_v53, %v4625_v48 }
 0x569   : > { %v9265_v6 = vmul.f32 %v8044_v58, %v9246_v22  ;;  %v3410_v56 = vadd.f32 %v3347_v24, %v3175_v45  ;;  %v3580_v32 = vrot.slane %v3459_v5, 2  ;;  %v9274_v3 = vadd.f32 %v2979_v62, %v8042_v27 }
 0x56a   : > { %v4483_v12 = vadd.f32 %v4390_v37, %v4247_v39  ;;  %4823 = vrot.lane.b32.xlu1 %v4751_v41, %s5462_s15  ;;  %v9268_v0 = vsel %vm673_vm1, %v3035_v40, %v3036_v14  ;;  %v9271_v7 = vsel %vm673_vm1, %v3036_v14, 0.0  ;;  %v3681_v36 = vmul.f32 %v8064_v42, %v9258_v61 }
 0x56b   : > { %11047 = vst [vmem:[#allocation125_spill] sm:$0xff] %v9274_v3  ;;  %v9280_v53 = vmul.f32 %v8071_v4, %v9258_v61  ;;  %v9284_v34 = vmul.f32 %v8044_v58, %v9268_v0  ;;  %v3205_v40 = vmul.f32 %v8044_v58, %v9271_v7  ;;  %v3582_v60 = vsel %vm1160_vm3, %v3580_v32, %v3581_v30 }
 0x56c   : > { %v4719_v17 = vadd.f32 %v4626_v29, %v4483_v12  ;;  %v9292_v27 = vmul.f32 %v8050_v49, %v9268_v0  ;;  %v3440_v37 = vmul.f32 %v8050_v49, %v9271_v7  ;;  %v3645_v48 = vadd.f32 %v3582_v60, %v3410_v56 }
 0x56d   : > { %11048 = vst [vmem:[#allocation126_spill] sm:$0xff] %v9280_v53  ;;  %v9298_v5 = vmul.f32 %v8079_v10, %v9258_v61  ;;  %v10472_v39 = vrot.slane %v9284_v34, 1  ;;  %v3313_v24 = vrot.slane %v3205_v40, 1  ;;  %v3162_v58 = vmul.f32 %v8038_v9, %v9268_v0 }
 0x56e   : > { %v4752_v16 = vadd.f32 %v8234_v26, %v4719_v17  ;;  %v10471_v30 = vrot.slane %v9292_v27, 2  ;;  %v3548_v41 = vrot.slane %v3440_v37, 2  ;;  %v3060_v45 = vrot.slane %v9274_v3, 7 }
 0x56f   : > { %11049 = vst [vmem:[#allocation127_spill] sm:$0xff] %v9298_v5  ;;  %v3314_v62 = vsel %vm927_vm2, %v10472_v39, %v3313_v24  ;;  %v9311_v12 = vmul.f32 %v8071_v4, %v9271_v7  ;;  %v3662_v14 = vmul.f32 %v8064_v42, %v8884_v23  ;;  %v3735_v29 = vmul.f32 %v8071_v4, %v8884_v23  ;;  %v11059_v5 = vld [vmem:[#allocation17_spill] sm:$0xff] }
 0x570   : > { %4825 = vrot.lane.b32.xlu0 %v4752_v16, %s5462_s15  ;;  %v9317_v56 = vadd.f32 %v3314_v62, %v3162_v58  ;;  %v9322_v32 = vsel %vm1160_vm3, %v10471_v30, %v3548_v41  ;;  %v9326_v17 = vmul.f32 %v8079_v10, %v9271_v7  ;;  %v3626_v40 = vadd.f32 %v8755_v57, %v8750_v50 }
 0x571   : > { %v9331_v16 = vadd.f32 %v3349_v11, %v9157_v19  ;;  %v9336_v37 = vmul.f32 %v8182_v15, %v9258_v61  ;;  %v9339_v24 = vsel %vm673_vm1, %v3059_v54, %v3060_v45  ;;  %v9344_v62 = vsel %vm673_vm1, %v3060_v45, 0.0 }
 0x572   : > { %v3694_v50 = vadd.f32 %v3662_v14, %v3626_v40  ;;  %v9346_v57 = vadd.f32 %v3681_v36, %v3645_v48  ;;  %v9351_v11 = vmul.f32 %v8182_v15, %v9271_v7  ;;  %v3841_v47 = vrot.slane %v3735_v29, 1 }
 0x573   : > { %11050 = vst [vmem:[#allocation128_spill] sm:$0xff] %v9331_v16  ;;  %v9356_v58 = vmul.f32 %v8064_v42, %v9339_v24  ;;  %v9360_v45 = vmul.f32 %v8071_v4, %v9339_v24  ;;  %v3979_v36 = vmul.f32 %v8079_v10, %v8884_v23  ;;  %v9366_v48 = vmul.f32 %v8071_v4, %v9344_v62  ;;  %v11058_v16 = vld [vmem:[#allocation14_spill] sm:$0xff] }
 0x574   : > { %11051 = vst [vmem:[#allocation129_spill] sm:$0xff] %v9346_v57  ;;  %v11053_v14 = vrot.slane %v8917_v31, 1  ;;  %v4218_v40 = vmul.f32 %v8247_v51, %v9068_v38  ;;  %v4290_v41 = vmul.f32 %v8182_v15, %v9068_v38  ;;  %v4394_v60 = vrot.slane %v9140_v8, 1 }
 0x575   : > { %11052 = vst [vmem:[#allocation130_spill] sm:$0xff] %v9356_v58  ;;  %v4085_v30 = vrot.slane %v3979_v36, 2  ;;  %v4526_v23 = vmul.f32 %v8354_v59, %v9068_v38  ;;  %v4527_v54 = vmul.f32 %v8354_v59, %v9071_v44  ;;  %v3155_v31 = vmul.f32 %v8038_v9, %v8672_v46 }
 0x576   : > { %v3844_v29 = vsel %vm927_vm2, %v3841_v47, %v11053_v14  ;;  %v4392_v39 = vrot.slane %v4290_v41, 1  ;;  %v11054_v14 = vrot.slane %v8683_v18, 1  ;;  %v11055_v19 = vrot.slane %v8700_v52, 1 }
 0x577   : > { %v3938_v35 = vadd.f32 %v3844_v29, %v3694_v50  ;;  %v9389_v50 = vmul.f32 %v8079_v10, %v9339_v24  ;;  %v11056_v8 = vrot.slane %v8921_v33, 2  ;;  %v4628_v36 = vrot.slane %v4526_v23, 2 }
 0x578   : > { %v3297_v3 = vsel %vm927_vm2, %v11055_v19, %v11054_v14  ;;  %v3429_v44 = vmul.f32 %v8050_v49, %v8672_v46  ;;  %v9398_v29 = vmul.f32 %v8079_v10, %v9344_v62  ;;  %v4630_v52 = vrot.slane %v4527_v54, 2 }
 0x579   : > { %v4088_v41 = vsel %vm1160_vm3, %v4085_v30, %v11056_v8  ;;  %v3390_v21 = vadd.f32 %v3297_v3, %v3155_v31  ;;  %v4395_v19 = vsel %vm927_vm2, %v4392_v39, %v4394_v60  ;;  %v3734_v1 = vmul.f32 %v8071_v4, %v8873_v55 }
 0x57a   : > { %v4182_v18 = vadd.f32 %v4088_v41, %v3938_v35  ;;  %v3530_v14 = vrot.slane %v3429_v44, 2  ;;  %v3978_v33 = vmul.f32 %v8079_v10, %v8873_v55  ;;  %v3661_v46 = vmul.f32 %v8064_v42, %v8873_v55 }
 0x57b   : > { %v4289_v8 = vmul.f32 %v8182_v15, %v9062_v20  ;;  %v4525_v35 = vmul.f32 %v8354_v59, %v9062_v20  ;;  %v4631_v3 = vsel %vm1160_vm3, %v4628_v36, %v4630_v52  ;;  %v11057_v60 = vrot.slane %v8689_v2, 2 }
 0x57c   : > { %v4249_v23 = vadd.f32 %v4218_v40, %v4182_v18  ;;  %v3840_v31 = vrot.slane %v3734_v1, 1  ;;  %v4217_v41 = vmul.f32 %v8247_v51, %v9062_v20  ;;  %v4084_v18 = vrot.slane %v3978_v33, 2 }
 0x57d   : > { %v3532_v54 = vsel %vm1160_vm3, %v3530_v14, %v11057_v60  ;;  %v4391_v13 = vrot.slane %v4289_v8, 1  ;;  %v4627_v43 = vrot.slane %v4525_v35, 2  ;;  %v3628_v57 = vadd.f32 %v11059_v5, %v11058_v16 }
 0x57e   : > { %v4485_v40 = vadd.f32 %v4395_v19, %v4249_v23  ;;  %v3625_v44 = vadd.f32 %v3532_v54, %v3390_v21  ;;  %v3842_v58 = vsel %vm927_vm2, %v3840_v31, %v3841_v47  ;;  %v3664_v52 = vmul.f32 %v8064_v42, %v9068_v38 }
 0x57f   : > { %v4086_v1 = vsel %vm1160_vm3, %v4084_v18, %v4085_v30  ;;  %v4393_v14 = vsel %vm927_vm2, %v4391_v13, %v4392_v39  ;;  %v4629_v19 = vsel %vm1160_vm3, %v4627_v43, %v4628_v36  ;;  %v3738_v33 = vmul.f32 %v8071_v4, %v9068_v38  ;;  %v11062_v36 = vld [vmem:[#allocation76_spill] sm:$0xff] }
 0x580   : > { %v4721_v2 = vadd.f32 %v4631_v3, %v4485_v40  ;;  %v3693_v53 = vadd.f32 %v3661_v46, %v3625_v44  ;;  %v3696_v21 = vadd.f32 %v3664_v52, %v3628_v57  ;;  %v3982_v47 = vmul.f32 %v8079_v10, %v9068_v38  ;;  %v11064_v3 = vld [vmem:[#allocation106_spill] sm:$0xff]  ;;  %v11066_v52 = vld [vmem:[#allocation111_spill] sm:$0xff] }
 0x581   : > { %v4293_v23 = vmul.f32 %v8182_v15, %v9268_v0  ;;  %v4399_v46 = vrot.slane %v9351_v11, 1  ;;  %v3846_v30 = vrot.slane %v3738_v33, 1  ;;  %v4529_v13 = vmul.f32 %v8354_v59, %v9268_v0 }
 0x582   : > { %v4754_v5 = vadd.f32 %v8234_v26, %v4721_v2  ;;  %v3937_v16 = vadd.f32 %v3842_v58, %v3693_v53  ;;  %v4090_v8 = vrot.slane %v3982_v47, 2  ;;  %v4530_v43 = vmul.f32 %v8354_v59, %v9271_v7  ;;  %v11060_v58 = vld [vmem:[#allocation64_spill] sm:$0xff] }
 0x583   : > { %v4220_v38 = vmul.f32 %v8247_v51, %v9268_v0  ;;  %v4397_v53 = vrot.slane %v4293_v23, 1  ;;  %v11061_v57 = vrot.slane %v11060_v58, 1  ;;  %v11063_v35 = vrot.slane %v11062_v36, 1 }
 0x584   : > { %4829 = vrot.lane.b32.xlu1 %v4754_v5, %s5462_s15  ;;  %v4181_v39 = vadd.f32 %v4086_v1, %v3937_v16  ;;  %v11065_v60 = vrot.slane %v11064_v3, 1  ;;  %v4633_v31 = vrot.slane %v4529_v13, 2  ;;  %v4635_v40 = vrot.slane %v4530_v43, 2 }
 0x585   : > { %v3302_v11 = vsel %vm927_vm2, %v11063_v35, %v11061_v57  ;;  %v3157_v7 = vmul.f32 %v8038_v9, %v8873_v55  ;;  %v11067_v2 = vrot.slane %v11066_v52, 2  ;;  %v4400_v33 = vsel %vm927_vm2, %v4397_v53, %v4399_v46 }
 0x586   : > { %v3849_v54 = vsel %vm927_vm2, %v3846_v30, %v11065_v60  ;;  %v4248_v44 = vadd.f32 %v4217_v41, %v4181_v39  ;;  %v4636_v47 = vsel %vm1160_vm3, %v4633_v31, %v4635_v40  ;;  %v3432_v16 = vmul.f32 %v8050_v49, %v8873_v55 }
 0x587   : > { %v3940_v18 = vadd.f32 %v3849_v54, %v3696_v21  ;;  %v4093_v1 = vsel %vm1160_vm3, %v4090_v8, %v11067_v2  ;;  %v3392_v5 = vadd.f32 %v3302_v11, %v3157_v7  ;;  %v3737_v23 = vmul.f32 %v8071_v4, %v9062_v20  ;;  %v11068_v11 = vld [vmem:[#allocation92_spill] sm:$0xff] }
 0x588   : > { %v4484_v13 = vadd.f32 %v4393_v14, %v4248_v44  ;;  %v3663_v41 = vmul.f32 %v8064_v42, %v9062_v20  ;;  %v3981_v21 = vmul.f32 %v8079_v10, %v9062_v20  ;;  %v3535_v39 = vrot.slane %v3432_v16, 2 }
 0x589   : > { %v4184_v43 = vadd.f32 %v4093_v1, %v3940_v18  ;;  %v3845_v58 = vrot.slane %v3737_v23, 1  ;;  %v4292_v46 = vmul.f32 %v8182_v15, %v9246_v22  ;;  %v4528_v57 = vmul.f32 %v8354_v59, %v9246_v22  ;;  %v11070_v1 = vld [vmem:[#allocation86_spill] sm:$0xff]  ;;  %v11072_v23 = vld [vmem:[#allocation96_spill] sm:$0xff] }
 0x58a   : > { %v4720_v55 = vadd.f32 %v4629_v19, %v4484_v13  ;;  %v4089_v35 = vrot.slane %v3981_v21, 2  ;;  %v4219_v14 = vmul.f32 %v8247_v51, %v9246_v22  ;;  %v11069_v3 = vrot.slane %v11068_v11, 2 }
 0x58b   : > { %v4251_v36 = vadd.f32 %v4220_v38, %v4184_v43  ;;  %v3847_v54 = vsel %vm927_vm2, %v3845_v58, %v3846_v30  ;;  %v4396_v40 = vrot.slane %v4292_v46, 1  ;;  %v3159_v7 = vmul.f32 %v8038_v9, %v9062_v20 }
 0x58c   : > { %v3537_v60 = vsel %vm1160_vm3, %v3535_v39, %v11069_v3  ;;  %v4753_v44 = vadd.f32 %v8234_v26, %v4720_v55  ;;  %v4632_v19 = vrot.slane %v4528_v57, 2  ;;  %v4091_v38 = vsel %vm1160_vm3, %v4089_v35, %v4090_v8 }
 0x58d   : > { %v4487_v18 = vadd.f32 %v4400_v33, %v4251_v36  ;;  %v3627_v52 = vadd.f32 %v3537_v60, %v3392_v5  ;;  %v4398_v2 = vsel %vm927_vm2, %v4396_v40, %v4397_v53  ;;  %v11071_v16 = vrot.slane %v11070_v1, 1 }
 0x58e   : > { %v11073_v13 = vrot.slane %v11072_v23, 1  ;;  %v3435_v30 = vmul.f32 %v8050_v49, %v9062_v20  ;;  %4827 = vrot.lane.b32.xlu2 %v4753_v44, %s5462_s15  ;;  %v4634_v33 = vsel %vm1160_vm3, %v4632_v19, %v4633_v31  ;;  %v3740_v8 = vmul.f32 %v8071_v4, %v9246_v22  ;;  %v11076_v44 = vld [vmem:[#allocation66_spill] sm:$0xff] }
 0x58f   : > { %v4723_v21 = vadd.f32 %v4636_v47, %v4487_v18  ;;  %v3695_v39 = vadd.f32 %v3663_v41, %v3627_v52  ;;  %v3741_v53 = vmul.f32 %v8071_v4, %v9268_v0  ;;  %v3984_v46 = vmul.f32 %v8079_v10, %v9246_v22  ;;  %v11074_v41 = vld [vmem:[#allocation32_spill] sm:$0xff] }
 0x590   : > { %v3307_v43 = vsel %vm927_vm2, %v11073_v13, %v11071_v16  ;;  %v3540_v58 = vrot.slane %v3435_v30, 2  ;;  %v3665_v47 = vmul.f32 %v8064_v42, %v9246_v22  ;;  %v3985_v31 = vmul.f32 %v8079_v10, %v9268_v0  ;;  %v11077_v52 = vld [vmem:[#allocation56_spill] sm:$0xff] }
 0x591   : > { %v3394_v5 = vadd.f32 %v3307_v43, %v3159_v7  ;;  %v4756_v57 = vadd.f32 %v8234_v26, %v4723_v21  ;;  %v3939_v20 = vadd.f32 %v3847_v54, %v3695_v39  ;;  %v11075_v55 = vrot.slane %v11074_v41, 2 }
 0x592   : > { %v3850_v35 = vrot.slane %v3740_v8, 1  ;;  %v3851_v11 = vrot.slane %v3741_v53, 1  ;;  %v4094_v3 = vrot.slane %v3984_v46, 2  ;;  %v4095_v7 = vrot.slane %v3985_v31, 2  ;;  %v11078_v53 = vld [vmem:[#allocation46_spill] sm:$0xff] }
 0x593   : > { %v3542_v36 = vsel %vm1160_vm3, %v3540_v58, %v11075_v55  ;;  %v4183_v60 = vadd.f32 %v4091_v38, %v3939_v20  ;;  %v4295_v18 = vmul.f32 %v8182_v15, %v11076_v44  ;;  %v4296_v19 = vmul.f32 %v8182_v15, %v11077_v52  ;;  %v11079_v46 = vld [vmem:[#allocation122_spill] sm:$0xff] }
 0x594   : > { %v3629_v40 = vadd.f32 %v3542_v36, %v3394_v5  ;;  %v3852_v54 = vsel %vm927_vm2, %v3850_v35, %v3851_v11  ;;  %v4531_v1 = vmul.f32 %v8354_v59, %v11076_v44  ;;  %v4532_v16 = vmul.f32 %v8354_v59, %v11077_v52 }
 0x595   : > { %v4250_v23 = vadd.f32 %v4219_v14, %v4183_v60  ;;  %v4096_v38 = vsel %vm1160_vm3, %v4094_v3, %v4095_v7  ;;  %v4221_v43 = vmul.f32 %v8247_v51, %v11076_v44  ;;  %v4401_v30 = vrot.slane %v4295_v18, 1  ;;  %v11082_v60 = vld [vmem:[#allocation72_spill] sm:$0xff]  ;;  %v11083_v18 = vld [vmem:[#allocation61_spill] sm:$0xff] }
 0x596   : > { %v3697_v13 = vadd.f32 %v3665_v47, %v3629_v40  ;;  %v4402_v21 = vrot.slane %v4296_v19, 1  ;;  %v4637_v39 = vrot.slane %v4531_v1, 2  ;;  %v4638_v5 = vrot.slane %v4532_v16, 2  ;;  %4833 = vrot.lane.b32.xlu2 %v4756_v57, %s5462_s15 }
 0x597   : > { %v4486_v58 = vadd.f32 %v4398_v2, %v4250_v23  ;;  %v3630_v20 = vadd.f32 %v11079_v46, %v11078_v53  ;;  %v3666_v14 = vmul.f32 %v8064_v42, %v9268_v0  ;;  %v11080_v41 = vrot.slane %v9311_v12, 1 }
 0x598   : > { %v3941_v8 = vadd.f32 %v3852_v54, %v3697_v13  ;;  %v4403_v47 = vsel %vm927_vm2, %v4401_v30, %v4402_v21  ;;  %v4639_v31 = vsel %vm1160_vm3, %v4637_v39, %v4638_v5  ;;  %v11081_v36 = vrot.slane %v9326_v17, 2 }
 0x599   : > { %v3854_v55 = vsel %vm927_vm2, %v3851_v11, %v11080_v41  ;;  %v4722_v2 = vadd.f32 %v4634_v33, %v4486_v58  ;;  %v3698_v3 = vadd.f32 %v3666_v14, %v3630_v20  ;;  %v4404_v40 = vrot.slane %v11082_v60, 1 }
 0x59a   : > { %v4098_v57 = vsel %vm1160_vm3, %v4095_v7, %v11081_v36  ;;  %v4185_v35 = vadd.f32 %v4096_v38, %v3941_v8  ;;  %v4533_v0 = vmul.f32 %v8354_v59, %v11083_v18  ;;  %v3161_v54 = vmul.f32 %v8038_v9, %v9246_v22 }
 0x59b   : > { %v11084_v19 = vrot.slane %v9284_v34, 1  ;;  %v11085_v12 = vrot.slane %v9265_v6, 1  ;;  %v3438_v17 = vmul.f32 %v8050_v49, %v9246_v22  ;;  %v4755_v33 = vadd.f32 %v8234_v26, %v4722_v2 }
 0x59c   : > { %v4252_v7 = vadd.f32 %v4221_v43, %v4185_v35  ;;  %v3942_v1 = vadd.f32 %v3854_v55, %v3698_v3  ;;  %v4222_v16 = vmul.f32 %v8247_v51, %v11077_v52  ;;  %v4405_v23 = vsel %vm927_vm2, %v4402_v21, %v4404_v40  ;;  %v11087_v3 = vld [vmem:[#allocation74_spill] sm:$0xff]  ;;  %v11088_v40 = vld [vmem:[#allocation104_spill] sm:$0xff] }
 0x59d   : > { %v3312_v11 = vsel %vm927_vm2, %v11085_v12, %v11084_v19  ;;  %v4640_v13 = vrot.slane %v4533_v0, 2  ;;  %v3545_v30 = vrot.slane %v3438_v17, 2  ;;  %4831 = vrot.lane.b32.xlu0 %v4755_v33, %s5462_s15  ;;  %v3743_v39 = vmul.f32 %v8071_v4, %v11076_v44 }
 0x59e   : > { %v3396_v38 = vadd.f32 %v3312_v11, %v3161_v54  ;;  %v4488_v6 = vadd.f32 %v4403_v47, %v4252_v7  ;;  %v4186_v34 = vadd.f32 %v4098_v57, %v3942_v1  ;;  %v9547_v22 = vmul.f32 %v8071_v4, %v11077_v52  ;;  %v11089_v1 = vld [vmem:[#allocation77_spill] sm:$0xff] }
 0x59f   : > { %v11086_v43 = vrot.slane %v9292_v27, 2  ;;  %v3667_v21 = vmul.f32 %v8064_v42, %v11076_v44  ;;  %v3987_v8 = vmul.f32 %v8079_v10, %v11076_v44  ;;  %v9558_v53 = vmul.f32 %v8079_v10, %v11077_v52 }
 0x5a0   : > { %v4724_v46 = vadd.f32 %v4639_v31, %v4488_v6  ;;  %v4253_v20 = vadd.f32 %v4222_v16, %v4186_v34  ;;  %v4641_v14 = vsel %vm1160_vm3, %v4638_v5, %v4640_v13  ;;  %v3855_v41 = vrot.slane %v3743_v39, 1 }
 0x5a1   : > { %v3547_v58 = vsel %vm1160_vm3, %v3545_v30, %v11086_v43  ;;  %v10482_v27 = vrot.slane %v9547_v22, 1  ;;  %v4099_v55 = vrot.slane %v3987_v8, 2  ;;  %v10481_v36 = vrot.slane %v9558_v53, 2  ;;  %v11093_v8 = vld [vmem:[#allocation49_spill] sm:$0xff] }
 0x5a2   : > { %v3631_v47 = vadd.f32 %v3547_v58, %v3396_v38  ;;  %v4757_v57 = vadd.f32 %v8234_v26, %v4724_v46  ;;  %v4489_v2 = vadd.f32 %v4405_v23, %v4253_v20  ;;  %v4298_v60 = vmul.f32 %v8182_v15, %v11087_v3  ;;  %v11091_v23 = vld [vmem:[#allocation91_spill] sm:$0xff] }
 0x5a3   : > { %v3857_v31 = vsel %vm927_vm2, %v3855_v41, %v10482_v27  ;;  %v4223_v5 = vmul.f32 %v8247_v51, %v11087_v3  ;;  %v9573_v18 = vmul.f32 %v8182_v15, %v11088_v40  ;;  %v4534_v0 = vmul.f32 %v8354_v59, %v11087_v3  ;;  %v11094_v41 = vld [vmem:[#allocation107_spill] sm:$0xff] }
 0x5a4   : > { %v3699_v35 = vadd.f32 %v3667_v21, %v3631_v47  ;;  %4835 = vrot.lane.b32.xlu1 %v4757_v57, %s5462_s15  ;;  %v4725_v54 = vadd.f32 %v4641_v14, %v4489_v2  ;;  %v4101_v12 = vsel %vm1160_vm3, %v4099_v55, %v10481_v36  ;;  %v9583_v11 = vmul.f32 %v8354_v59, %v11088_v40 }
 0x5a5   : > { %v4406_v17 = vrot.slane %v4298_v60, 1  ;;  %v10480_v33 = vrot.slane %v9573_v18, 1  ;;  %v3165_v7 = vmul.f32 %v8038_v9, %v11087_v3  ;;  %v11090_v16 = vrot.slane %v11089_v1, 1 }
 0x5a6   : > { %v3943_v19 = vadd.f32 %v3857_v31, %v3699_v35  ;;  %v11092_v13 = vrot.slane %v11091_v23, 1  ;;  %v4758_v30 = vadd.f32 %v8234_v26, %v4725_v54  ;;  %v10479_v34 = vrot.slane %v9583_v11, 2  ;;  %v11098_v23 = vld [vmem:[#allocation119_spill] sm:$0xff] }
 0x5a7   : > { %v3444_v39 = vmul.f32 %v8050_v49, %v11087_v3  ;;  %v4408_v43 = vsel %vm927_vm2, %v4406_v17, %v10480_v33  ;;  %v4642_v58 = vrot.slane %v4534_v0, 2  ;;  %v3749_v46 = vmul.f32 %v8071_v4, %v11093_v8 }
 0x5a8   : > { %v3322_v38 = vsel %vm927_vm2, %v11092_v13, %v11090_v16  ;;  %v4187_v6 = vadd.f32 %v4101_v12, %v3943_v19  ;;  %4837 = vrot.lane.b32.xlu0 %v4758_v30, %s5462_s15  ;;  %v3671_v47 = vmul.f32 %v8064_v42, %v11093_v8  ;;  %v9607_v55 = vmul.f32 %v8071_v4, %v11094_v41  ;;  %v11097_v12 = vld [vmem:[#allocation23_spill] sm:$0xff] }
 0x5a9   : > { %v3400_v21 = vadd.f32 %v3322_v38, %v3165_v7  ;;  %v3555_v14 = vrot.slane %v3444_v39, 2  ;;  %v4644_v57 = vsel %vm1160_vm3, %v4642_v58, %v10479_v34  ;;  %v3865_v2 = vrot.slane %v3749_v46, 1 }
 0x5aa   : > { %v4254_v20 = vadd.f32 %v4223_v5, %v4187_v6  ;;  %v3993_v35 = vmul.f32 %v8079_v10, %v11093_v8  ;;  %v9616_v60 = vmul.f32 %v8079_v10, %v11094_v41  ;;  %v11095_v5 = vld [vmem:[#allocation73_spill] sm:$0xff]  ;;  %v10486_v19 = vrot.slane %v9607_v55, 1 }
 0x5ab   : > { %v11096_v0 = vrot.slane %v11095_v5, 2  ;;  %v4304_v17 = vmul.f32 %v8182_v15, %v11097_v12  ;;  %v4227_v16 = vmul.f32 %v8247_v51, %v11097_v12  ;;  %v9629_v13 = vmul.f32 %v8182_v15, %v11098_v23 }
 0x5ac   : > { %v4490_v31 = vadd.f32 %v4408_v43, %v4254_v20  ;;  %v10485_v1 = vrot.slane %v9616_v60, 2  ;;  %v3867_v30 = vsel %vm927_vm2, %v3865_v2, %v10486_v19  ;;  %v4109_v6 = vrot.slane %v3993_v35, 2  ;;  %v11099_v2 = vld [vmem:[#allocation88_spill] sm:$0xff] }
 0x5ad   : > { %v3557_v54 = vsel %vm1160_vm3, %v3555_v14, %v11096_v0  ;;  %v4540_v39 = vmul.f32 %v8354_v59, %v11097_v12  ;;  %v4416_v58 = vrot.slane %v4304_v17, 1  ;;  %v9639_v46 = vmul.f32 %v8354_v59, %v11098_v23 }
 0x5ae   : > { %v3635_v7 = vadd.f32 %v3557_v54, %v3400_v21  ;;  %v4726_v38 = vadd.f32 %v4644_v57, %v4490_v31  ;;  %v10484_v21 = vrot.slane %v9629_v13, 1  ;;  %v4111_v14 = vsel %vm1160_vm3, %v4109_v6, %v10485_v1  ;;  %v11101_v31 = vld [vmem:[#allocation75_spill] sm:$0xff]  ;;  %v11107_v1 = vld [vmem:[#allocation78_spill] sm:$0xff] }
 0x5af   : > { %v3163_v57 = vmul.f32 %v8038_v9, %v11076_v44  ;;  %v11100_v35 = vrot.slane %v11099_v2, 1  ;;  %v4652_v54 = vrot.slane %v4540_v39, 2  ;;  %v10483_v17 = vrot.slane %v9639_v46, 2 }
 0x5b0   : > { %v3703_v43 = vadd.f32 %v3671_v47, %v3635_v7  ;;  %v4759_v20 = vadd.f32 %v8234_v26, %v4726_v38  ;;  %v11102_v47 = vrot.slane %v11101_v31, 1  ;;  %v3441_v7 = vmul.f32 %v8050_v49, %v11076_v44 }
 0x5b1   : > { %v4418_v38 = vsel %vm927_vm2, %v4416_v58, %v10484_v21  ;;  %v3746_v2 = vmul.f32 %v8071_v4, %v11087_v3  ;;  %v3990_v44 = vmul.f32 %v8079_v10, %v11087_v3  ;;  %v3991_v31 = vmul.f32 %v8079_v10, %v11088_v40 }
 0x5b2   : > { %v3317_v5 = vsel %vm927_vm2, %v11102_v47, %v11100_v35  ;;  %v3947_v0 = vadd.f32 %v3867_v30, %v3703_v43  ;;  %4839 = vrot.lane.b32.xlu2 %v4759_v20, %s5462_s15  ;;  %v3747_v35 = vmul.f32 %v8071_v4, %v11088_v40  ;;  %v3550_v39 = vrot.slane %v3441_v7, 2 }
 0x5b3   : > { %v3398_v6 = vadd.f32 %v3317_v5, %v3163_v57  ;;  %v3669_v43 = vmul.f32 %v8064_v42, %v11087_v3  ;;  %v4654_v20 = vsel %vm1160_vm3, %v4652_v54, %v10483_v17  ;;  %v3860_v58 = vrot.slane %v3746_v2, 1  ;;  %v11103_v5 = vld [vmem:[#allocation69_spill] sm:$0xff] }
 0x5b4   : > { %v4191_v30 = vadd.f32 %v4111_v14, %v3947_v0  ;;  %v3861_v57 = vrot.slane %v3747_v35, 1  ;;  %v11104_v34 = vrot.slane %v11103_v5, 2  ;;  %v4225_v0 = vmul.f32 %v8247_v51, %v11093_v8 }
 0x5b5   : > { %v4301_v3 = vmul.f32 %v8182_v15, %v11093_v8  ;;  %v4104_v33 = vrot.slane %v3990_v44, 2  ;;  %v4105_v36 = vrot.slane %v3991_v31, 2  ;;  %v4302_v54 = vmul.f32 %v8182_v15, %v11094_v41  ;;  %v11105_v31 = vld [vmem:[#allocation80_spill] sm:$0xff] }
 0x5b6   : > { %v4258_v47 = vadd.f32 %v4227_v16, %v4191_v30  ;;  %v3552_v14 = vsel %vm1160_vm3, %v3550_v39, %v11104_v34  ;;  %v3862_v35 = vsel %vm927_vm2, %v3860_v58, %v3861_v57  ;;  %v4537_v16 = vmul.f32 %v8354_v59, %v11093_v8 }
 0x5b7   : > { %v3633_v7 = vadd.f32 %v3552_v14, %v3398_v6  ;;  %v4538_v34 = vmul.f32 %v8354_v59, %v11094_v41  ;;  %v4106_v39 = vsel %vm1160_vm3, %v4104_v33, %v4105_v36  ;;  %v4411_v5 = vrot.slane %v4301_v3, 1  ;;  %v11106_v14 = vld [vmem:[#allocation83_spill] sm:$0xff] }
 0x5b8   : > { %v4494_v2 = vadd.f32 %v4418_v38, %v4258_v47  ;;  %v4412_v27 = vrot.slane %v4302_v54, 1  ;;  %v4647_v44 = vrot.slane %v4537_v16, 2  ;;  %v3634_v17 = vadd.f32 %v11106_v14, %v11105_v31  ;;  %v11111_v31 = vld [vmem:[#allocation19_spill] sm:$0xff] }
 0x5b9   : > { %v3701_v30 = vadd.f32 %v3669_v43, %v3633_v7  ;;  %v3670_v38 = vmul.f32 %v8064_v42, %v11088_v40  ;;  %v4648_v21 = vrot.slane %v4538_v34, 2  ;;  %v11108_v19 = vrot.slane %v11107_v1, 1  ;;  %v11109_v7 = vld [vmem:[#allocation109_spill] sm:$0xff]  ;;  %v11114_v1 = vld [vmem:[#allocation39_spill] sm:$0xff] }
 0x5ba   : > { %v4730_v6 = vadd.f32 %v4654_v20, %v4494_v2  ;;  %v4413_v47 = vsel %vm927_vm2, %v4411_v5, %v4412_v27  ;;  %v11110_v20 = vrot.slane %v11109_v7, 2  ;;  %v4226_v2 = vmul.f32 %v8247_v51, %v11094_v41  ;;  %v11113_v5 = vld [vmem:[#allocation41_spill] sm:$0xff] }
 0x5bb   : > { %v3945_v58 = vadd.f32 %v3862_v35, %v3701_v30  ;;  %v3864_v43 = vsel %vm927_vm2, %v3861_v57, %v11108_v19  ;;  %v3702_v3 = vadd.f32 %v3670_v38, %v3634_v17  ;;  %v4414_v35 = vrot.slane %v11111_v31, 1  ;;  %v11112_v30 = vld [vmem:[#allocation105_spill] sm:$0xff] }
 0x5bc   : > { %v4763_v33 = vadd.f32 %v8234_v26, %v4730_v6  ;;  %v4108_v54 = vsel %vm1160_vm3, %v4105_v36, %v11110_v20  ;;  %v4539_v34 = vmul.f32 %v8354_v59, %v11112_v30  ;;  %v3638_v14 = vadd.f32 %v11114_v1, %v11113_v5  ;;  %v11115_v30 = vld [vmem:[#allocation120_spill] sm:$0xff] }
 0x5bd   : > { %v4189_v16 = vadd.f32 %v4106_v39, %v3945_v58  ;;  %v3946_v19 = vadd.f32 %v3864_v43, %v3702_v3  ;;  %v3674_v17 = vmul.f32 %v8064_v42, %v11098_v23  ;;  %v9711_v36 = vmul.f32 %v8071_v4, %v11098_v23 }
 0x5be   : > { %4847 = vrot.lane.b32.xlu1 %v4763_v33, %s5462_s15  ;;  %v9715_v57 = vmul.f32 %v8079_v10, %v11098_v23  ;;  %v4649_v6 = vsel %vm1160_vm3, %v4647_v44, %v4648_v21  ;;  %v4415_v38 = vsel %vm927_vm2, %v4412_v27, %v4414_v35  ;;  %v4650_v58 = vrot.slane %v4539_v34, 2  ;;  %v11118_v35 = vld [vmem:[#allocation29_spill] sm:$0xff] }
 0x5bf   : > { %v4256_v39 = vadd.f32 %v4225_v0, %v4189_v16  ;;  %v4190_v7 = vadd.f32 %v4108_v54, %v3946_v19  ;;  %v3706_v33 = vadd.f32 %v3674_v17, %v3638_v14  ;;  %v10487_v43 = vrot.slane %v9711_v36, 1  ;;  %v11116_v16 = vld [vmem:[#allocation117_spill] sm:$0xff]  ;;  %v11119_v19 = vld [vmem:[#allocation59_spill] sm:$0xff] }
 0x5c0   : > { %v10488_v3 = vrot.slane %v9715_v57, 2  ;;  %v4651_v31 = vsel %vm1160_vm3, %v4648_v21, %v4650_v58  ;;  %v4230_v5 = vmul.f32 %v8247_v51, %v11115_v30  ;;  %v9726_v0 = vmul.f32 %v8182_v15, %v11115_v30 }
 0x5c1   : > { %v4492_v20 = vadd.f32 %v4413_v47, %v4256_v39  ;;  %v4257_v44 = vadd.f32 %v4226_v2, %v4190_v7  ;;  %v11117_v27 = vrot.slane %v11116_v16, 1  ;;  %v4424_v34 = vrot.slane %v11118_v35, 1  ;;  %v11120_v39 = vld [vmem:[#allocation22_spill] sm:$0xff] }
 0x5c2   : > { %v9736_v47 = vmul.f32 %v8354_v59, %v11115_v30  ;;  %v4422_v14 = vrot.slane %v9726_v0, 1  ;;  %v4545_v17 = vmul.f32 %v8354_v59, %v11119_v19  ;;  %v11121_v58 = vrot.slane %v11120_v39, 2  ;;  %v11122_v16 = vld [vmem:[#allocation98_spill] sm:$0xff]  ;;  %v11124_v39 = vld [vmem:[#allocation115_spill] sm:$0xff] }
 0x5c3   : > { %v3874_v54 = vsel %vm927_vm2, %v10487_v43, %v11117_v27  ;;  %v4728_v21 = vadd.f32 %v4649_v6, %v4492_v20  ;;  %v4493_v2 = vadd.f32 %v4415_v38, %v4257_v44  ;;  %v11123_v27 = vld [vmem:[#allocation15_spill] sm:$0xff]  ;;  %v3672_v43 = vmul.f32 %v8064_v42, %v11094_v41 }
 0x5c4   : > { %v3950_v1 = vadd.f32 %v3874_v54, %v3706_v33  ;;  %v4118_v7 = vsel %vm1160_vm3, %v10488_v3, %v11121_v58  ;;  %v3636_v35 = vadd.f32 %v11123_v27, %v11122_v16  ;;  %v4658_v20 = vrot.slane %v9736_v47, 2  ;;  %v11131_v27 = vld [vmem:[#allocation42_spill] sm:$0xff] }
 0x5c5   : > { %v4761_v6 = vadd.f32 %v8234_v26, %v4728_v21  ;;  %v4660_v54 = vrot.slane %v4545_v17, 2  ;;  %v4729_v19 = vadd.f32 %v4651_v31, %v4493_v2  ;;  %v4425_v38 = vsel %vm927_vm2, %v4422_v14, %v4424_v34 }
 0x5c6   : > { %v4194_v33 = vadd.f32 %v4118_v7, %v3950_v1  ;;  %v3704_v44 = vadd.f32 %v3672_v43, %v3636_v35  ;;  %v11125_v58 = vrot.slane %v11124_v39, 1  ;;  %v11126_v3 = vrot.slane %v9607_v55, 1  ;;  %v11127_v1 = vld [vmem:[#allocation113_spill] sm:$0xff]  ;;  %v11130_v43 = vld [vmem:[#allocation43_spill] sm:$0xff] }
 0x5c7   : > { %v9762_v41 = vmul.f32 %v8182_v15, %v9344_v62  ;;  %4843 = vrot.lane.b32.xlu0 %v4761_v6, %s5462_s15  ;;  %v11128_v31 = vrot.slane %v11127_v1, 2  ;;  %v11129_v17 = vrot.slane %v9616_v60, 2  ;;  %v4419_v2 = vrot.slane %v11130_v43, 1  ;;  %v11132_v6 = vld [vmem:[#allocation101_spill] sm:$0xff] }
 0x5c8   : > { %v3869_v16 = vsel %vm927_vm2, %v11126_v3, %v11125_v58  ;;  %v4261_v21 = vadd.f32 %v4230_v5, %v4194_v33  ;;  %v4762_v7 = vadd.f32 %v8234_v26, %v4729_v19  ;;  %v4228_v3 = vmul.f32 %v8247_v51, %v11098_v23  ;;  %v11134_v58 = vld [vmem:[#allocation36_spill] sm:$0xff] }
 0x5c9   : > { %v4113_v34 = vsel %vm1160_vm3, %v11129_v17, %v11128_v31  ;;  %v3948_v55 = vadd.f32 %v3869_v16, %v3704_v44  ;;  %v4542_v35 = vmul.f32 %v8354_v59, %v11131_v27  ;;  %v4661_v5 = vsel %vm1160_vm3, %v4658_v20, %v4660_v54 }
 0x5ca   : > { %v4497_v39 = vadd.f32 %v4425_v38, %v4261_v21  ;;  %v3167_v60 = vmul.f32 %v8038_v9, %v11093_v8  ;;  %v11133_v33 = vrot.slane %v11132_v6, 1  ;;  %v11135_v1 = vrot.slane %v11134_v58, 1  ;;  %4845 = vrot.lane.b32.xlu2 %v4762_v7, %s5462_s15  ;;  %v11139_v6 = vld [vmem:[#allocation35_spill] sm:$0xff] }
 0x5cb   : > { %v4192_v23 = vadd.f32 %v4113_v34, %v3948_v55  ;;  %v11136_v44 = vrot.slane %v9629_v13, 1  ;;  %v4655_v16 = vrot.slane %v4542_v35, 2  ;;  %v3447_v54 = vmul.f32 %v8050_v49, %v11093_v8 }
 0x5cc   : > { %v3327_v19 = vsel %vm927_vm2, %v11135_v1, %v11133_v33  ;;  %v4733_v21 = vadd.f32 %v4661_v5, %v4497_v39  ;;  %v3752_v17 = vmul.f32 %v8071_v4, %v11097_v12  ;;  %v3996_v43 = vmul.f32 %v8079_v10, %v11097_v12  ;;  %v11138_v39 = vld [vmem:[#allocation52_spill] sm:$0xff] }
 0x5cd   : > { %v4420_v38 = vsel %vm927_vm2, %v11136_v44, %v4419_v2  ;;  %v3402_v31 = vadd.f32 %v3327_v19, %v3167_v60  ;;  %v9799_v34 = vmul.f32 %v8354_v59, %v9344_v62  ;;  %v4259_v13 = vadd.f32 %v4228_v3, %v4192_v23 }
 0x5ce   : > { %v3560_v2 = vrot.slane %v3447_v54, 2  ;;  %v4766_v7 = vadd.f32 %v8234_v26, %v4733_v21  ;;  %v11137_v8 = vrot.slane %v9639_v46, 2  ;;  %v3673_v35 = vmul.f32 %v8064_v42, %v11097_v12  ;;  %v11142_v54 = vld [vmem:[#allocation12_spill] sm:$0xff] }
 0x5cf   : > { %v4307_v5 = vmul.f32 %v8182_v15, %v11138_v39  ;;  %v4495_v60 = vadd.f32 %v4420_v38, %v4259_v13  ;;  %v11140_v33 = vrot.slane %v11139_v6, 2  ;;  %v3870_v58 = vrot.slane %v3752_v17, 1  ;;  %v11144_v17 = vld [vmem:[#allocation95_spill] sm:$0xff] }
 0x5d0   : > { %v4656_v55 = vsel %vm1160_vm3, %v11137_v8, %v4655_v16  ;;  %v4543_v3 = vmul.f32 %v8354_v59, %v11138_v39  ;;  %4853 = vrot.lane.b32.xlu1 %v4766_v7, %s5462_s15  ;;  %v4114_v1 = vrot.slane %v3996_v43, 2  ;;  %v4229_v19 = vmul.f32 %v8247_v51, %v11138_v39 }
 0x5d1   : > { %v3562_v62 = vsel %vm1160_vm3, %v3560_v2, %v11140_v33  ;;  %v3171_v23 = vmul.f32 %v8038_v9, %v11138_v39  ;;  %v4731_v44 = vadd.f32 %v4656_v55, %v4495_v60  ;;  %v11141_v38 = vrot.slane %v9711_v36, 1 }
 0x5d2   : > { %v3637_v46 = vadd.f32 %v3562_v62, %v3402_v31  ;;  %v11143_v21 = vrot.slane %v11142_v54, 1  ;;  %v11145_v13 = vrot.slane %v11144_v17, 1  ;;  %v3453_v31 = vmul.f32 %v8050_v49, %v11138_v39  ;;  %v11147_v62 = vld [vmem:[#allocation48_spill] sm:$0xff] }
 0x5d3   : > { %v3872_v16 = vsel %vm927_vm2, %v3870_v58, %v11141_v38  ;;  %v11146_v7 = vrot.slane %v9715_v57, 2  ;;  %v4421_v6 = vrot.slane %v4307_v5, 1  ;;  %v4764_v36 = vadd.f32 %v8234_v26, %v4731_v44 }
 0x5d4   : > { %v3337_v2 = vsel %vm927_vm2, %v11145_v13, %v11143_v21  ;;  %v3705_v43 = vadd.f32 %v3673_v35, %v3637_v46  ;;  %v4657_v60 = vrot.slane %v4543_v3, 2  ;;  %v3570_v33 = vrot.slane %v3453_v31, 2  ;;  %v11148_v21 = vld [vmem:[#allocation97_spill] sm:$0xff]  ;;  %v11151_v31 = vld [vmem:[#allocation87_spill] sm:$0xff] }
 0x5d5   : > { %v4116_v8 = vsel %vm1160_vm3, %v4114_v1, %v11146_v7  ;;  %v3406_v55 = vadd.f32 %v3337_v2, %v3171_v23  ;;  %v3758_v58 = vmul.f32 %v8071_v4, %v11147_v62  ;;  %v3677_v54 = vmul.f32 %v8064_v42, %v11147_v62  ;;  %4849 = vrot.lane.b32.xlu0 %v4764_v36, %s5462_s15  ;;  %v11149_v3 = vld [vmem:[#allocation53_spill] sm:$0xff] }
 0x5d6   : > { %v3949_v38 = vadd.f32 %v3872_v16, %v3705_v43  ;;  %v9839_v35 = vmul.f32 %v8071_v4, %v11148_v21  ;;  %v9843_v57 = vmul.f32 %v8079_v10, %v11148_v21  ;;  %v4423_v5 = vsel %vm927_vm2, %v4421_v6, %v4422_v14 }
 0x5d7   : > { %v11150_v46 = vrot.slane %v11149_v3, 2  ;;  %v4002_v23 = vmul.f32 %v8079_v10, %v11147_v62  ;;  %v4313_v44 = vmul.f32 %v8182_v15, %v9093_v28  ;;  %v3880_v13 = vrot.slane %v3758_v58, 1 }
 0x5d8   : > { %v4193_v16 = vadd.f32 %v4116_v8, %v3949_v38  ;;  %v3881_v2 = vrot.slane %v9839_v35, 1  ;;  %v4659_v0 = vsel %vm1160_vm3, %v4657_v60, %v4658_v20  ;;  %v10491_v14 = vrot.slane %v9843_v57, 2 }
 0x5d9   : > { %v3572_v1 = vsel %vm1160_vm3, %v3570_v33, %v11150_v46  ;;  %v9863_v43 = vmul.f32 %v8182_v15, %v11151_v31  ;;  %v4549_v7 = vmul.f32 %v8354_v59, %v9093_v28  ;;  %v9872_v47 = vmul.f32 %v8354_v59, %v11151_v31  ;;  %v11154_v46 = vld [vmem:[#allocation30_spill] sm:$0xff] }
 0x5da   : > { %v3641_v17 = vadd.f32 %v3572_v1, %v3406_v55  ;;  %v4260_v6 = vadd.f32 %v4229_v19, %v4193_v16  ;;  %v3882_v8 = vsel %vm927_vm2, %v3880_v13, %v3881_v2  ;;  %v4124_v20 = vrot.slane %v4002_v23, 2 }
 0x5db   : > { %v4233_v55 = vmul.f32 %v8247_v51, %v9093_v28  ;;  %v4431_v60 = vrot.slane %v4313_v44, 1  ;;  %v10490_v33 = vrot.slane %v9863_v43, 1  ;;  %v3169_v19 = vmul.f32 %v8038_v9, %v11097_v12 }
 0x5dc   : > { %v3709_v36 = vadd.f32 %v3677_v54, %v3641_v17  ;;  %v4496_v58 = vadd.f32 %v4423_v5, %v4260_v6  ;;  %v11152_v54 = vld [vmem:[#allocation112_spill] sm:$0xff]  ;;  %v11155_v1 = vrot.slane %v11154_v46, 1  ;;  %v4126_v23 = vsel %vm1160_vm3, %v4124_v20, %v10491_v14 }
 0x5dd   : > { %v11153_v3 = vrot.slane %v11152_v54, 1  ;;  %v4667_v17 = vrot.slane %v4549_v7, 2  ;;  %v10489_v44 = vrot.slane %v9872_v47, 2  ;;  %v3450_v5 = vmul.f32 %v8050_v49, %v11097_v12  ;;  %v11165_v14 = vld [vmem:[#allocation40_spill] sm:$0xff] }
 0x5de   : > { %v3953_v38 = vadd.f32 %v3882_v8, %v3709_v36  ;;  %v4732_v13 = vadd.f32 %v4659_v0, %v4496_v58  ;;  %v3755_v8 = vmul.f32 %v8071_v4, %v11138_v39  ;;  %v4433_v54 = vsel %vm927_vm2, %v4431_v60, %v10490_v33 }
 0x5df   : > { %v3332_v16 = vsel %vm927_vm2, %v11155_v1, %v11153_v3  ;;  %v3565_v3 = vrot.slane %v3450_v5, 2  ;;  %v3756_v20 = vmul.f32 %v8071_v4, %v11115_v30  ;;  %v4000_v7 = vmul.f32 %v8079_v10, %v11115_v30 }
 0x5e0   : > { %v4197_v6 = vadd.f32 %v4126_v23, %v3953_v38  ;;  %v3404_v36 = vadd.f32 %v3332_v16, %v3169_v19  ;;  %v4765_v46 = vadd.f32 %v8234_v26, %v4732_v13  ;;  %v3675_v0 = vmul.f32 %v8064_v42, %v11138_v39  ;;  %v11156_v38 = vld [vmem:[#allocation118_spill] sm:$0xff] }
 0x5e1   : > { %v3999_v58 = vmul.f32 %v8079_v10, %v11138_v39  ;;  %v11157_v19 = vrot.slane %v11156_v38, 2  ;;  %v3875_v1 = vrot.slane %v3755_v8, 1  ;;  %v3876_v16 = vrot.slane %v3756_v20, 1 }
 0x5e2   : > { %v4264_v12 = vadd.f32 %v4233_v55, %v4197_v6  ;;  %v4120_v23 = vrot.slane %v4000_v7, 2  ;;  %4851 = vrot.lane.b32.xlu2 %v4765_v46, %s5462_s15  ;;  %v4310_v55 = vmul.f32 %v8182_v15, %v11147_v62  ;;  %v4311_v13 = vmul.f32 %v8182_v15, %v11148_v21 }
 0x5e3   : > { %v3567_v60 = vsel %vm1160_vm3, %v3565_v3, %v11157_v19  ;;  %v4669_v39 = vsel %vm1160_vm3, %v4667_v17, %v10489_v44  ;;  %v3877_v6 = vsel %vm927_vm2, %v3875_v1, %v3876_v16  ;;  %v4546_v8 = vmul.f32 %v8354_v59, %v11147_v62 }
 0x5e4   : > { %v4500_v5 = vadd.f32 %v4433_v54, %v4264_v12  ;;  %v3639_v27 = vadd.f32 %v3567_v60, %v3404_v36  ;;  %v4547_v3 = vmul.f32 %v8354_v59, %v11148_v21  ;;  %v4119_v20 = vrot.slane %v3999_v58, 2 }
 0x5e5   : > { %v4427_v7 = vrot.slane %v4311_v13, 1  ;;  %v4439_v46 = vrot.slane %v9762_v41, 1  ;;  %v4231_v38 = vmul.f32 %v8247_v51, %v11147_v62  ;;  %v4426_v17 = vrot.slane %v4310_v55, 1 }
 0x5e6   : > { %v4736_v54 = vadd.f32 %v4669_v39, %v4500_v5  ;;  %v3707_v36 = vadd.f32 %v3675_v0, %v3639_v27  ;;  %v4121_v1 = vsel %vm1160_vm3, %v4119_v20, %v4120_v23  ;;  %v4663_v44 = vrot.slane %v4547_v3, 2  ;;  %v11158_v27 = vld [vmem:[#allocation103_spill] sm:$0xff]  ;;  %v11159_v0 = vld [vmem:[#allocation102_spill] sm:$0xff]  ;;  %v11160_v39 = vld [vmem:[#allocation13_spill] sm:$0xff] }
 0x5e7   : > { %v4428_v33 = vsel %vm927_vm2, %v4426_v17, %v4427_v7  ;;  %v4662_v5 = vrot.slane %v4546_v8, 2  ;;  %v3640_v58 = vadd.f32 %v11159_v0, %v11158_v27  ;;  %v3676_v41 = vmul.f32 %v8064_v42, %v11115_v30  ;;  %v11163_v20 = vld [vmem:[#allocation114_spill] sm:$0xff]  ;;  %v11164_v8 = vld [vmem:[#allocation99_spill] sm:$0xff] }
 0x5e8   : > { %v4769_v19 = vadd.f32 %v8234_v26, %v4736_v54  ;;  %v3951_v60 = vadd.f32 %v3877_v6, %v3707_v36  ;;  %v11161_v55 = vrot.slane %v11160_v39, 1  ;;  %v11162_v6 = vld [vmem:[#allocation47_spill] sm:$0xff]  ;;  %v4548_v3 = vmul.f32 %v8354_v59, %v11163_v20 }
 0x5e9   : > { %v4429_v36 = vrot.slane %v11162_v6, 1  ;;  %v3708_v17 = vadd.f32 %v3676_v41, %v3640_v58  ;;  %v3644_v12 = vadd.f32 %v11165_v14, %v11164_v8  ;;  %v3680_v27 = vmul.f32 %v8064_v42, %v11151_v31 }
 0x5ea   : > { %4859 = vrot.lane.b32.xlu1 %v4769_v19, %s5462_s15  ;;  %v4195_v13 = vadd.f32 %v4121_v1, %v3951_v60  ;;  %v3879_v54 = vsel %vm927_vm2, %v3876_v16, %v11161_v55  ;;  %v9944_v30 = vmul.f32 %v8071_v4, %v11151_v31  ;;  %v4664_v60 = vsel %vm1160_vm3, %v4662_v5, %v4663_v44  ;;  %v11166_v16 = vld [vmem:[#allocation16_spill] sm:$0xff] }
 0x5eb   : > { %v11167_v1 = vrot.slane %v11166_v16, 2  ;;  %v9952_v58 = vmul.f32 %v8079_v10, %v11151_v31  ;;  %v3952_v41 = vadd.f32 %v3879_v54, %v3708_v17  ;;  %v4232_v14 = vmul.f32 %v8247_v51, %v11148_v21 }
 0x5ec   : > { %v4262_v19 = vadd.f32 %v4231_v38, %v4195_v13  ;;  %v3712_v39 = vadd.f32 %v3680_v27, %v3644_v12  ;;  %v3886_v55 = vrot.slane %v9944_v30, 1  ;;  %v4430_v38 = vsel %vm927_vm2, %v4427_v7, %v4429_v36 }
 0x5ed   : > { %v4123_v0 = vsel %vm1160_vm3, %v4120_v23, %v11167_v1  ;;  %v4130_v5 = vrot.slane %v9952_v58, 2  ;;  %v9961_v13 = vmul.f32 %v8182_v15, %v9339_v24  ;;  %v4665_v20 = vrot.slane %v4548_v3, 2  ;;  %v11170_v3 = vld [vmem:[#allocation60_spill] sm:$0xff] }
 0x5ee   : > { %v4498_v6 = vadd.f32 %v4428_v33, %v4262_v19  ;;  %v4196_v23 = vadd.f32 %v4123_v0, %v3952_v41  ;;  %v11168_v8 = vrot.slane %v9183_v25, 1  ;;  %v9968_v12 = vmul.f32 %v8354_v59, %v9339_v24  ;;  %v11171_v19 = vld [vmem:[#allocation44_spill] sm:$0xff]  ;;  %v11172_v41 = vld [vmem:[#allocation18_spill] sm:$0xff] }
 0x5ef   : > { %v4236_v7 = vmul.f32 %v8247_v51, %v9339_v24  ;;  %v4437_v36 = vrot.slane %v9961_v13, 1  ;;  %v11169_v30 = vrot.slane %v9193_v63, 2  ;;  %v3642_v16 = vadd.f32 %v11171_v19, %v11170_v3  ;;  %v11181_v19 = vld [vmem:[#allocation34_spill] sm:$0xff] }
 0x5f0   : > { %v3889_v54 = vsel %vm927_vm2, %v3886_v55, %v11168_v8  ;;  %v4734_v17 = vadd.f32 %v4664_v60, %v4498_v6  ;;  %v4263_v27 = vadd.f32 %v4232_v14, %v4196_v23  ;;  %v3678_v1 = vmul.f32 %v8064_v42, %v11148_v21 }
 0x5f1   : > { %v3956_v33 = vadd.f32 %v3889_v54, %v3712_v39  ;;  %v4133_v25 = vsel %vm1160_vm3, %v4130_v5, %v11169_v30  ;;  %v4673_v24 = vrot.slane %v9968_v12, 2  ;;  %v11173_v39 = vrot.slane %v11172_v41, 1  ;;  %v11174_v54 = vld [vmem:[#allocation24_spill] sm:$0xff] }
 0x5f2   : > { %v4767_v60 = vadd.f32 %v8234_v26, %v4734_v17  ;;  %v4499_v14 = vadd.f32 %v4430_v38, %v4263_v27  ;;  %v4666_v6 = vsel %vm1160_vm3, %v4663_v44, %v4665_v20  ;;  %v4440_v13 = vsel %vm927_vm2, %v4437_v36, %v4439_v46  ;;  %v11176_v44 = vld [vmem:[#allocation121_spill] sm:$0xff]  ;;  %v11178_v46 = vld [vmem:[#allocation84_spill] sm:$0xff] }
 0x5f3   : > { %v4200_v0 = vadd.f32 %v4133_v25, %v3956_v33  ;;  %v3884_v63 = vsel %vm927_vm2, %v3881_v2, %v11173_v39  ;;  %v3710_v23 = vadd.f32 %v3678_v1, %v3642_v16  ;;  %v4234_v8 = vmul.f32 %v8247_v51, %v11151_v31  ;;  %v11175_v33 = vld [vmem:[#allocation45_spill] sm:$0xff] }
 0x5f4   : > { %4855 = vrot.lane.b32.xlu0 %v4767_v60, %s5462_s15  ;;  %v4434_v17 = vrot.slane %v11174_v54, 1  ;;  %v4551_v30 = vmul.f32 %v8354_v59, %v11175_v33  ;;  %v4735_v35 = vadd.f32 %v4666_v6, %v4499_v14  ;;  %v3173_v2 = vmul.f32 %v8038_v9, %v11147_v62 }
 0x5f5   : > { %v4267_v21 = vadd.f32 %v4236_v7, %v4200_v0  ;;  %v3954_v25 = vadd.f32 %v3884_v63, %v3710_v23  ;;  %v11177_v38 = vrot.slane %v11176_v44, 1  ;;  %v11179_v20 = vrot.slane %v11178_v46, 1 }
 0x5f6   : > { %v11180_v3 = vrot.slane %v9799_v34, 2  ;;  %v11182_v16 = vrot.slane %v11181_v19, 2  ;;  %v11183_v1 = vrot.slane %v9843_v57, 2  ;;  %v3456_v9 = vmul.f32 %v8050_v49, %v11147_v62 }
 0x5f7   : > { %v3342_v27 = vsel %vm927_vm2, %v11179_v20, %v11177_v38  ;;  %v4503_v7 = vadd.f32 %v4440_v13, %v4267_v21  ;;  %v4768_v0 = vadd.f32 %v8234_v26, %v4735_v35  ;;  %v4670_v39 = vrot.slane %v4551_v30, 2 }
 0x5f8   : > { %v4676_v31 = vsel %vm1160_vm3, %v4673_v24, %v11180_v3  ;;  %v4128_v60 = vsel %vm1160_vm3, %v11183_v1, %v11182_v16  ;;  %v3408_v63 = vadd.f32 %v3342_v27, %v3173_v2  ;;  %v11184_v34 = vrot.slane %v9863_v43, 1  ;;  %v11195_v1 = vld [vmem:[#allocation31_spill] sm:$0xff] }
 0x5f9   : > { %v4198_v41 = vadd.f32 %v4128_v60, %v3954_v25  ;;  %v4739_v14 = vadd.f32 %v4676_v31, %v4503_v7  ;;  %v3575_v13 = vrot.slane %v3456_v9, 2  ;;  %v3761_v23 = vmul.f32 %v8071_v4, %v9093_v28  ;;  %4857 = vrot.lane.b32.xlu2 %v4768_v0, %s5462_s15  ;;  %v11191_v31 = vld [vmem:[#allocation93_spill] sm:$0xff]  ;;  %v11197_v0 = vld [vmem:[#allocation126_spill] sm:$0xff] }
 0x5fa   : > { %v4435_v6 = vsel %vm927_vm2, %v11184_v34, %v4434_v17  ;;  %v3893_v57 = vrot.slane %v9366_v48, 1  ;;  %v3679_v49 = vmul.f32 %v8064_v42, %v9093_v28  ;;  %v4005_v62 = vmul.f32 %v8079_v10, %v9093_v28  ;;  %v11185_v17 = vld [vmem:[#allocation33_spill] sm:$0xff] }
 0x5fb   : > { %v4265_v21 = vadd.f32 %v4234_v8, %v4198_v41  ;;  %v4135_v54 = vrot.slane %v9389_v50, 2  ;;  %v4772_v43 = vadd.f32 %v8234_v26, %v4739_v14  ;;  %v11186_v33 = vrot.slane %v11185_v17, 2  ;;  %v11199_v34 = vld [vmem:[#allocation129_spill] sm:$0xff] }
 0x5fc   : > { %v3885_v4 = vrot.slane %v3761_v23, 1  ;;  %v11187_v48 = vrot.slane %v9872_v47, 2  ;;  %v4436_v2 = vrot.slane %v9336_v37, 1  ;;  %v4129_v28 = vrot.slane %v4005_v62, 2 }
 0x5fd   : > { %v3577_v30 = vsel %vm1160_vm3, %v3575_v13, %v11186_v33  ;;  %v4501_v35 = vadd.f32 %v4435_v6, %v4265_v21  ;;  %4865 = vrot.lane.b32.xlu1 %v4772_v43, %s5462_s15  ;;  %v3632_v50 = vadd.f32 %v9322_v32, %v9317_v56  ;;  %v3668_v44 = vmul.f32 %v8064_v42, %v11077_v52  ;;  %v11188_v52 = vld [vmem:[#allocation70_spill] sm:$0xff] }
 0x5fe   : > { %v4671_v8 = vsel %vm1160_vm3, %v11187_v48, %v4670_v39  ;;  %v3643_v25 = vadd.f32 %v3577_v30, %v3408_v63  ;;  %v3887_v10 = vsel %vm927_vm2, %v3885_v4, %v3886_v55  ;;  %v4137_v38 = vrot.slane %v9398_v29, 2  ;;  %v4810_v39 = vpop.permute.xlu2 %4809  ;;  %v11202_v4 = vld [vmem:[#allocation128_spill] sm:$0xff] }
 0x5ff   : > { %v4737_v46 = vadd.f32 %v4671_v8, %v4501_v35  ;;  %v4235_v20 = vmul.f32 %v8247_v51, %v9258_v61  ;;  %v4131_v37 = vsel %vm1160_vm3, %v4129_v28, %v4130_v5  ;;  %v4438_v55 = vsel %vm927_vm2, %v4436_v2, %v4437_v36  ;;  %v11192_v5 = vld [vmem:[#allocation71_spill] sm:$0xff]  ;;  %v11203_v35 = vld [vmem:[#allocation124_spill] sm:$0xff] }
 0x600   : > { %v3711_v47 = vadd.f32 %v3679_v49, %v3643_v25  ;;  %v4552_v27 = vmul.f32 %v8354_v59, %v9258_v61  ;;  %v3700_v56 = vadd.f32 %v3668_v44, %v3632_v50  ;;  %v11189_v29 = vrot.slane %v11188_v52, 1  ;;  %v11206_v44 = vld [vmem:[#allocation130_spill] sm:$0xff] }
 0x601   : > { %v4770_v32 = vadd.f32 %v8234_v26, %v4737_v46  ;;  %v11190_v7 = vrot.slane %v9547_v22, 1  ;;  %v4536_v58 = vmul.f32 %v8354_v59, %v11191_v31  ;;  %v11193_v16 = vrot.slane %v11192_v5, 2  ;;  %v4812_v5 = vpop.permute.xlu1 %4811 }
 0x602   : > { %v3955_v42 = vadd.f32 %v3887_v10, %v3711_v47  ;;  %v11194_v36 = vrot.slane %v9558_v53, 2  ;;  %v4409_v60 = vrot.slane %v11195_v1, 1  ;;  %v11196_v9 = vrot.slane %v9360_v45, 1  ;;  %v11200_v53 = vld [vmem:[#allocation127_spill] sm:$0xff] }
 0x603   : > { %v3859_v3 = vsel %vm927_vm2, %v11190_v7, %v11189_v29  ;;  %v11198_v41 = vrot.slane %v11197_v0, 1  ;;  %4861 = vrot.lane.b32.xlu0 %v4770_v32, %s5462_s15  ;;  %v4224_v14 = vmul.f32 %v8247_v51, %v11088_v40  ;;  %v11201_v13 = vrot.slane %v11200_v53, 2 }
 0x604   : > { %v3944_v19 = vadd.f32 %v3859_v3, %v3700_v56  ;;  %v4103_v61 = vsel %vm1160_vm3, %v11194_v36, %v11193_v16  ;;  %v4199_v63 = vadd.f32 %v4131_v37, %v3955_v42  ;;  %v4645_v49 = vrot.slane %v4536_v58, 2  ;;  %v11208_v16 = vld [vmem:[#allocation55_spill] sm:$0xff] }
 0x605   : > { %v3892_v22 = vsel %vm927_vm2, %v11198_v41, %v11196_v9  ;;  %v4136_v23 = vsel %vm1160_vm3, %v11201_v13, %v4135_v54  ;;  %v4237_v62 = vmul.f32 0.0, %v8247_v51  ;;  %v4319_v43 = vmul.f32 0.0, %v8182_v15  ;;  %v11212_v13 = vld [vmem:[#allocation82_spill] sm:$0xff] }
 0x606   : > { %v3957_v6 = vadd.f32 %v3892_v22, %v11199_v34  ;;  %v4188_v21 = vadd.f32 %v4103_v61, %v3944_v19  ;;  %v4266_v17 = vadd.f32 %v4235_v20, %v4199_v63  ;;  %v4555_v30 = vmul.f32 0.0, %v8354_v59  ;;  %v4816_v32 = vpop.permute.xlu2 %4815  ;;  %v11210_v22 = vld [vmem:[#allocation57_spill] sm:$0xff] }
 0x607   : > { %v3646_v48 = vadd.f32 %v11203_v35, %v11202_v4  ;;  %v11204_v40 = vmov %v11196_v9  ;;  %v4672_v25 = vrot.slane %v4552_v27, 2  ;;  %v11205_v10 = vrot.slane %v9573_v18, 1  ;;  %v11209_v9 = vld [vmem:[#allocation54_spill] sm:$0xff]  ;;  %v11215_v4 = vld [vmem:[#allocation25_spill] sm:$0xff] }
 0x608   : > { %v4201_v33 = vadd.f32 %v4136_v23, %v3957_v6  ;;  %v3894_v8 = vsel %vm927_vm2, %v11204_v40, %v3893_v57  ;;  %v4255_v2 = vadd.f32 %v4224_v14, %v4188_v21  ;;  %v4502_v51 = vadd.f32 %v4438_v55, %v4266_v17  ;;  %v11211_v14 = vld [vmem:[#allocation58_spill] sm:$0xff]  ;;  %v11213_v21 = vld [vmem:[#allocation108_spill] sm:$0xff]  ;;  %v11214_v17 = vld [vmem:[#allocation85_spill] sm:$0xff] }
 0x609   : > { %v4410_v28 = vsel %vm927_vm2, %v11205_v10, %v4409_v60  ;;  %v4441_v15 = vrot.slane %v4319_v43, 1  ;;  %v3714_v46 = vadd.f32 %v11206_v44, %v3646_v48  ;;  %v4674_v59 = vsel %vm1160_vm3, %v4672_v25, %v4673_v24  ;;  %v4818_v61 = vpop.permute.xlu1 %4817  ;;  %v4808_v60 = vpop.permute.xlu0 %4807 }
 0x60a   : > { %v4268_v50 = vadd.f32 %v4237_v62, %v4201_v33  ;;  %v4491_v47 = vadd.f32 %v4410_v28, %v4255_v2  ;;  %v11207_v45 = vrot.slane %v9583_v11, 2  ;;  %v4738_v20 = vadd.f32 %v4674_v59, %v4502_v51  ;;  %v11217_v28 = vld [vmem:[#allocation65_spill] sm:$0xff] }
 0x60b   : > { %v4677_v27 = vrot.slane %v4555_v30, 2  ;;  %v3958_v18 = vadd.f32 %v3894_v8, %v3714_v46  ;;  %v4138_v55 = vsel %vm1160_vm3, %v4135_v54, %v4137_v38  ;;  %v4903_v0 = vsel %vm2707_vm5, %v11209_v9, %v4808_v60  ;;  %v11216_v8 = vld [vmem:[#allocation28_spill] sm:$0xff]  ;;  %v11219_v46 = vld [vmem:[#allocation81_spill] sm:$0xff]  ;;  %v11232_v9 = vld [vmem:[#allocation123_spill] sm:$0xff] }
 0x60c   : > { %v4646_v57 = vsel %vm1160_vm3, %v11207_v45, %v4645_v49  ;;  %v4504_v37 = vadd.f32 %v4441_v15, %v4268_v50  ;;  %v4771_v42 = vadd.f32 %v8234_v26, %v4738_v20  ;;  %v4905_v34 = vsel %vm2707_vm5, %v11211_v14, %v4812_v5  ;;  %v11218_v50 = vld [vmem:[#allocation94_spill] sm:$0xff]  ;;  %v11221_v20 = vld [vmem:[#allocation100_spill] sm:$0xff] }
 0x60d   : > { %v4727_v56 = vadd.f32 %v4646_v57, %v4491_v47  ;;  %v4202_v29 = vadd.f32 %v4138_v55, %v3958_v18  ;;  %v4907_v49 = vsel %vm2707_vm5, %v11213_v21, %v4816_v32  ;;  %v11220_v47 = vld [vmem:[#allocation37_spill] sm:$0xff]  ;;  %v11224_v32 = vld [vmem:[#allocation27_spill] sm:$0xff] }
 0x60e   : > { %v4740_v52 = vadd.f32 %v4677_v27, %v4504_v37  ;;  %4863 = vrot.lane.b32.xlu2 %v4771_v42, %s5462_s15  ;;  %v4822_v31 = vpop.permute.xlu2 %4821  ;;  %v11237_v21 = vld [vmem:[#allocation79_spill] sm:$0xff] }
 0x60f   : > { %v4760_v12 = vadd.f32 %v8234_v26, %v4727_v56  ;;  %v4269_v24 = vadd.f32 %v4237_v62, %v4202_v29  ;;  %v4910_v25 = vsel %vm2707_vm5, %v11216_v8, %v4822_v31  ;;  %v11223_v56 = vld [vmem:[#allocation51_spill] sm:$0xff]  ;;  %v11225_v29 = vld [vmem:[#allocation90_spill] sm:$0xff]  ;;  %v5290_v8 = vld [vmem:[%s5595_s20 + $0x10] sm:$0xff] }
 0x610   : > { %v4773_v11 = vadd.f32 %v8234_v26, %v4740_v52 }
 0x611   : > { %4841 = vrot.lane.b32.xlu1 %v4760_v12, %s5462_s15  ;;  %v4505_v7 = vadd.f32 %v4441_v15, %v4269_v24  ;;  %v4824_v1 = vpop.permute.xlu1 %4823  ;;  %v4814_v6 = vpop.permute.xlu0 %4813 }
 0x612   : > { %4867 = vrot.lane.b32.xlu0 %v4773_v11, %s5462_s15  ;;  %v4906_v23 = vsel %vm2707_vm5, %v11212_v13, %v4814_v6  ;;  %v4911_v15 = vsel %vm2707_vm5, %v11218_v50, %v4824_v1  ;;  %v11226_v11 = vld [vmem:[#allocation50_spill] sm:$0xff]  ;;  %v11231_v1 = vld [vmem:[#allocation89_spill] sm:$0xff] }
 0x613   : > { %v4741_v3 = vadd.f32 %v4677_v27, %v4505_v7  ;;  %v11222_v27 = vld [vmem:[#allocation20_spill] sm:$0xff]  ;;  %v11236_v13 = vld [vmem:[#allocation62_spill] sm:$0xff] }
 0x614   : > { %v5292_v50 = vld [vmem:[%s5595_s20 + $0x18] sm:$0xff] }
 0x615   : > { %v4774_v54 = vadd.f32 %v8234_v26, %v4741_v3  ;;  %v4904_v26 = vsel %vm2707_vm5, %v11210_v22, %v4810_v39  ;;  %v4908_v39 = vsel %vm2707_vm5, %v11214_v17, %v4818_v61  ;;  %v11227_v3 = vld [vmem:[#allocation26_spill] sm:$0xff]  ;;  %v5289_v17 = vld [vmem:[%s5595_s20] sm:$0xff] }
 0x616   : > { %v4828_v38 = vpop.permute.xlu2 %4827 }
 0x617   : > { %4869 = vrot.lane.b32.xlu2 %v4774_v54, %s5462_s15  ;;  %v4913_v18 = vsel %vm2707_vm5, %v11222_v27, %v4828_v38  ;;  %v11228_v54 = vld [vmem:[#allocation68_spill] sm:$0xff] }
 0x619   : > { %v4830_v41 = vpop.permute.xlu1 %4829  ;;  %v4820_v62 = vpop.permute.xlu0 %4819 }
 0x61a   : > { %v4909_v35 = vsel %vm2707_vm5, %v11215_v4, %v4820_v62  ;;  %v4914_v42 = vsel %vm2707_vm5, %v11224_v32, %v4830_v41  ;;  %v11233_v41 = vld [vmem:[#allocation38_spill] sm:$0xff] }
 0x61e   : > { %v4834_v58 = vpop.permute.xlu2 %4833 }
 0x61f   : > { %v4916_v38 = vsel %vm2707_vm5, %v11228_v54, %v4834_v58 }
 0x621   : > { %v4836_v63 = vpop.permute.xlu1 %4835  ;;  %v4826_v33 = vpop.permute.xlu0 %4825 }
 0x622   : > { %v4912_v45 = vsel %vm2707_vm5, %v11220_v47, %v4826_v33  ;;  %v11238_v33 = vld [vmem:[#allocation21_spill] sm:$0xff] }
 0x626   : > { %v4840_v19 = vpop.permute.xlu2 %4839 }
 0x627   : > { %v4919_v36 = vsel %vm2707_vm5, %v11208_v16, %v4840_v19  ;;  %v11229_v19 = vld [vmem:[#allocation110_spill] sm:$0xff]  ;;  %v11230_v16 = vld [vmem:[#allocation116_spill] sm:$0xff] }
 0x629   : > { %v4832_v48 = vpop.permute.xlu0 %4831 }
 0x62a   : > { %v4915_v24 = vsel %vm2707_vm5, %v11226_v11, %v4832_v48 }
 0x62e   : > { %v4846_v57 = vpop.permute.xlu2 %4845 }
 0x62f   : > { %v4922_v37 = vsel %vm2707_vm5, %v11221_v20, %v4846_v57 }
 0x630   : > { %v4848_v53 = vpop.permute.xlu1 %4847 }
 0x631   : > { %v4838_v2 = vpop.permute.xlu0 %4837  ;;  %v4923_v55 = vsel %vm2707_vm5, %v11223_v56, %v4848_v53 }
 0x634   : > { %4967 = vxpose.xlu0.b32.start [1/16] (narrow) %v4919_v36, 16  ;;  %v4917_v36 = vsel %vm2707_vm5, %v11230_v16, %v4836_v63 }
 0x639   : > { %v4844_v44 = vpop.permute.xlu0 %4843 }
 0x63a   : > { %v4921_v59 = vsel %vm2707_vm5, %v11219_v46, %v4844_v44 }
 0x63c   : > { %v4852_v7 = vpop.permute.xlu2 %4851 }
 0x63d   : > { %v4925_v31 = vsel %vm2707_vm5, %v11227_v3, %v4852_v7 }
 0x642   : > { %v4854_v43 = vpop.permute.xlu1 %4853 }
 0x643   : > { %v4926_v5 = vsel %vm2707_vm5, %v11229_v19, %v4854_v43 }
 0x646   : > { %4935 = vxpose.xlu1.b32.start [1/16] (narrow) %v4903_v0, 16  ;;  %v4918_v0 = vsel %vm2707_vm5, %v11232_v9, %v4838_v2 }
 0x647   : > { %v4850_v52 = vpop.permute.xlu0 %4849 }
 0x648   : > { %v4924_v12 = vsel %vm2707_vm5, %v11225_v29, %v4850_v52 }
 0x64e   : > { %4936 = vxpose.xlu1.b32.cont [2/16] (narrow) %v4904_v26, 16  ;;  %v11234_v26 = vld [vmem:[#allocation63_spill] sm:$0xff] }
 0x653   : > { %v4858_v58 = vpop.permute.xlu2 %4857 }
 0x654   : > { %v4928_v22 = vsel %vm2707_vm5, %v11233_v41, %v4858_v58 }
 0x656   : > { %4937 = vxpose.xlu1.b32.cont [3/16] (narrow) %v4905_v34, 16  ;;  %v11235_v34 = vld [vmem:[#allocation67_spill] sm:$0xff] }
 0x65c   : > { %v4860_v30 = vpop.permute.xlu1 %4859 }
 0x65d   : > { %v4929_v63 = vsel %vm2707_vm5, %v11234_v26, %v4860_v30 }
 0x65e   : > { %4938 = vxpose.xlu1.b32.cont [4/16] (narrow) %v4906_v23, 16 }
 0x666   : > { %4939 = vxpose.xlu1.b32.cont [5/16] (narrow) %v4907_v49, 16  ;;  %v4856_v61 = vpop.permute.xlu0 %4855 }
 0x667   : > { %v4927_v60 = vsel %vm2707_vm5, %v11231_v1, %v4856_v61 }
 0x668   : > { %v4864_v53 = vpop.permute.xlu2 %4863 }
 0x669   : > { %v4931_v23 = vsel %vm2707_vm5, %v11236_v13, %v4864_v53 }
 0x66e   : > { %4940 = vxpose.xlu1.b32.cont [6/16] (narrow) %v4908_v39, 16 }
 0x66f   : > { %v4866_v40 = vpop.permute.xlu1 %4865 }
 0x670   : > { %v4932_v49 = vsel %vm2707_vm5, %v11237_v21, %v4866_v40 }
 0x671   : > { %v4870_v4 = vpop.permute.xlu2 %4869 }
 0x675   : > { %v4862_v14 = vpop.permute.xlu0 %4861 }
 0x676   : > { %4941 = vxpose.xlu1.b32.cont [7/16] (narrow) %v4909_v35, 16  ;;  %v4930_v6 = vsel %vm2707_vm5, %v11235_v34, %v4862_v14  ;;  %v11239_v35 = vld [vmem:[#allocation125_spill] sm:$0xff] }
 0x677   : > { %v4934_v48 = vsel %vm2707_vm5, %v11239_v35, %v4870_v4 }
 0x67e   : > { %4942 = vxpose.xlu1.b32.cont [8/16] (narrow) %v4910_v25, 16 }
 0x683   : > { %v4842_v10 = vpop.permute.xlu1 %4841 }
 0x684   : > { %v4920_v51 = vsel %vm2707_vm5, %v11217_v28, %v4842_v10  ;;  %v4868_v62 = vpop.permute.xlu0 %4867  ;;  %v5291_v10 = vld [vmem:[%s5595_s20 + $0x8] sm:$0xff] }
 0x685   : > { %4968 = vxpose.xlu0.b32.cont [2/16] (narrow) %v4920_v51, 16  ;;  %v4933_v30 = vsel %vm2707_vm5, %v11238_v33, %v4868_v62 }
 0x686   : > { %4943 = vxpose.xlu1.b32.cont [9/16] (narrow) %v4911_v15, 16 }
 0x68d   : > { %4969 = vxpose.xlu0.b32.cont [3/16] (narrow) %v4921_v59, 16 }
 0x68e   : > { %4944 = vxpose.xlu1.b32.cont [10/16] (narrow) %v4912_v45, 16 }
 0x695   : > { %4970 = vxpose.xlu0.b32.cont [4/16] (narrow) %v4922_v37, 16 }
 0x696   : > { %4945 = vxpose.xlu1.b32.cont [11/16] (narrow) %v4913_v18, 16 }
 0x69d   : > { %4971 = vxpose.xlu0.b32.cont [5/16] (narrow) %v4923_v55, 16 }
 0x69e   : > { %4946 = vxpose.xlu1.b32.cont [12/16] (narrow) %v4914_v42, 16 }
 0x6a5   : > { %4972 = vxpose.xlu0.b32.cont [6/16] (narrow) %v4924_v12, 16 }
 0x6a6   : > { %4947 = vxpose.xlu1.b32.cont [13/16] (narrow) %v4915_v24, 16 }
 0x6ad   : > { %4973 = vxpose.xlu0.b32.cont [7/16] (narrow) %v4925_v31, 16 }
 0x6ae   : > { %4948 = vxpose.xlu1.b32.cont [14/16] (narrow) %v4916_v38, 16 }
 0x6b5   : > { %4974 = vxpose.xlu0.b32.cont [8/16] (narrow) %v4926_v5, 16 }
 0x6b6   : > { %4949 = vxpose.xlu1.b32.cont [15/16] (narrow) %v4917_v36, 16 }
 0x6bd   : > { %4975 = vxpose.xlu0.b32.cont [9/16] (narrow) %v4927_v60, 16 }
 0x6be   : > { %4950 = vxpose.xlu1.b32.end [16/16] (narrow) %v4918_v0, 16 }
 0x6c5   : > { %4976 = vxpose.xlu0.b32.cont [10/16] (narrow) %v4928_v22, 16 }
 0x6cd   : > { %4977 = vxpose.xlu0.b32.cont [11/16] (narrow) %v4929_v63, 16 }
 0x6d5   : > { %4978 = vxpose.xlu0.b32.cont [12/16] (narrow) %v4930_v6, 16 }
 0x6dd   : > { %4979 = vxpose.xlu0.b32.cont [13/16] (narrow) %v4931_v23, 16 }
 0x6e5   : > { %4980 = vxpose.xlu0.b32.cont [14/16] (narrow) %v4932_v49, 16 }
 0x6ea   : > { %v4951_v43 = vpop.trf.xlu1 }
 0x6eb   : > { %v4999_v39 = vadd.f32 %v5289_v17, %v4951_v43 }
 0x6ed   : > { %4981 = vxpose.xlu0.b32.cont [15/16] (narrow) %v4933_v30, 16  ;;  %5003 = vst [vmem:[%s319_s16] sm:$0xff] %v4999_v39 }
 0x6f2   : > { %v4952_v40 = vpop.trf.xlu1 }
 0x6f3   : > { %v5001_v25 = vadd.f32 %v5290_v8, %v4952_v40 }
 0x6f5   : > { %4982 = vxpose.xlu0.b32.end [16/16] (narrow) %v4934_v48, 16  ;;  %5005 = vst [vmem:[%s319_s16 + $0x10] sm:$0xff] %v5001_v25 }
 0x721   : > { %v4983_v2 = vpop.trf.xlu0 }
 0x722   : > { %v5000_v28 = vadd.f32 %v5291_v10, %v4983_v2 }
 0x724   : > { %5004 = vst [vmem:[%s319_s16 + $0x8] sm:$0xff] %v5000_v28 }
 0x729   : > { %v4984_v51 = vpop.trf.xlu0 }
 0x72a   : > { %v5002_v15 = vadd.f32 %v5292_v50, %v4984_v51 }
 0x72c   : > { %5006 = vst [vmem:[%s319_s16 + $0x18] sm:$0xff] %v5002_v15 }
 0x72d   : > { %5410 = shalt.err (!%p5407_p8)
}
 0x72e   : > { %s5463_s20 = smov 256  }
 0x72f   : > { %5220 = dma.vmem_to_hbm [thread:$0]  (%p5542_p5), %s5021_s23, 512, %s5023_s29, %s5008_s8, %s5463_s20, %s5463_s20, %s5460_s21  }
 0x730 PF: > { %p5242_p9 = scmp.ge.s32.totalorder %s5453_s27, 2  ;;  %s5037_s17 = sand.u32 1, %s5441_s24  }
 0x731   : > { %s5038_s16 = scalar_lea.sflag [#allocation4], %s5037_s17 }
 0x732   : > { %p5233_p10 = pnand %p5242_p9, %p5546_p6 }
 0x734   : > { %p5234_p11 = pneg %p5233_p10 }
 0x736   : > { %5436 = dma.done.wait (%p5234_p11), %s5038_s16, 512  }
 0x737   : > { %5438 = vsyncadd (%p5234_p11), %s5038_s16, 4294966784  ;;  %p19_p12 = scmp.ge.s32.totalorder %s5529_s30, 4   ;;  %s11240_s24 = smov %s5445_s25 }
 0x738   : > { %s11241_s25 = smov %s5449_s26  ;;  %s11242_s26 = smov %s5540_s10 }
 0x739   : > { %s11243_s27 = smov %s5529_s30  ;;  %21 = sbr.rel (!%p19_p12) target bundleno = 7 (0x7), region = 96 }
 0x73e   :  { %5044 = vsyncpa [#allocation3], 1 }
 0x73f   :  { %5046 = vsyncpa [#allocation3 + $0x1], 1 }
 0x740   :  { %5047 = vsyncpa [#allocation6], 1 }
 0x741   :  { %5048 = vsyncpa [#allocation4], 1 }
 0x742   :  { %5050 = vsyncpa [#allocation4 + $0x1], 1 }

</bundles_post_ra>
